<compile_context>
chip_gen: v6e
topology: v6e:2x2x1
jax: 0.10.0
libtpu: 0.0.40
codegen_flags: <defaults>
</compile_context>

<pallas_src>
import functools

import jax
import jax.numpy as jnp
from jax.experimental import pallas as pl
from jax.experimental.pallas import tpu as pltpu

EPS = 1e-5          # torch.nn.InstanceNorm2d default eps
NHIDDEN = 128       # fixed in SPADE.__init__

_PAD_OFF = 8        # interior column offset inside halo scratch (sublane aligned)
_PAD_EXTRA = 16     # scratch W over-allocation (1-px halo + alignment); W % 8 == 0


# --------------------------------------------------------------------------
# Small helpers (footprint estimation for vmem_limit_bytes)
# --------------------------------------------------------------------------

def _pad_lane(c):
    return ((max(int(c), 1) + 127) // 128) * 128


def _pad_sub(n):
    return ((max(int(n), 1) + 7) // 8) * 8


def _vmem_limit(raw_bytes):
    # Explicit scoped-VMEM request: 2x the computed block/scratch footprint to
    # cover relayout temporaries, floored at 32 MiB, capped so v7x (64 MiB
    # physical VMEM) keeps headroom.
    return int(min(56 * 2 ** 20, max(32 * 2 ** 20, 2 * int(raw_bytes))))


def _conv_footprint(H, W, Cin, Cout, extra_in_channels=()):
    hw = _pad_sub(H * W)
    f = (2 * hw * _pad_lane(Cin) * 4                                   # x blocks
         + 2 * hw * _pad_lane(Cout) * 4                                # out blocks
         + _pad_sub(9 * Cin) * _pad_lane(Cout) * 2                     # weight
         + (H + 2) * _pad_sub(W + _PAD_EXTRA) * _pad_lane(Cin) * 2     # halo scratch
         + 3 * hw * _pad_lane(3 * Cin) * 2                             # im2col taps
         + 2 * hw * _pad_lane(Cout) * 4)                               # f32 acc temps
    for c in extra_in_channels:                                        # gb / residual
        f += 2 * hw * _pad_lane(c) * 4
    return f


# --------------------------------------------------------------------------
# Pallas kernels
# --------------------------------------------------------------------------

def _zero_halo_scratch_once(pad_ref):
    # The scratch persists across grid iterations and its interior is fully
    # overwritten every step, so the zero halo only needs to be written once.
    # Requires the grid axis to be "arbitrary" (sequential on one core).
    @pl.when(pl.program_id(0) == 0)
    def _():
        pad_ref[...] = jnp.zeros(pad_ref.shape, pad_ref.dtype)


def _im2col_matmul(pad_ref, w_ref, H, W, Cin):
    """3x3 im2col from the zero-haloed bf16 scratch as THREE accumulated MXU
    matmuls (one per kernel row, K = 3*Cin), instead of one (H*W, 9*Cin) slab.

    pad_ref: (H+2, W+_PAD_EXTRA, Cin) bf16; image interior at
             [1:H+1, _PAD_OFF:_PAD_OFF+W, :], everything else zero.
    w_ref:   (9*Cin, Cout) bf16 weight, rows ordered (kh, kw, cin).
    Returns  (H*W, Cout) float32 accumulator.
    """
    acc = None
    for kh in range(3):
        taps = jnp.concatenate(
            [pad_ref[kh:kh + H, _PAD_OFF - 1 + kw:_PAD_OFF - 1 + kw + W, :]
             for kw in range(3)], axis=-1)                   # (H, W, 3*Cin) bf16
        part = jnp.dot(taps.reshape(H * W, 3 * Cin),
                       w_ref[kh * 3 * Cin:(kh + 1) * 3 * Cin, :],
                       preferred_element_type=jnp.float32)
        acc = part if acc is None else acc + part
    return acc


def _conv3x3_kernel(x_ref, w_ref, b_ref, o_ref, pad_ref,
                    *, H, W, Cin, Cout, relu):
    # Plain 3x3 conv (stride 1, pad 1) + bias (+ ReLU), in-kernel halo.
    _zero_halo_scratch_once(pad_ref)
    pad_ref[1:H + 1, _PAD_OFF:_PAD_OFF + W, :] = x_ref[0].astype(jnp.bfloat16)
    acc = _im2col_matmul(pad_ref, w_ref, H, W, Cin) + b_ref[...]
    if relu:
        acc = jnp.maximum(acc, 0.0)
    o_ref[0] = acc.reshape(H, W, Cout)     # W % 8 == 0 -> layout-preserving


def _spade_modulate(x, gb, Cin, leaky):
    """InstanceNorm2dAlt (biased variance, two-pass stats, f32) followed by
    SPADE modulation out = x_hat * (1 + gamma) + beta, optional LeakyReLU(0.2)."""
    inv_n = 1.0 / (x.shape[0] * x.shape[1])
    mean = jnp.sum(x, axis=(0, 1), keepdims=True) * inv_n
    xc = x - mean
    var = jnp.sum(xc * xc, axis=(0, 1), keepdims=True) * inv_n
    x_hat = xc * jax.lax.rsqrt(var + EPS)
    h = x_hat * (1.0 + gb[:, :, :Cin]) + gb[:, :, Cin:]
    if leaky:
        h = jnp.where(h >= 0.0, h, 0.2 * h)
    return h


def _spade_conv3x3_kernel(x_ref, gb_ref, w_ref, b_ref, *rest,
                          H, W, Cin, Cout, leaky, has_residual):
    # Fused: instance-norm + SPADE modulation (+ LeakyReLU) + 3x3 conv + bias
    # (+ residual add).  x_ref: (1,H,W,Cin); gb_ref: (1,H,W,2*Cin);
    # w_ref: (9*Cin,Cout) bf16; b_ref: (1,Cout) f32.
    if has_residual:
        r_ref, o_ref, pad_ref = rest
    else:
        o_ref, pad_ref = rest
        r_ref = None
    _zero_halo_scratch_once(pad_ref)
    h = _spade_modulate(x_ref[0], gb_ref[0], Cin, leaky)      # f32
    pad_ref[1:H + 1, _PAD_OFF:_PAD_OFF + W, :] = h.astype(jnp.bfloat16)
    acc = _im2col_matmul(pad_ref, w_ref, H, W, Cin) + b_ref[...]
    if r_ref is not None:
        acc = acc + r_ref[0].reshape(H * W, Cout)
    o_ref[0] = acc.reshape(H, W, Cout)


def _spade_conv1x1_kernel(x_ref, gb_ref, w_ref, o_ref, *, H, W, Cin, Cout):
    # Fused shortcut path: instance-norm + SPADE modulation (no activation)
    # + 1x1 conv (no bias).  bf16 dot, f32 accumulation.
    h = _spade_modulate(x_ref[0], gb_ref[0], Cin, leaky=False)
    y = jnp.dot(h.reshape(H * W, Cin).astype(jnp.bfloat16), w_ref[...],
                preferred_element_type=jnp.float32)
    o_ref[0] = y.reshape(H, W, Cout)


# --------------------------------------------------------------------------
# Pallas wrappers
# --------------------------------------------------------------------------

def conv3x3(x, w, b, *, relu=False, cin_block=0):
    """3x3 conv, pad=1, stride=1.  x: (B,H,W,Cx); w: (3,3,Cin,Cout); b: (Cout,).
    `cin_block` selects a channel block of width Cin from x (Cx = k*Cin) via the
    BlockSpec index_map, so the fused mlp_shared output needs no HBM slice copy."""
    B, H, W, Cx = x.shape
    _, _, Cin, Cout = w.shape
    assert W % 8 == 0, "W must be a multiple of 8 (layout-preserving reshapes)"
    assert Cx % Cin == 0 and cin_block * Cin < Cx
    w9 = w.reshape(9 * Cin, Cout).astype(jnp.bfloat16)
    b2 = b.reshape(1, Cout).astype(jnp.float32)
    kernel = functools.partial(_conv3x3_kernel, H=H, W=W, Cin=Cin, Cout=Cout,
                               relu=relu)
    return pl.pallas_call(
        kernel,
        out_shape=jax.ShapeDtypeStruct((B, H, W, Cout), jnp.float32),
        grid=(B,),
        in_specs=[pl.BlockSpec((1, H, W, Cin), lambda i: (i, 0, 0, cin_block)),
                  pl.BlockSpec((9 * Cin, Cout), lambda i: (0, 0)),
                  pl.BlockSpec((1, Cout), lambda i: (0, 0))],
        out_specs=pl.BlockSpec((1, H, W, Cout), lambda i: (i, 0, 0, 0)),
        scratch_shapes=[pltpu.VMEM((H + 2, W + _PAD_EXTRA, Cin), jnp.bfloat16)],
        compiler_params=pltpu.CompilerParams(
            # "arbitrary": the zero-once halo init requires a sequential grid.
            dimension_semantics=("arbitrary",),
            vmem_limit_bytes=_vmem_limit(_conv_footprint(H, W, Cin, Cout))),
    )(x, w9, b2)


def spade_conv3x3(x, gb, w, b, *, leaky, residual=None):
    """Fused SPADE-norm(x; gamma,beta) (+LeakyReLU) -> 3x3 conv (+residual).
    x: (B,H,W,Cin); gb: (B,H,W,2*Cin) = concat(gamma, beta); w: (3,3,Cin,Cout)."""
    B, H, W, Cin = x.shape
    Cout = w.shape[-1]
    assert W % 8 == 0
    w9 = w.reshape(9 * Cin, Cout).astype(jnp.bfloat16)
    b2 = b.reshape(1, Cout).astype(jnp.float32)
    kernel = functools.partial(_spade_conv3x3_kernel, H=H, W=W, Cin=Cin,
                               Cout=Cout, leaky=leaky,
                               has_residual=residual is not None)
    in_specs = [pl.BlockSpec((1, H, W, Cin), lambda i: (i, 0, 0, 0)),
                pl.BlockSpec((1, H, W, 2 * Cin), lambda i: (i, 0, 0, 0)),
                pl.BlockSpec((9 * Cin, Cout), lambda i: (0, 0)),
                pl.BlockSpec((1, Cout), lambda i: (0, 0))]
    args = [x, gb, w9, b2]
    extra = [2 * Cin]
    if residual is not None:
        in_specs.append(pl.BlockSpec((1, H, W, Cout), lambda i: (i, 0, 0, 0)))
        args.append(residual)
        extra.append(Cout)
    return pl.pallas_call(
        kernel,
        out_shape=jax.ShapeDtypeStruct((B, H, W, Cout), jnp.float32),
        grid=(B,),
        in_specs=in_specs,
        out_specs=pl.BlockSpec((1, H, W, Cout), lambda i: (i, 0, 0, 0)),
        scratch_shapes=[pltpu.VMEM((H + 2, W + _PAD_EXTRA, Cin), jnp.bfloat16)],
        compiler_params=pltpu.CompilerParams(
            dimension_semantics=("arbitrary",),
            vmem_limit_bytes=_vmem_limit(
                _conv_footprint(H, W, Cin, Cout, extra))),
    )(*args)


def spade_conv1x1(x, gb, w):
    """Fused SPADE-norm(x; gamma,beta) -> 1x1 conv (no bias).  w: (Cin, Cout)."""
    B, H, W, Cin = x.shape
    Cout = w.shape[-1]
    assert W % 8 == 0
    hw = _pad_sub(H * W)
    raw = (2 * hw * (_pad_lane(Cin) + _pad_lane(2 * Cin) + _pad_lane(Cout)) * 4
           + _pad_sub(Cin) * _pad_lane(Cout) * 2
           + 3 * hw * _pad_lane(Cin) * 4)
    kernel = functools.partial(_spade_conv1x1_kernel, H=H, W=W, Cin=Cin,
                               Cout=Cout)
    return pl.pallas_call(
        kernel,
        out_shape=jax.ShapeDtypeStruct((B, H, W, Cout), jnp.float32),
        grid=(B,),
        in_specs=[pl.BlockSpec((1, H, W, Cin), lambda i: (i, 0, 0, 0)),
                  pl.BlockSpec((1, H, W, 2 * Cin), lambda i: (i, 0, 0, 0)),
                  pl.BlockSpec((Cin, Cout), lambda i: (0, 0))],
        out_specs=pl.BlockSpec((1, H, W, Cout), lambda i: (i, 0, 0, 0)),
        compiler_params=pltpu.CompilerParams(
            dimension_semantics=("parallel",),
            vmem_limit_bytes=_vmem_limit(raw)),
    )(x, gb, w.astype(jnp.bfloat16))


# --------------------------------------------------------------------------
# Glue (plain JAX): segmap resize, spectral norm, parameter setup
# --------------------------------------------------------------------------

def nearest_resize_nhwc(seg, H, W):
    """F.interpolate(mode='nearest') equivalent: src = floor(dst * in / out)."""
    B, h, w, C = seg.shape
    if (h, w) == (H, W):
        return seg
    rows = (jnp.arange(H) * h // H).astype(jnp.int32)
    cols = (jnp.arange(W) * w // W).astype(jnp.int32)
    return seg[:, rows][:, :, cols]


def spectral_normalize(w_hwio, key, n_iter=3, eps=1e-12):
    """Deterministic power-iteration spectral normalization (W / sigma)."""
    kh, kw, cin, cout = w_hwio.shape
    wm = jnp.transpose(w_hwio, (3, 2, 0, 1)).reshape(cout, -1)
    u = jax.random.normal(key, (cout,), jnp.float32)
    u = u / (jnp.linalg.norm(u) + eps)
    v = None
    for _ in range(n_iter):
        v = wm.T @ u
        v = v / (jnp.linalg.norm(v) + eps)
        u = wm @ v
        u = u / (jnp.linalg.norm(u) + eps)
    sigma = u @ (wm @ v)
    return w_hwio / sigma


def init_spade_params(key, norm_nc, label_nc):
    ks = jax.random.split(key, 6)
    return {
        'shared_w': 0.10 * jax.random.normal(ks[0], (3, 3, label_nc, NHIDDEN), jnp.float32),
        'shared_b': 0.05 * jax.random.normal(ks[1], (NHIDDEN,), jnp.float32),
        'gamma_w': 0.02 * jax.random.normal(ks[2], (3, 3, NHIDDEN, norm_nc), jnp.float32),
        'gamma_b': 0.05 * jax.random.normal(ks[3], (norm_nc,), jnp.float32),
        'beta_w': 0.02 * jax.random.normal(ks[4], (3, 3, NHIDDEN, norm_nc), jnp.float32),
        'beta_b': 0.05 * jax.random.normal(ks[5], (norm_nc,), jnp.float32),
    }


def init_params(key, fin, fout, label_nc):
    fmiddle = min(fin, fout)
    k = jax.random.split(key, 8)
    return {
        'conv_0_w': spectral_normalize(
            0.05 * jax.random.normal(k[0], (3, 3, fin, fmiddle), jnp.float32), k[1]),
        'conv_0_b': 0.05 * jax.random.normal(k[6], (fmiddle,), jnp.float32),
        'conv_1_w': spectral_normalize(
            0.05 * jax.random.normal(k[2], (3, 3, fmiddle, fout), jnp.float32), k[3]),
        'conv_1_b': 0.05 * jax.random.normal(k[7], (fout,), jnp.float32),
        'conv_s_w': spectral_normalize(
            0.05 * jax.random.normal(k[4], (1, 1, fin, fout), jnp.float32), k[5]),
        'norm_0': init_spade_params(jax.random.fold_in(key, 100), fin, label_nc),
        'norm_1': init_spade_params(jax.random.fold_in(key, 101), fmiddle, label_nc),
        'norm_s': init_spade_params(jax.random.fold_in(key, 102), fin, label_nc),
    }


# --------------------------------------------------------------------------
# Forward pass (Pallas-backed)
# --------------------------------------------------------------------------

def shortcut_spade_resnet_block(x_nchw, seg_nchw, params):
    x = jnp.transpose(x_nchw, (0, 2, 3, 1)).astype(jnp.float32)
    seg = jnp.transpose(seg_nchw, (0, 2, 3, 1)).astype(jnp.float32)
    B, H, W, _ = x.shape
    seg = nearest_resize_nhwc(seg, H, W)

    ns, n0, n1 = params['norm_s'], params['norm_0'], params['norm_1']

    # --- one fused conv for the three mlp_shared layers (Cout = 3*NHIDDEN) ---
    shared_w = jnp.concatenate([ns['shared_w'], n0['shared_w'], n1['shared_w']], axis=-1)
    shared_b = jnp.concatenate([ns['shared_b'], n0['shared_b'], n1['shared_b']], axis=-1)
    actv = conv3x3(seg, shared_w, shared_b, relu=True)      # (B,H,W,3*128)

    # --- per-norm gamma/beta convs fused into one conv each (Cout = 2*nc) ---
    def gamma_beta(p, block):
        w = jnp.concatenate([p['gamma_w'], p['beta_w']], axis=-1)
        b = jnp.concatenate([p['gamma_b'], p['beta_b']], axis=-1)
        return conv3x3(actv, w, b, cin_block=block)

    gb_s = gamma_beta(ns, 0)          # (B,H,W,2*fin)
    gb_0 = gamma_beta(n0, 1)          # (B,H,W,2*fin)
    gb_1 = gamma_beta(n1, 2)          # (B,H,W,2*fmiddle)

    # --- shortcut: conv_s(norm_s(x, seg)), fully fused ---
    ws = params['conv_s_w']
    x_s = spade_conv1x1(x, gb_s, ws.reshape(ws.shape[2], ws.shape[3]))

    # --- main branch: conv_0(leaky(norm_0(x))), conv_1(leaky(norm_1(.))) + x_s ---
    dx = spade_conv3x3(x, gb_0, params['conv_0_w'], params['conv_0_b'], leaky=True)
    out = spade_conv3x3(dx, gb_1, params['conv_1_w'], params['conv_1_b'],
                        leaky=True, residual=x_s)

    return jnp.transpose(out, (0, 3, 1, 2))


# --------------------------------------------------------------------------
# Pure-JAX reference (f32, HIGHEST precision, for correctness check)
# --------------------------------------------------------------------------

def reference_block(x_nchw, seg_nchw, params):
    x = jnp.transpose(x_nchw, (0, 2, 3, 1)).astype(jnp.float32)
    seg = jnp.transpose(seg_nchw, (0, 2, 3, 1)).astype(jnp.float32)
    B, H, W, _ = x.shape
    seg = nearest_resize_nhwc(seg, H, W)

    def ref_conv(xx, w, b=None, pad=1):
        y = jax.lax.conv_general_dilated(
            xx, w, (1, 1), [(pad, pad), (pad, pad)],
            dimension_numbers=('NHWC', 'HWIO', 'NHWC'),
            precision=jax.lax.Precision.HIGHEST)
        return y if b is None else y + b

    def ref_spade(xx, p, leaky):
        mean = jnp.mean(xx, axis=(1, 2), keepdims=True)
        var = jnp.mean((xx - mean) ** 2, axis=(1, 2), keepdims=True)
        normalized = (xx - mean) / jnp.sqrt(var + EPS)
        actv = jnp.maximum(ref_conv(seg, p['shared_w'], p['shared_b']), 0.0)
        gamma = ref_conv(actv, p['gamma_w'], p['gamma_b'])
        beta = ref_conv(actv, p['beta_w'], p['beta_b'])
        out = normalized * (1.0 + gamma) + beta
        return jnp.where(out >= 0, out, 0.2 * out) if leaky else out

    x_s = ref_conv(ref_spade(x, params['norm_s'], False), params['conv_s_w'], pad=0)
    dx = ref_conv(ref_spade(x, params['norm_0'], True),
                  params['conv_0_w'], params['conv_0_b'])
    dx = ref_conv(ref_spade(dx, params['norm_1'], True),
                  params['conv_1_w'], params['conv_1_b'])
    return jnp.transpose(x_s + dx, (0, 3, 1, 2))


# --------------------------------------------------------------------------

if __name__ == "__main__":
    fin, fout, label_nc = 4, 8, 3
    B, H, W = 2, 16, 16

    key = jax.random.PRNGKey(0)
    kp, kx, ks = jax.random.split(key, 3)
    params = init_params(kp, fin, fout, label_nc)

    x = jax.random.normal(kx, (B, fin, H, W), jnp.float32)              # NCHW
    seg1 = jax.random.normal(ks, (B, label_nc, H // 2, W // 2), jnp.float32)

    out = shortcut_spade_resnet_block(x, seg1, params)
    out = jax.block_until_ready(out)
    assert out.shape == (B, fout, H, W), out.shape

    ref = jax.block_until_ready(reference_block(x, seg1, params))
    max_err = float(jnp.max(jnp.abs(out - ref)))
    # Tolerance re-budgeted for bf16 MXU inputs (f32 accumulation / stats) vs
    # the f32 HIGHEST-precision reference; structural bugs produce O(1) errors.
    assert max_err < 1e-1, f"max abs err too large: {max_err}"

    print("KERNEL_OK")
</pallas_src>

<mosaic_0001>
module attributes {stable_mosaic.version = 11 : i64} {
  func.func @_conv3x3_kernel(%arg0: i32, %arg1: memref<1x16x16x3xf32, #tpu.memory_space<vmem>>, %arg2: memref<27x384xbf16, #tpu.memory_space<vmem>>, %arg3: memref<1x384xf32, #tpu.memory_space<vmem>>, %arg4: memref<1x16x16x384xf32, #tpu.memory_space<vmem>>, %arg5: memref<18x32x3xbf16, #tpu.memory_space<vmem>>) attributes {dimension_semantics = [#tpu.dimension_semantics<arbitrary>], iteration_bounds = array<i64: 2>, scalar_prefetch = 0 : i64, scratch_operands = 1 : i64, tpu.core_type = #tpu.core_type<tc>, window_params = [{transform_indices = @transform_0, window_bounds = array<i64: 1, 16, 16, 3>}, {pipeline_mode = #tpu.pipeline_mode<synchronous>, transform_indices = @transform_1, window_bounds = array<i64: 27, 384>}, {pipeline_mode = #tpu.pipeline_mode<synchronous>, transform_indices = @transform_2, window_bounds = array<i64: 1, 384>}, {transform_indices = @transform_3, window_bounds = array<i64: 1, 16, 16, 384>}]} {
    %c0_i32 = arith.constant 0 : i32
    %0 = arith.cmpi eq, %arg0, %c0_i32 : i32
    %1 = arith.extui %0 : i1 to i32
    %c0_i32_0 = arith.constant 0 : i32
    %2 = arith.cmpi ne, %1, %c0_i32_0 : i32
    scf.if %2 {
      %cst_43 = arith.constant 0.000000e+00 : bf16
      %39 = vector.broadcast %cst_43 : bf16 to vector<18x32x3xbf16>
      %c0_44 = arith.constant 0 : index
      %c0_45 = arith.constant 0 : index
      %c0_46 = arith.constant 0 : index
      %40 = vector.load %arg5[%c0_44, %c0_45, %c0_46] : memref<18x32x3xbf16, #tpu.memory_space<vmem>>, vector<18x32x3xbf16>
      tpu.vector_store %arg5[%c0_44, %c0_45, %c0_46], %39 {strides = array<i32>} : memref<18x32x3xbf16, #tpu.memory_space<vmem>>, vector<18x32x3xbf16>,
    } else {
    }
    %c0 = arith.constant 0 : index
    %c0_1 = arith.constant 0 : index
    %c0_2 = arith.constant 0 : index
    %c0_3 = arith.constant 0 : index
    %3 = vector.load %arg1[%c0, %c0_1, %c0_2, %c0_3] : memref<1x16x16x3xf32, #tpu.memory_space<vmem>>, vector<1x16x16x3xf32>
    %4 = vector.shape_cast %3 : vector<1x16x16x3xf32> to vector<16x16x3xf32>
    %5 = arith.truncf %4 : vector<16x16x3xf32> to vector<16x16x3xbf16>
    %c1 = arith.constant 1 : index
    %c8 = arith.constant 8 : index
    %c0_4 = arith.constant 0 : index
    %6 = vector.load %arg5[%c1, %c8, %c0_4] : memref<18x32x3xbf16, #tpu.memory_space<vmem>>, vector<16x16x3xbf16>
    tpu.vector_store %arg5[%c1, %c8, %c0_4], %5 {strides = array<i32>} : memref<18x32x3xbf16, #tpu.memory_space<vmem>>, vector<16x16x3xbf16>,
    %c0_5 = arith.constant 0 : index
    %c7 = arith.constant 7 : index
    %c0_6 = arith.constant 0 : index
    %7 = vector.load %arg5[%c0_5, %c7, %c0_6] : memref<18x32x3xbf16, #tpu.memory_space<vmem>>, vector<16x16x3xbf16>
    %c0_7 = arith.constant 0 : index
    %c8_8 = arith.constant 8 : index
    %c0_9 = arith.constant 0 : index
    %8 = vector.load %arg5[%c0_7, %c8_8, %c0_9] : memref<18x32x3xbf16, #tpu.memory_space<vmem>>, vector<16x16x3xbf16>
    %c0_10 = arith.constant 0 : index
    %c9 = arith.constant 9 : index
    %c0_11 = arith.constant 0 : index
    %9 = vector.load %arg5[%c0_10, %c9, %c0_11] : memref<18x32x3xbf16, #tpu.memory_space<vmem>>, vector<16x16x3xbf16>
    %10 = tpu.concatenate %7, %8, %9 in 2 : vector<16x16x3xbf16>, vector<16x16x3xbf16>, vector<16x16x3xbf16> -> vector<16x16x9xbf16>
    %11 = vector.shape_cast %10 : vector<16x16x9xbf16> to vector<256x9xbf16>
    %c0_12 = arith.constant 0 : index
    %c0_13 = arith.constant 0 : index
    %12 = vector.load %arg2[%c0_12, %c0_13] : memref<27x384xbf16, #tpu.memory_space<vmem>>, vector<9x384xbf16>
    %cst = arith.constant dense<0.000000e+00> : vector<256x384xf32>
    %13 = tpu.matmul %11, %12, %cst {dimension_numbers = #tpu.dot_dimension_numbers<[1], [0], [0], [1], [0, 0, 1, 1], [], []>} : vector<256x9xbf16>, vector<9x384xbf16>, vector<256x384xf32> -> vector<256x384xf32>
    %c1_14 = arith.constant 1 : index
    %c7_15 = arith.constant 7 : index
    %c0_16 = arith.constant 0 : index
    %14 = vector.load %arg5[%c1_14, %c7_15, %c0_16] : memref<18x32x3xbf16, #tpu.memory_space<vmem>>, vector<16x16x3xbf16>
    %c1_17 = arith.constant 1 : index
    %c8_18 = arith.constant 8 : index
    %c0_19 = arith.constant 0 : index
    %15 = vector.load %arg5[%c1_17, %c8_18, %c0_19] : memref<18x32x3xbf16, #tpu.memory_space<vmem>>, vector<16x16x3xbf16>
    %c1_20 = arith.constant 1 : index
    %c9_21 = arith.constant 9 : index
    %c0_22 = arith.constant 0 : index
    %16 = vector.load %arg5[%c1_20, %c9_21, %c0_22] : memref<18x32x3xbf16, #tpu.memory_space<vmem>>, vector<16x16x3xbf16>
    %17 = tpu.concatenate %14, %15, %16 in 2 : vector<16x16x3xbf16>, vector<16x16x3xbf16>, vector<16x16x3xbf16> -> vector<16x16x9xbf16>
    %18 = vector.shape_cast %17 : vector<16x16x9xbf16> to vector<256x9xbf16>
    %c9_23 = arith.constant 9 : index
    %c0_24 = arith.constant 0 : index
    %19 = vector.load %arg2[%c9_23, %c0_24] : memref<27x384xbf16, #tpu.memory_space<vmem>>, vector<9x384xbf16>
    %cst_25 = arith.constant dense<0.000000e+00> : vector<256x384xf32>
    %20 = tpu.matmul %18, %19, %cst_25 {dimension_numbers = #tpu.dot_dimension_numbers<[1], [0], [0], [1], [0, 0, 1, 1], [], []>} : vector<256x9xbf16>, vector<9x384xbf16>, vector<256x384xf32> -> vector<256x384xf32>
    %21 = arith.addf %13, %20 : vector<256x384xf32>
    %c2 = arith.constant 2 : index
    %c7_26 = arith.constant 7 : index
    %c0_27 = arith.constant 0 : index
    %22 = vector.load %arg5[%c2, %c7_26, %c0_27] : memref<18x32x3xbf16, #tpu.memory_space<vmem>>, vector<16x16x3xbf16>
    %c2_28 = arith.constant 2 : index
    %c8_29 = arith.constant 8 : index
    %c0_30 = arith.constant 0 : index
    %23 = vector.load %arg5[%c2_28, %c8_29, %c0_30] : memref<18x32x3xbf16, #tpu.memory_space<vmem>>, vector<16x16x3xbf16>
    %c2_31 = arith.constant 2 : index
    %c9_32 = arith.constant 9 : index
    %c0_33 = arith.constant 0 : index
    %24 = vector.load %arg5[%c2_31, %c9_32, %c0_33] : memref<18x32x3xbf16, #tpu.memory_space<vmem>>, vector<16x16x3xbf16>
    %25 = tpu.concatenate %22, %23, %24 in 2 : vector<16x16x3xbf16>, vector<16x16x3xbf16>, vector<16x16x3xbf16> -> vector<16x16x9xbf16>
    %26 = vector.shape_cast %25 : vector<16x16x9xbf16> to vector<256x9xbf16>
    %c18 = arith.constant 18 : index
    %c0_34 = arith.constant 0 : index
    %27 = vector.load %arg2[%c18, %c0_34] : memref<27x384xbf16, #tpu.memory_space<vmem>>, vector<9x384xbf16>
    %cst_35 = arith.constant dense<0.000000e+00> : vector<256x384xf32>
    %28 = tpu.matmul %26, %27, %cst_35 {dimension_numbers = #tpu.dot_dimension_numbers<[1], [0], [0], [1], [0, 0, 1, 1], [], []>} : vector<256x9xbf16>, vector<9x384xbf16>, vector<256x384xf32> -> vector<256x384xf32>
    %29 = arith.addf %21, %28 : vector<256x384xf32>
    %c0_36 = arith.constant 0 : index
    %c0_37 = arith.constant 0 : index
    %30 = vector.load %arg3[%c0_36, %c0_37] : memref<1x384xf32, #tpu.memory_space<vmem>>, vector<1x384xf32>
    %31 = vector.broadcast %30 : vector<1x384xf32> to vector<256x384xf32>
    %32 = arith.addf %29, %31 : vector<256x384xf32>
    %cst_38 = arith.constant 0.000000e+00 : f32
    %33 = vector.broadcast %cst_38 : f32 to vector<256x384xf32>
    %34 = arith.maximumf %32, %33 : vector<256x384xf32>
    %35 = vector.shape_cast %34 : vector<256x384xf32> to vector<16x16x384xf32>
    %c0_39 = arith.constant 0 : index
    %c0_40 = arith.constant 0 : index
    %c0_41 = arith.constant 0 : index
    %c0_42 = arith.constant 0 : index
    %36 = vector.load %arg4[%c0_39, %c0_40, %c0_41, %c0_42] : memref<1x16x16x384xf32, #tpu.memory_space<vmem>>, vector<1x16x16x384xf32>
    %37 = vector.shape_cast %36 : vector<1x16x16x384xf32> to vector<16x16x384xf32>
    %38 = vector.shape_cast %35 : vector<16x16x384xf32> to vector<1x16x16x384xf32>
    tpu.vector_store %arg4[%c0_39, %c0_40, %c0_41, %c0_42], %38 {strides = array<i32>} : memref<1x16x16x384xf32, #tpu.memory_space<vmem>>, vector<1x16x16x384xf32>,
    return
  }
  func.func @transform_0(%arg0: i32) -> (i32, i32, i32, i32) {
    %c0_i32 = arith.constant 0 : i32
    %c0_i32_0 = arith.constant 0 : i32
    %c0_i32_1 = arith.constant 0 : i32
    %c0_i32_2 = arith.constant 0 : i32
    return %arg0, %c0_i32, %c0_i32_0, %c0_i32_1 : i32, i32, i32, i32
  }
  func.func @transform_1(%arg0: i32) -> (i32, i32) {
    %c0_i32 = arith.constant 0 : i32
    %c0_i32_0 = arith.constant 0 : i32
    %c0_i32_1 = arith.constant 0 : i32
    return %c0_i32, %c0_i32_0 : i32, i32
  }
  func.func @transform_2(%arg0: i32) -> (i32, i32) {
    %c0_i32 = arith.constant 0 : i32
    %c0_i32_0 = arith.constant 0 : i32
    %c0_i32_1 = arith.constant 0 : i32
    return %c0_i32, %c0_i32_0 : i32, i32
  }
  func.func @transform_3(%arg0: i32) -> (i32, i32, i32, i32) {
    %c0_i32 = arith.constant 0 : i32
    %c0_i32_0 = arith.constant 0 : i32
    %c0_i32_1 = arith.constant 0 : i32
    %c0_i32_2 = arith.constant 0 : i32
    return %arg0, %c0_i32, %c0_i32_0, %c0_i32_1 : i32, i32, i32, i32
  }
}

</mosaic_0001>

<bundles_post_ra>
// kernel: tpu_custom_call.1
= control target key start
LH: loop header
LB: loop body
LE: loop exit
PB: predicated region body
PF: predicated region fallthrough
CT: control target
= control target key end

     0   :  { %8 = vsyncpa [#allocation4], 0  ;;  %s8894_s0 = inlined_call_operand.vmem [shape: f32[2,16,16,3], index: 0, kind: input, shape index: {}]   ;;  %s8895_s1 = inlined_call_operand.vmem [shape: bf16[27,384], index: 1, kind: input, shape index: {}]   ;;  %s8896_s2 = inlined_call_operand.vmem [shape: f32[1,384], index: 2, kind: input, shape index: {}]   ;;  %s8897_s3 = inlined_call_operand.hbm [shape: f32[2,16,16,384], index: 3, kind: output, shape index: {}]  }
   0x1   :  { %10 = vsyncpa [#allocation4 + $0x1], 0  ;;  %s5878_s12 = smov 0   ;;  %s5880_s13 = smov 0  }
   0x2   :  { %s5882_s14 = smov 0   ;;  %s5884_s15 = smov 0  }
   0x3 LB: > { %s5899_s16 = sadd.s32 4294967295, %s5848_s15   ;;  %s4972_s17 = sadd.s32 4294967294, %s5848_s15   ;;  %s5848_s15 = sphi %s5884_s15, %s9341_s15   ;;  %s5844_s14 = sphi %s5882_s14, %s9340_s14   ;;  %s5840_s13 = sphi %s5880_s13, %s9339_s13   ;;  %s5836_s12 = sphi %s5878_s12, %s9338_s12  }
   0x4   : > { %s5903_s18 = sadd.s32 1, %s5848_s15   ;;  %s91_s19 = sadd.s32 1, %s5844_s14 }
   0x5   : > { %s88_s20 = ssub.s32 %s5848_s15, %s5903_s18  ;;  %p101_p0 = scmp.ne.s32.totalorder %s5844_s14, %s5840_s13 }
   0x6   : > { %p89_p1 = scmp.eq.s32.totalorder %s88_s20, 0  ;;  %p102_p2 = scmp.eq.s32.totalorder %s5899_s16, 1 }
   0x7   : > { %p107_p3 = scmp.ne.s32.totalorder %s5840_s13, %s5836_s12  ;;  %p108_p4 = scmp.eq.s32.totalorder %s4972_s17, 1 }
   0x8   : > { %s5914_s21 = scalar_select %p89_p1, %s5844_s14, %s91_s19  }
   0x9   : > { %p5916_p5 = por %p102_p2, %p101_p0  ;;  %p5920_p6 = por %p108_p4, %p107_p3 }
   0xa   : > { %p4975_p7 = scmp.ge.s32.totalorder %s5848_s15, 1  ;;  %p140_p8 = scmp.lt.s32.totalorder %s5848_s15, 3 }
   0xc   : > { %p141_p9 = pnand %p4975_p7, %p140_p8 }
   0xe   : > { %144 = sbr.rel (%p141_p9) target bundleno = 748 (0x2ec), region = 32 }
  0x13   : > { %s161_s24 = sand.u32 1, %s5840_s13   ;;  %p164_p10 = scmp.lt.s32.totalorder %s5899_s16, 1 }
  0x14   : > { %s5499_s25 = smul.u32 768, %s161_s24  ;;  %p4978_p11 = scmp.ne.s32.totalorder %s5899_s16, 0 }
  0x15   : > { %s165_s26 = scalar_select %p164_p10, %s5899_s16, 1 }
  0x16   : > { %s5936_s4 = scalar_lea.vmem [#allocation3], %s5499_s25  ;;  %173 = sbr.rel (%p4978_p11) target bundleno = 64 (0x40), region = 36 }
  0x17   : > { %s5311_s27 = sshll.u32 %s165_s26, 8 }
  0x18   : > { %s5934_s30 = scalar_lea.vmem %s8894_s0, %s5311_s27 }
  0x1b   : > { %vm174_vm0 = vcmask 19456   ;;  %v5850_v0 = vmov 0  }
  0x1c   : > { %175 = vst.msk [vmem:[#allocation2] sm:$0xf] %vm174_vm0, %v5850_v0  ;;  %176 = vst.msk [vmem:[#allocation2 + $0x4] sm:$0xf] %vm174_vm0, %v5850_v0 }
  0x1d   : > { %177 = vst.msk [vmem:[#allocation2 + $0x8] sm:$0xf] %vm174_vm0, %v5850_v0  ;;  %178 = vst.msk [vmem:[#allocation2 + $0xc] sm:$0xf] %vm174_vm0, %v5850_v0 }
  0x1e   : > { %179 = vst.msk [vmem:[#allocation2 + $0x10] sm:$0xf] %vm174_vm0, %v5850_v0  ;;  %180 = vst.msk [vmem:[#allocation2 + $0x14] sm:$0xf] %vm174_vm0, %v5850_v0 }
  0x1f   : > { %181 = vst.msk [vmem:[#allocation2 + $0x18] sm:$0xf] %vm174_vm0, %v5850_v0  ;;  %182 = vst.msk [vmem:[#allocation2 + $0x1c] sm:$0xf] %vm174_vm0, %v5850_v0 }
  0x20   : > { %183 = vst.msk [vmem:[#allocation2 + $0x20] sm:$0xf] %vm174_vm0, %v5850_v0  ;;  %184 = vst.msk [vmem:[#allocation2 + $0x24] sm:$0xf] %vm174_vm0, %v5850_v0 }
  0x21   : > { %185 = vst.msk [vmem:[#allocation2 + $0x28] sm:$0xf] %vm174_vm0, %v5850_v0  ;;  %186 = vst.msk [vmem:[#allocation2 + $0x2c] sm:$0xf] %vm174_vm0, %v5850_v0 }
  0x22   : > { %187 = vst.msk [vmem:[#allocation2 + $0x30] sm:$0xf] %vm174_vm0, %v5850_v0  ;;  %188 = vst.msk [vmem:[#allocation2 + $0x34] sm:$0xf] %vm174_vm0, %v5850_v0 }
  0x23   : > { %189 = vst.msk [vmem:[#allocation2 + $0x38] sm:$0xf] %vm174_vm0, %v5850_v0  ;;  %190 = vst.msk [vmem:[#allocation2 + $0x3c] sm:$0xf] %vm174_vm0, %v5850_v0 }
  0x24   : > { %191 = vst.msk [vmem:[#allocation2 + $0x40] sm:$0xf] %vm174_vm0, %v5850_v0  ;;  %192 = vst.msk [vmem:[#allocation2 + $0x44] sm:$0xf] %vm174_vm0, %v5850_v0 }
  0x25   : > { %193 = vst.msk [vmem:[#allocation2 + $0x48] sm:$0xf] %vm174_vm0, %v5850_v0  ;;  %194 = vst.msk [vmem:[#allocation2 + $0x4c] sm:$0xf] %vm174_vm0, %v5850_v0 }
  0x26   : > { %195 = vst.msk [vmem:[#allocation2 + $0x50] sm:$0xf] %vm174_vm0, %v5850_v0  ;;  %196 = vst.msk [vmem:[#allocation2 + $0x54] sm:$0xf] %vm174_vm0, %v5850_v0 }
  0x27   : > { %197 = vst.msk [vmem:[#allocation2 + $0x58] sm:$0xf] %vm174_vm0, %v5850_v0  ;;  %198 = vst.msk [vmem:[#allocation2 + $0x5c] sm:$0xf] %vm174_vm0, %v5850_v0 }
  0x28   : > { %199 = vst.msk [vmem:[#allocation2 + $0x60] sm:$0xf] %vm174_vm0, %v5850_v0  ;;  %200 = vst.msk [vmem:[#allocation2 + $0x64] sm:$0xf] %vm174_vm0, %v5850_v0 }
  0x29   : > { %201 = vst.msk [vmem:[#allocation2 + $0x68] sm:$0xf] %vm174_vm0, %v5850_v0  ;;  %202 = vst.msk [vmem:[#allocation2 + $0x6c] sm:$0xf] %vm174_vm0, %v5850_v0 }
  0x2a   : > { %203 = vst.msk [vmem:[#allocation2 + $0x70] sm:$0xf] %vm174_vm0, %v5850_v0  ;;  %204 = vst.msk [vmem:[#allocation2 + $0x74] sm:$0xf] %vm174_vm0, %v5850_v0 }
  0x2b   : > { %205 = vst.msk [vmem:[#allocation2 + $0x78] sm:$0xf] %vm174_vm0, %v5850_v0  ;;  %206 = vst.msk [vmem:[#allocation2 + $0x7c] sm:$0xf] %vm174_vm0, %v5850_v0 }
  0x2c   : > { %207 = vst.msk [vmem:[#allocation2 + $0x80] sm:$0xf] %vm174_vm0, %v5850_v0  ;;  %208 = vst.msk [vmem:[#allocation2 + $0x84] sm:$0xf] %vm174_vm0, %v5850_v0 }
  0x2d   : > { %209 = vst.msk [vmem:[#allocation2 + $0x88] sm:$0xf] %vm174_vm0, %v5850_v0  ;;  %210 = vst.msk [vmem:[#allocation2 + $0x8c] sm:$0xf] %vm174_vm0, %v5850_v0 }
  0x2e   : > { %211 = vst.msk [vmem:[#allocation2 + $0x90] sm:$0xf] %vm174_vm0, %v5850_v0  ;;  %212 = vst.msk [vmem:[#allocation2 + $0x94] sm:$0xf] %vm174_vm0, %v5850_v0 }
  0x2f   : > { %213 = vst.msk [vmem:[#allocation2 + $0x98] sm:$0xf] %vm174_vm0, %v5850_v0  ;;  %214 = vst.msk [vmem:[#allocation2 + $0x9c] sm:$0xf] %vm174_vm0, %v5850_v0 }
  0x30   : > { %215 = vst.msk [vmem:[#allocation2 + $0xa0] sm:$0xf] %vm174_vm0, %v5850_v0  ;;  %216 = vst.msk [vmem:[#allocation2 + $0xa4] sm:$0xf] %vm174_vm0, %v5850_v0 }
  0x31   : > { %217 = vst.msk [vmem:[#allocation2 + $0xa8] sm:$0xf] %vm174_vm0, %v5850_v0  ;;  %218 = vst.msk [vmem:[#allocation2 + $0xac] sm:$0xf] %vm174_vm0, %v5850_v0 }
  0x32   : > { %219 = vst.msk [vmem:[#allocation2 + $0xb0] sm:$0xf] %vm174_vm0, %v5850_v0  ;;  %220 = vst.msk [vmem:[#allocation2 + $0xb4] sm:$0xf] %vm174_vm0, %v5850_v0 }
  0x33   : > { %221 = vst.msk [vmem:[#allocation2 + $0xb8] sm:$0xf] %vm174_vm0, %v5850_v0  ;;  %222 = vst.msk [vmem:[#allocation2 + $0xbc] sm:$0xf] %vm174_vm0, %v5850_v0 }
  0x34   : > { %223 = vst.msk [vmem:[#allocation2 + $0xc0] sm:$0xf] %vm174_vm0, %v5850_v0  ;;  %224 = vst.msk [vmem:[#allocation2 + $0xc4] sm:$0xf] %vm174_vm0, %v5850_v0 }
  0x35   : > { %225 = vst.msk [vmem:[#allocation2 + $0xc8] sm:$0xf] %vm174_vm0, %v5850_v0  ;;  %226 = vst.msk [vmem:[#allocation2 + $0xcc] sm:$0xf] %vm174_vm0, %v5850_v0 }
  0x36   : > { %227 = vst.msk [vmem:[#allocation2 + $0xd0] sm:$0xf] %vm174_vm0, %v5850_v0  ;;  %228 = vst.msk [vmem:[#allocation2 + $0xd4] sm:$0xf] %vm174_vm0, %v5850_v0 }
  0x37   : > { %229 = vst.msk [vmem:[#allocation2 + $0xd8] sm:$0xf] %vm174_vm0, %v5850_v0  ;;  %230 = vst.msk [vmem:[#allocation2 + $0xdc] sm:$0xf] %vm174_vm0, %v5850_v0 }
  0x38   : > { %231 = vst.msk [vmem:[#allocation2 + $0xe0] sm:$0xf] %vm174_vm0, %v5850_v0  ;;  %232 = vst.msk [vmem:[#allocation2 + $0xe4] sm:$0xf] %vm174_vm0, %v5850_v0 }
  0x39   : > { %233 = vst.msk [vmem:[#allocation2 + $0xe8] sm:$0xf] %vm174_vm0, %v5850_v0  ;;  %234 = vst.msk [vmem:[#allocation2 + $0xec] sm:$0xf] %vm174_vm0, %v5850_v0 }
  0x3a   : > { %235 = vst.msk [vmem:[#allocation2 + $0xf0] sm:$0xf] %vm174_vm0, %v5850_v0  ;;  %236 = vst.msk [vmem:[#allocation2 + $0xf4] sm:$0xf] %vm174_vm0, %v5850_v0 }
  0x3b   : > { %237 = vst.msk [vmem:[#allocation2 + $0xf8] sm:$0xf] %vm174_vm0, %v5850_v0  ;;  %238 = vst.msk [vmem:[#allocation2 + $0xfc] sm:$0xf] %vm174_vm0, %v5850_v0 }
  0x3c   : > { %239 = vst.msk [vmem:[#allocation2 + $0x100] sm:$0xf] %vm174_vm0, %v5850_v0  ;;  %240 = vst.msk [vmem:[#allocation2 + $0x104] sm:$0xf] %vm174_vm0, %v5850_v0 }
  0x3d   : > { %241 = vst.msk [vmem:[#allocation2 + $0x108] sm:$0xf] %vm174_vm0, %v5850_v0  ;;  %242 = vst.msk [vmem:[#allocation2 + $0x10c] sm:$0xf] %vm174_vm0, %v5850_v0 }
  0x3e   : > { %243 = vst.msk [vmem:[#allocation2 + $0x110] sm:$0xf] %vm174_vm0, %v5850_v0  ;;  %244 = vst.msk [vmem:[#allocation2 + $0x114] sm:$0xf] %vm174_vm0, %v5850_v0 }
  0x3f   : > { %245 = vst.msk [vmem:[#allocation2 + $0x118] sm:$0xf] %vm174_vm0, %v5850_v0  ;;  %246 = vst.msk [vmem:[#allocation2 + $0x11c] sm:$0xf] %vm174_vm0, %v5850_v0 }
  0x40 PF: > { %v271_v1 = vld [vmem:[%s5934_s30 + $0xc0] sm:$0xff]  ;;  %v272_v2 = vld [vmem:[%s5934_s30 + $0xc8] sm:$0xff]  ;;  %vm408_vm1 = vcmask 19456   ;;  %v249_v8 = vld [vmem:[%s5934_s30 + $0x10] sm:$0xff]  ;;  %vm857_vm2 = vcmask 1042432   ;;  %s5851_s5 = smov 6  }
  0x41   : > { %v247_v3 = vld [vmem:[%s5934_s30] sm:$0xff]  ;;  %v5336_v4 = vpack.c.bf16 %v271_v1, %v271_v1  ;;  %v5337_v5 = vpack.c.bf16 %v272_v2, %v272_v2  ;;  %v248_v6 = vld [vmem:[%s5934_s30 + $0x8] sm:$0xff]  ;;  %v250_v9 = vld [vmem:[%s5934_s30 + $0x18] sm:$0xff]  ;;  %v5314_v11 = vpack.c.bf16 %v249_v8, %v249_v8  ;;  %s5852_s6 = smov 3   ;;  %vm2360_vm3 = vcmask 1043456   ;;  %s5500_s11 = smul.u32 12288, %s5899_s16 }
  0x42   : > { %v5312_v7 = vpack.c.bf16 %v247_v3, %v247_v3  ;;  %v5313_v10 = vpack.c.bf16 %v248_v6, %v248_v6  ;;  %v5315_v12 = vpack.c.bf16 %v250_v9, %v250_v9  ;;  %v273_v13 = vld [vmem:[%s5934_s30 + $0xd0] sm:$0xff]  ;;  %v274_v14 = vld [vmem:[%s5934_s30 + $0xd8] sm:$0xff]  ;;  %v275_v17 = vld [vmem:[%s5934_s30 + $0xe0] sm:$0xff]  ;;  %vm2361_vm4 = vcmask 1044480   ;;  %s4910_s17 = sshll.u32 %s5936_s4, 4  ;;  %s8854_s16 = scalar_lea.sflag [#allocation4], %s161_s24  ;;  %s8849_s17 = int_to_ptr.vmem [resolvable:$true] %s4910_s17 }
  0x43   : > { %433 = vst.msk [vmem:[#allocation2 + $0xd4] sm:$0xf] %vm408_vm1, %v5336_v4  ;;  %434 = vst.msk [vmem:[#allocation2 + $0xd8] sm:$0xf] %vm408_vm1, %v5337_v5  ;;  %v5338_v15 = vpack.c.bf16 %v273_v13, %v273_v13  ;;  %v5339_v16 = vpack.c.bf16 %v274_v14, %v274_v14  ;;  %v276_v18 = vld [vmem:[%s5934_s30 + $0xe8] sm:$0xff]  ;;  %v251_v19 = vld [vmem:[%s5934_s30 + $0x20] sm:$0xff]  ;;  %v5340_v20 = vpack.c.bf16 %v275_v17, %v275_v17  ;;  %s8846_s25 = scalar_lea.hbm %s8897_s3, %s5500_s11 }
  0x44   : > { %409 = vst.msk [vmem:[#allocation2 + $0x14] sm:$0xf] %vm408_vm1, %v5312_v7  ;;  %410 = vst.msk [vmem:[#allocation2 + $0x18] sm:$0xf] %vm408_vm1, %v5313_v10  ;;  %v5341_v21 = vpack.c.bf16 %v276_v18, %v276_v18  ;;  %v252_v22 = vld [vmem:[%s5934_s30 + $0x28] sm:$0xff]  ;;  %v5316_v23 = vpack.c.bf16 %v251_v19, %v251_v19  ;;  %v277_v26 = vld [vmem:[%s5934_s30 + $0xf0] sm:$0xff] }
  0x45   : > { %411 = vst.msk [vmem:[#allocation2 + $0x24] sm:$0xf] %vm408_vm1, %v5314_v11  ;;  %412 = vst.msk [vmem:[#allocation2 + $0x28] sm:$0xf] %vm408_vm1, %v5315_v12  ;;  %v5317_v25 = vpack.c.bf16 %v252_v22, %v252_v22  ;;  %v278_v27 = vld [vmem:[%s5934_s30 + $0xf8] sm:$0xff]  ;;  %v253_v28 = vld [vmem:[%s5934_s30 + $0x30] sm:$0xff]  ;;  %v5342_v32 = vpack.c.bf16 %v277_v26, %v277_v26 }
  0x46   : > { %435 = vst.msk [vmem:[#allocation2 + $0xe4] sm:$0xf] %vm408_vm1, %v5338_v15  ;;  %436 = vst.msk [vmem:[#allocation2 + $0xe8] sm:$0xf] %vm408_vm1, %v5339_v16  ;;  %v5343_v33 = vpack.c.bf16 %v278_v27, %v278_v27  ;;  %v5318_v34 = vpack.c.bf16 %v253_v28, %v253_v28  ;;  %v254_v44 = vld [vmem:[%s5934_s30 + $0x38] sm:$0xff]  ;;  %v255_v16 = vld [vmem:[%s5934_s30 + $0x40] sm:$0xff] }
  0x47   : > { %v5550_v24 = vld [vmem:[#allocation2 + $0x1c] ss:$0 sps:$4 sm:$0x11]   ;;  %437 = vst.msk [vmem:[#allocation2 + $0xf4] sm:$0xf] %vm408_vm1, %v5340_v20  ;;  %v5319_v49 = vpack.c.bf16 %v254_v44, %v254_v44  ;;  %v256_v17 = vld [vmem:[%s5934_s30 + $0x48] sm:$0xff]  ;;  %v5320_v27 = vpack.c.bf16 %v255_v16, %v255_v16 }
  0x48   : > { %438 = vst.msk [vmem:[#allocation2 + $0xf8] sm:$0xf] %vm408_vm1, %v5341_v21  ;;  %413 = vst.msk [vmem:[#allocation2 + $0x34] sm:$0xf] %vm408_vm1, %v5316_v23  ;;  %v1778_v42 = vrot.slane %v5550_v24, 5  ;;  %v257_v20 = vld [vmem:[%s5934_s30 + $0x50] sm:$0xff]  ;;  %v5321_v28 = vpack.c.bf16 %v256_v17, %v256_v17 }
  0x49   : > { %414 = vst.msk [vmem:[#allocation2 + $0x38] sm:$0xf] %vm408_vm1, %v5317_v25  ;;  %v5551_v39 = vld [vmem:[#allocation2 + $0xdc] ss:$0 sps:$4 sm:$0x11]   ;;  %vm970_vm5 = vcmask 23552  }
  0x4a   : > { %v6109_v29 = vld [vmem:[#allocation2 + $0xd4] sm:$0xf]  ;;  %v6111_v30 = vld [vmem:[#allocation2 + $0xd8] sm:$0xf]  ;;  %439 = vst.msk [vmem:[#allocation2 + $0x104] sm:$0xf] %vm408_vm1, %v5342_v32 }
  0x4b   : > { %8959 = vst [vmem:[#allocation6_spill] sm:$0xff] %v6109_v29  ;;  %8960 = vst [vmem:[#allocation7_spill] sm:$0xff] %v6111_v30  ;;  %v6113_v31 = vld [vmem:[#allocation2 + $0x14] sm:$0xf]  ;;  %v5119_v35 = vcombine.low %v6109_v29, %v6111_v30  ;;  %v6118_v36 = vld [vmem:[#allocation2 + $0x18] sm:$0xf] }
  0x4c   : > { %v1365_v37 = vld [vmem:[#allocation2 + $0x24] sm:$0xf]  ;;  %v6120_v38 = vld [vmem:[#allocation2 + $0x28] sm:$0xf]  ;;  %v5107_v40 = vcombine.low %v6113_v31, %v6118_v36  ;;  %440 = vst.msk [vmem:[#allocation2 + $0x108] sm:$0xf] %vm408_vm1, %v5343_v33 }
  0x4d   : > { %8961 = vst [vmem:[#allocation8_spill] sm:$0xff] %v6120_v38  ;;  %v5108_v41 = vcombine.low %v1365_v37, %v6120_v38  ;;  %v1401_v43 = vld [vmem:[#allocation2 + $0xe4] sm:$0xf]  ;;  %415 = vst.msk [vmem:[#allocation2 + $0x44] sm:$0xf] %vm408_vm1, %v5318_v34  ;;  %v1813_v45 = vrot.slane %v5119_v35, 5 }
  0x4e   : > { %v1666_v46 = vshrl.u32 %v5119_v35, 16  ;;  %v1669_v47 = vshll.u32 %v5119_v35, 16  ;;  %v6129_v48 = vld [vmem:[#allocation2 + $0xe8] sm:$0xf]  ;;  %v1777_v50 = vrot.slane %v5107_v40, 5  ;;  %v1570_v51 = vshrl.u32 %v5107_v40, 16 }
  0x4f   : > { %8962 = vst [vmem:[#allocation9_spill] sm:$0xff] %v6129_v48  ;;  %v1573_v52 = vshll.u32 %v5107_v40, 16  ;;  %1873 = vrot.lane.b32.xlu0 %v1813_v45, %s5851_s5  ;;  %v1780_v53 = vrot.slane %v5108_v41, 5  ;;  %416 = vst.msk [vmem:[#allocation2 + $0x48] sm:$0xf] %vm408_vm1, %v5319_v49  ;;  %v6135_v56 = vcombine.low %v1401_v43, %v6129_v48  ;;  %v1814_v58 = vrot.slane %v5551_v39, 5 }
  0x50   : > { %1825 = vrot.lane.b32.xlu1 %v1777_v50, %s5851_s5  ;;  %v1572_v54 = vrot.slane %v1570_v51, 4  ;;  %v1779_v57 = vsel %vm857_vm2, %v1777_v50, %v1778_v42  ;;  %v5552_v59 = vld [vmem:[#allocation2 + $0x2c] ss:$0 sps:$4 sm:$0x11]   ;;  %v1668_v60 = vrot.slane %v1666_v46, 4  ;;  %v1671_v61 = vrot.slane %v1669_v47, 5 }
  0x51   : > { %v1575_v55 = vrot.slane %v1573_v52, 5  ;;  %v6138_v62 = vld [vmem:[#allocation2 + $0xf4] sm:$0xf]  ;;  %v6140_v63 = vld [vmem:[#allocation2 + $0xf8] sm:$0xf]  ;;  %v1578_v1 = vshrl.u32 %v5108_v41, 16  ;;  %v1815_v7 = vsel %vm857_vm2, %v1813_v45, %v1814_v58  ;;  %v5322_v43 = vpack.c.bf16 %v257_v20, %v257_v20 }
  0x52   : > { %8963 = vst [vmem:[#allocation10_spill] sm:$0xff] %v6138_v62  ;;  %8964 = vst [vmem:[#allocation11_spill] sm:$0xff] %v6140_v63  ;;  %v1581_v2 = vshll.u32 %v5108_v41, 16  ;;  %v6143_v3 = vld [vmem:[#allocation2 + $0x34] sm:$0xf]  ;;  %v1674_v5 = vshrl.u32 %v6135_v56, 16  ;;  %v6153_v9 = vcombine.low %v6138_v62, %v6140_v63  ;;  %v1672_v11 = vor.u32 %v1671_v61, %v1668_v60 }
  0x53   : > { %1829 = vrot.lane.b32.xlu0 %v1780_v53, %s5851_s5  ;;  %v1576_v0 = vor.u32 %v1575_v55, %v1572_v54  ;;  %v6145_v4 = vld [vmem:[#allocation2 + $0x38] sm:$0xf]  ;;  %v1677_v6 = vshll.u32 %v6135_v56, 16  ;;  %v1781_v8 = vrot.slane %v5552_v59, 5  ;;  %v1580_v12 = vrot.slane %v1578_v1, 4  ;;  %v259_v32 = vld [vmem:[%s5934_s30 + $0x60] sm:$0xff] }
  0x54   : > { %8965 = vst [vmem:[#allocation12_spill] sm:$0xff] %v6145_v4  ;;  %1827 = vrot.lane.b32.xlu1 %v1779_v57, %s5851_s5  ;;  %v6157_v10 = vcombine.low %v6143_v3, %v6145_v4  ;;  %v1583_v13 = vrot.slane %v1581_v2, 5  ;;  %v1676_v14 = vrot.slane %v1674_v5, 4  ;;  %v5554_v19 = vld [vmem:[#allocation2 + $0xec] ss:$0 sps:$4 sm:$0x11]   ;;  %v5324_v51 = vpack.c.bf16 %v259_v32, %v259_v32 }
  0x55   : > { %v1679_v15 = vrot.slane %v1677_v6, 5  ;;  %v1782_v18 = vsel %vm857_vm2, %v1780_v53, %v1781_v8  ;;  %v1682_v21 = vshrl.u32 %v6153_v9, 16  ;;  %v1685_v22 = vshll.u32 %v6153_v9, 16  ;;  %v258_v24 = vld [vmem:[%s5934_s30 + $0x58] sm:$0xff]  ;;  %v260_v33 = vld [vmem:[%s5934_s30 + $0x68] sm:$0xff]  ;;  %v261_v34 = vld [vmem:[%s5934_s30 + $0x70] sm:$0xff] }
  0x56   : > { %v1586_v23 = vshrl.u32 %v6157_v10, 16  ;;  %v1584_v25 = vor.u32 %v1583_v13, %v1580_v12  ;;  %v1589_v26 = vshll.u32 %v6157_v10, 16  ;;  %v262_v37 = vld [vmem:[%s5934_s30 + $0x78] sm:$0xff]  ;;  %v265_v39 = vld [vmem:[%s5934_s30 + $0x90] sm:$0xff]  ;;  %v1816_v41 = vrot.slane %v6135_v56, 5  ;;  %v263_v45 = vld [vmem:[%s5934_s30 + $0x80] sm:$0xff] }
  0x57   : > { %1697 = vrot.lane.b32.xlu0 %v1576_v0, %s5852_s6  ;;  %v1680_v35 = vor.u32 %v1679_v15, %v1676_v14  ;;  %v266_v40 = vld [vmem:[%s5934_s30 + $0x98] sm:$0xff]  ;;  %v1817_v42 = vrot.slane %v5554_v19, 5  ;;  %417 = vst.msk [vmem:[#allocation2 + $0x54] sm:$0xf] %vm408_vm1, %v5320_v27  ;;  %418 = vst.msk [vmem:[#allocation2 + $0x58] sm:$0xf] %vm408_vm1, %v5321_v28  ;;  %v5323_v44 = vpack.c.bf16 %v258_v24, %v258_v24 }
  0x58   : > { %1875 = vrot.lane.b32.xlu1 %v1815_v7, %s5851_s5  ;;  %v264_v46 = vld [vmem:[%s5934_s30 + $0x88] sm:$0xff]  ;;  %v1684_v47 = vrot.slane %v1682_v21, 4  ;;  %v1687_v49 = vrot.slane %v1685_v22, 5  ;;  %v6183_v50 = vld [vmem:[#allocation2 + $0x44] sm:$0xf]  ;;  %v5325_v52 = vpack.c.bf16 %v260_v33, %v260_v33  ;;  %v1588_v53 = vrot.slane %v1586_v23, 4 }
  0x59   : > { %v1591_v54 = vrot.slane %v1589_v26, 5  ;;  %v5557_v55 = vld [vmem:[#allocation2 + $0x3c] ss:$0 sps:$4 sm:$0x11]   ;;  %419 = vst.msk [vmem:[#allocation2 + $0x64] sm:$0xf] %vm408_vm1, %v5322_v43  ;;  %v5326_v56 = vpack.c.bf16 %v261_v34, %v261_v34  ;;  %v5327_v57 = vpack.c.bf16 %v262_v37, %v262_v37  ;;  %v5330_v61 = vpack.c.bf16 %v265_v39, %v265_v39 }
  0x5a   : > { %420 = vst.msk [vmem:[#allocation2 + $0x68] sm:$0xf] %vm408_vm1, %v5323_v44  ;;  %v269_v58 = vld [vmem:[%s5934_s30 + $0xb0] sm:$0xff]  ;;  %v270_v59 = vld [vmem:[%s5934_s30 + $0xb8] sm:$0xff]  ;;  %v6191_v60 = vld [vmem:[#allocation2 + $0x48] sm:$0xf]  ;;  %v5331_v0 = vpack.c.bf16 %v266_v40, %v266_v40  ;;  %v5328_v1 = vpack.c.bf16 %v263_v45, %v263_v45  ;;  %v5329_v2 = vpack.c.bf16 %v264_v46, %v264_v46  ;;  %v1818_v7 = vsel %vm857_vm2, %v1816_v41, %v1817_v42 }
  0x5b   : > { %1721 = vrot.lane.b32.xlu0 %v1672_v11, %s5852_s6  ;;  %8966 = vst [vmem:[#allocation13_spill] sm:$0xff] %v6191_v60  ;;  %421 = vst.msk [vmem:[#allocation2 + $0x74] sm:$0xf] %vm408_vm1, %v5324_v51  ;;  %v267_v5 = vld [vmem:[%s5934_s30 + $0xa0] sm:$0xff]  ;;  %v268_v6 = vld [vmem:[%s5934_s30 + $0xa8] sm:$0xff]  ;;  %v5334_v12 = vpack.c.bf16 %v269_v58, %v269_v58  ;;  %v5335_v13 = vpack.c.bf16 %v270_v59, %v270_v59  ;;  %v1592_v16 = vor.u32 %v1591_v54, %v1588_v53  ;;  %vm1051_vm6 = vcmask 48128  }
  0x5c   : > { %1831 = vrot.lane.b32.xlu1 %v1782_v18, %s5851_s5  ;;  %422 = vst.msk [vmem:[#allocation2 + $0x78] sm:$0xf] %vm408_vm1, %v5325_v52  ;;  %v6198_v8 = vld [vmem:[#allocation2 + $0x104] sm:$0xf]  ;;  %v6200_v11 = vld [vmem:[#allocation2 + $0x108] sm:$0xf]  ;;  %v5332_v14 = vpack.c.bf16 %v267_v5, %v267_v5  ;;  %v5333_v15 = vpack.c.bf16 %v268_v6, %v268_v6  ;;  %v5110_v17 = vcombine.low %v6183_v50, %v6191_v60 }
  0x5d   : > { %8967 = vst [vmem:[#allocation14_spill] sm:$0xff] %v6198_v8  ;;  %8968 = vst [vmem:[#allocation15_spill] sm:$0xff] %v6200_v11  ;;  %v1688_v18 = vor.u32 %v1687_v49, %v1684_v47  ;;  %v5558_v19 = vld [vmem:[#allocation2 + $0xfc] ss:$0 sps:$4 sm:$0x11]   ;;  %v5122_v20 = vcombine.low %v6198_v8, %v6200_v11  ;;  %v1783_v21 = vrot.slane %v6157_v10, 5 }
  0x5e   : > { %423 = vst.msk [vmem:[#allocation2 + $0x84] sm:$0xf] %vm408_vm1, %v5326_v56  ;;  %424 = vst.msk [vmem:[#allocation2 + $0x88] sm:$0xf] %vm408_vm1, %v5327_v57  ;;  %v1784_v22 = vrot.slane %v5557_v55, 5  ;;  %v1594_v23 = vshrl.u32 %v5110_v17, 16 }
  0x5f   : > { %1699 = vrot.lane.b32.xlu0 %v1584_v25, %s5852_s6  ;;  %427 = vst.msk [vmem:[#allocation2 + $0xa4] sm:$0xf] %vm408_vm1, %v5330_v61  ;;  %428 = vst.msk [vmem:[#allocation2 + $0xa8] sm:$0xf] %vm408_vm1, %v5331_v0  ;;  %v1597_v24 = vshll.u32 %v5110_v17, 16  ;;  %v1690_v25 = vshrl.u32 %v5122_v20, 16 }
  0x60   : > { %1723 = vrot.lane.b32.xlu1 %v1680_v35, %s5852_s6  ;;  %425 = vst.msk [vmem:[#allocation2 + $0x94] sm:$0xf] %vm408_vm1, %v5328_v1  ;;  %426 = vst.msk [vmem:[#allocation2 + $0x98] sm:$0xf] %vm408_vm1, %v5329_v2  ;;  %v1693_v26 = vshll.u32 %v5122_v20, 16  ;;  %v1785_v27 = vsel %vm857_vm2, %v1783_v21, %v1784_v22  ;;  %v1819_v28 = vrot.slane %v6153_v9, 5 }
  0x61   : > { %431 = vst.msk [vmem:[#allocation2 + $0xc4] sm:$0xf] %vm408_vm1, %v5334_v12  ;;  %432 = vst.msk [vmem:[#allocation2 + $0xc8] sm:$0xf] %vm408_vm1, %v5335_v13  ;;  %v1820_v32 = vrot.slane %v5558_v19, 5  ;;  %v1596_v33 = vrot.slane %v1594_v23, 4 }
  0x62   : > { %429 = vst.msk [vmem:[#allocation2 + $0xb4] sm:$0xf] %vm408_vm1, %v5332_v14  ;;  %430 = vst.msk [vmem:[#allocation2 + $0xb8] sm:$0xf] %vm408_vm1, %v5333_v15  ;;  %v1599_v34 = vrot.slane %v1597_v24, 5  ;;  %v1692_v10 = vrot.slane %v1690_v25, 4 }
  0x63   : > { %1877 = vrot.lane.b32.xlu0 %v1816_v41, %s5851_s5  ;;  %v1695_v35 = vrot.slane %v1693_v26, 5  ;;  %v6225_v37 = vld [vmem:[#allocation2 + $0x54] sm:$0xf]  ;;  %v6227_v39 = vld [vmem:[#allocation2 + $0x58] sm:$0xf]  ;;  %v1821_v40 = vsel %vm857_vm2, %v1819_v28, %v1820_v32  ;;  %v1786_v45 = vrot.slane %v5110_v17, 5 }
  0x64   : > { %1879 = vrot.lane.b32.xlu1 %v1818_v7, %s5851_s5  ;;  %8969 = vst [vmem:[#allocation16_spill] sm:$0xff] %v6227_v39  ;;  %v5561_v41 = vld [vmem:[#allocation2 + $0x4c] ss:$0 sps:$4 sm:$0x11]   ;;  %v1600_v42 = vor.u32 %v1599_v34, %v1596_v33  ;;  %v5111_v9 = vcombine.low %v6225_v37, %v6227_v39  ;;  %v6234_v47 = vld [vmem:[#allocation2 + $0x64] sm:$0xf] }
  0x65   : > { %v1696_v43 = vor.u32 %v1695_v35, %v1692_v10  ;;  %v5562_v44 = vld [vmem:[#allocation2 + $0x10c] ss:$0 sps:$4 sm:$0x11]   ;;  %v1787_v46 = vrot.slane %v5561_v41, 5  ;;  %8970 = vst [vmem:[#allocation17_spill] sm:$0xff] %v6234_v47  ;;  %v1822_v55 = vrot.slane %v5122_v20, 5 }
  0x66   : > { %v6236_v49 = vld [vmem:[#allocation2 + $0x68] sm:$0xf]  ;;  %v1602_v51 = vshrl.u32 %v5111_v9, 16  ;;  %v1605_v52 = vshll.u32 %v5111_v9, 16  ;;  %v1823_v56 = vrot.slane %v5562_v44, 5  ;;  %v1789_v13 = vrot.slane %v5111_v9, 5 }
  0x67   : > { %1701 = vrot.lane.b32.xlu0 %v1592_v16, %s5852_s6  ;;  %8971 = vst [vmem:[#allocation18_spill] sm:$0xff] %v6236_v49  ;;  %v5112_v53 = vcombine.low %v6234_v47, %v6236_v49  ;;  %v1788_v54 = vsel %vm857_vm2, %v1786_v45, %v1787_v46  ;;  %v6244_v59 = vld [vmem:[#allocation2 + $0x74] sm:$0xf]  ;;  %v6246_v61 = vld [vmem:[#allocation2 + $0x78] sm:$0xf]  ;;  %vm2311_vm8 = vcmask 72704  }
  0x68   : > { %1725 = vrot.lane.b32.xlu1 %v1688_v18, %s5852_s6  ;;  %v1604_v57 = vrot.slane %v1602_v51, 4  ;;  %v1607_v58 = vrot.slane %v1605_v52, 5  ;;  %8972 = vst [vmem:[#allocation19_spill] sm:$0xff] %v6244_v59  ;;  %8973 = vst [vmem:[#allocation20_spill] sm:$0xff] %v6246_v61  ;;  %v1824_v5 = vsel %vm857_vm2, %v1822_v55, %v1823_v56  ;;  %v6252_v6 = vcombine.low %v6244_v59, %v6246_v61  ;;  %v6256_v17 = vld [vmem:[#allocation2 + $0x84] sm:$0xf] }
  0x69   : > { %v1610_v0 = vshrl.u32 %v5112_v53, 16  ;;  %v1613_v1 = vshll.u32 %v5112_v53, 16  ;;  %v5565_v2 = vld [vmem:[#allocation2 + $0x5c] ss:$0 sps:$4 sm:$0x11]   ;;  %8974 = vst [vmem:[#allocation21_spill] sm:$0xff] %v6256_v17 }
  0x6a   : > { %v1608_v7 = vor.u32 %v1607_v58, %v1604_v57  ;;  %v5566_v12 = vld [vmem:[#allocation2 + $0x6c] ss:$0 sps:$4 sm:$0x11]   ;;  %v1790_v16 = vrot.slane %v5565_v2, 5  ;;  %v6258_v18 = vld [vmem:[#allocation2 + $0x88] sm:$0xf] }
  0x6b   : > { %1833 = vrot.lane.b32.xlu0 %v1783_v21, %s5851_s5  ;;  %v1612_v14 = vrot.slane %v1610_v0, 4  ;;  %v1615_v15 = vrot.slane %v1613_v1, 5  ;;  %8975 = vst [vmem:[#allocation22_spill] sm:$0xff] %v6258_v18  ;;  %v1618_v19 = vshrl.u32 %v6252_v6, 16  ;;  %v1621_v20 = vshll.u32 %v6252_v6, 16  ;;  %v9015_v47 = vld [vmem:[#allocation8_spill] sm:$0xff] }
  0x6c   : > { %1835 = vrot.lane.b32.xlu1 %v1785_v27, %s5851_s5  ;;  %v5590_v21 = vld [vmem:[%s8895_s1 + $0x10] ss:$12 sps:$4 sm:$0x1f]   ;;  %v1791_v23 = vsel %vm857_vm2, %v1789_v13, %v1790_v16  ;;  %v6270_v24 = vcombine.low %v6256_v17, %v6258_v18  ;;  %v1792_v26 = vrot.slane %v5112_v53, 5  ;;  %v1793_v27 = vrot.slane %v5566_v12, 5  ;;  %s5788_s26 = scalar_lea.vmem %s8849_s17, 12288 }
  0x6d   : > { %v1616_v22 = vor.u32 %v1615_v15, %v1612_v14  ;;  %v5569_v25 = vld [vmem:[#allocation2 + $0x7c] ss:$0 sps:$4 sm:$0x11]   ;;  %v1620_v32 = vrot.slane %v1618_v19, 4  ;;  %v6272_v33 = vld [vmem:[#allocation2 + $0xa8] sm:$0xf]  ;;  %p5789_p12 = scmp.ne.s32.totalorder %s8849_s17, %s5788_s26 }
  0x6e   : > { %8976 = vst [vmem:[#allocation23_spill] sm:$0xff] %v6272_v33  ;;  %v5593_v34 = vld [vmem:[%s8895_s1 + $0xc] ss:$12 sps:$4 sm:$0x1f]   ;;  %v1623_v10 = vrot.slane %v1621_v20, 5  ;;  %v2300_v41 = vshll.u32 %v5590_v21, 16  ;;  %v1794_v44 = vsel %vm857_vm2, %v1792_v26, %v1793_v27 }
  0x6f   : > { %1881 = vrot.lane.b32.xlu0 %v1819_v28, %s5851_s5  ;;  %v1389_v28 = vld [vmem:[#allocation2 + $0xa4] sm:$0xf]  ;;  %v1386_v35 = vld [vmem:[#allocation2 + $0x94] sm:$0xf]  ;;  %v1629_v9 = vshll.u32 %v6270_v24, 16  ;;  %v5853_v51 = vmov 65535   ;;  %p5790_p13 = pnand %p5789_p12, %p5916_p5 }
  0x70   : > { %1883 = vrot.lane.b32.xlu1 %v1821_v40, %s5851_s5  ;;  %v2298_v40 = vshrl.u32 %v5590_v21, 16  ;;  %v2302_v46 = vrot.slane %v2300_v41, 1  ;;  %v2362_v52 = vsel %vm2360_vm3, 4294967295, %v5853_v51  ;;  %v6285_v53 = vcombine.low %v1389_v28, %v6272_v33  ;;  %v5570_v12 = vld [vmem:[#allocation2 + $0x8c] ss:$0 sps:$4 sm:$0x11]  }
  0x71   : > { %v2293_v56 = vshll.u32 %v5593_v34, 16  ;;  %v1795_v57 = vrot.slane %v6252_v6, 5  ;;  %v1624_v58 = vor.u32 %v1623_v10, %v1620_v32  ;;  %v8898_v14 = vmov 0   ;;  %v5573_v27 = vld [vmem:[#allocation2 + $0x9c] ss:$0 sps:$4 sm:$0x11]   ;;  %p5791_p0 = pneg %p5790_p13 }
  0x72   : > { %v2303_v1 = vor.u32 %v2302_v46, %v2298_v40  ;;  %2405 = vmatprep.mubr.bf16.mxu0 %v8898_v14  ;;  %2525 = vmatprep.mubr.bf16.mxu1 %v8898_v14  ;;  %v1642_v21 = vshrl.u32 %v6285_v53, 16  ;;  %v6309_v40 = vld [vmem:[#allocation2 + $0xb8] sm:$0xf]  ;;  %v1802_v46 = vrot.slane %v5573_v27, 5  ;;  %v6338_v27 = vld [vmem:[#allocation2 + $0x8] sm:$0xf] }
  0x73   : > { %1703 = vrot.lane.b32.xlu0 %v1600_v42, %s5852_s6  ;;  %v1626_v42 = vshrl.u32 %v6270_v24, 16  ;;  %8979 = vst [vmem:[#allocation26_spill] sm:$0xff] %v6309_v40  ;;  %v5574_v51 = vld [vmem:[#allocation2 + $0xac] ss:$0 sps:$4 sm:$0x11]   ;;  %8982 = vst [vmem:[#allocation29_spill] sm:$0xff] %v6338_v27 }
  0x74   : > { %1727 = vrot.lane.b32.xlu1 %v1696_v43, %s5852_s6  ;;  %v6281_v43 = vld [vmem:[#allocation2 + $0x98] sm:$0xf]  ;;  %v1644_v10 = vrot.slane %v1642_v21, 4  ;;  %v5577_v21 = vld [vmem:[#allocation2 + $0xbc] ss:$0 sps:$4 sm:$0x11]  }
  0x75   : > { %8977 = vst [vmem:[#allocation24_spill] sm:$0xff] %v6281_v43  ;;  %v6292_v0 = vcombine.low %v1386_v35, %v6281_v43  ;;  %v1628_v2 = vrot.slane %v1626_v42, 4  ;;  %v1395_v42 = vld [vmem:[#allocation2 + $0xc4] sm:$0xf]  ;;  %v481_v49 = vld [vmem:[#allocation2 + $0xd4] sm:$0xf] }
  0x76   : > { %v6496_v60 = vld [vmem:[#allocation2 + $0x9c] ss:$0 sps:$4 sm:$0x11]   ;;  %v5606_v29 = vld [vmem:[#allocation2 + $0xac] ss:$0 sps:$4 sm:$0x11]  }
  0x77   : > { %1837 = vrot.lane.b32.xlu0 %v1786_v45, %s5851_s5  ;;  %v1796_v45 = vrot.slane %v5569_v25, 5  ;;  %v1634_v16 = vshrl.u32 %v6292_v0, 16  ;;  %v1637_v19 = vshll.u32 %v6292_v0, 16  ;;  %v1798_v25 = vrot.slane %v6270_v24, 5  ;;  %v482_v8 = vld [vmem:[#allocation2 + $0xd8] sm:$0xf] }
  0x78   : > { %1839 = vrot.lane.b32.xlu1 %v1788_v54, %s5851_s5  ;;  %v6287_v54 = vsel %vm2361_vm4, %v2362_v52, 0  ;;  %vm1116_vm7 = vsmask.f32 4352  ;;  %v9008_v33 = vld [vmem:[#allocation6_spill] sm:$0xff]  ;;  %s5855_s27 = smov [#allocation3]  }
  0x79   : > { %8978 = vst [vmem:[#allocation25_spill] sm:$0xff] %v6287_v54  ;;  %v1797_v6 = vsel %vm857_vm2, %v1795_v57, %v1796_v45  ;;  %v1636_v28 = vrot.slane %v1634_v16, 4  ;;  %v1639_v32 = vrot.slane %v1637_v19, 5  ;;  %s5792_s28 = sshll.u32 %s5855_s27, 4  ;;  %s5793_s28 = int_to_ptr.vmem [resolvable:$false] %s5792_s28 }
  0x7a   : > { %s5794_s29 = scalar_lea.vmem %s5793_s28, 24576  ;;  %p5795_p1 = scmp.lt.s32.totalorder %s8849_s17, %s5793_s28 }
  0x7b   : > { %1885 = vrot.lane.b32.xlu0 %v1822_v55, %s5851_s5  ;;  %v2291_v55 = vshrl.u32 %v5593_v34, 16  ;;  %v1392_v34 = vld [vmem:[#allocation2 + $0xb4] sm:$0xf]  ;;  %v1640_v24 = vor.u32 %v1639_v32, %v1636_v28  ;;  %v6342_v32 = vld [vmem:[#allocation2 + $0x18] sm:$0xf]  ;;  %p5796_p2 = scmp.lt.s32.totalorder %s5794_s29, %s5788_s26 }
  0x7c   : > { %1887 = vrot.lane.b32.xlu1 %v1824_v5, %s5851_s5  ;;  %v1631_v5 = vrot.slane %v1629_v9, 5  ;;  %v6312_v9 = vld [vmem:[#allocation2 + $0xc8] sm:$0xf]  ;;  %v445_v28 = vld [vmem:[#allocation2 + $0x14] sm:$0xf]  ;;  %8983 = vst [vmem:[#allocation30_spill] sm:$0xff] %v6342_v32 }
  0x7d   : > { %8980 = vst [vmem:[#allocation27_spill] sm:$0xff] %v6312_v9  ;;  %v6318_v52 = vcombine.low %v1395_v42, %v6312_v9  ;;  %v6354_v42 = vcombine.low %v445_v28, %v6342_v32  ;;  %v457_v28 = vld [vmem:[#allocation2 + $0x54] sm:$0xf]  ;;  %v470_v32 = vld [vmem:[#allocation2 + $0x98] sm:$0xf]  ;;  %p5797_p3 = por %p5796_p2, %p5795_p1 }
  0x7e   : > { %v1632_v20 = vor.u32 %v1631_v5, %v1628_v2 }
  0x7f   : > { %1705 = vrot.lane.b32.xlu0 %v1608_v7, %s5852_s6  ;;  %v2295_v7 = vrot.slane %v2293_v56, 1  ;;  %v5604_v56 = vld [vmem:[%s8895_s1 + $0x14] ss:$12 sps:$4 sm:$0x1f]   ;;  %v1658_v5 = vshrl.u32 %v6318_v52, 16  ;;  %p5798_p4 = pnand %p5797_p3, %p5791_p0 }
  0x80   : > { %1841 = vrot.lane.b32.xlu1 %v1789_v13, %s5851_s5  ;;  %v2368_v13 = vand.u32 %v6287_v54, %v2303_v1  ;;  %v2305_v1 = vshrl.u32 %v5604_v56, 16  ;;  %v2307_v2 = vshll.u32 %v5604_v56, 16  ;;  %v448_v56 = vld [vmem:[#allocation2 + $0x24] sm:$0xf] }
  0x81   : > { %v2296_v15 = vor.u32 %v2295_v7, %v2291_v55  ;;  %v1801_v55 = vrot.slane %v6292_v0, 5  ;;  %v1661_v7 = vshll.u32 %v6318_v52, 16  ;;  %v5605_v0 = vld [vmem:[%s8895_s1 + $0x8] ss:$12 sps:$4 sm:$0x1f]  }
  0x82   : > { %2387 = vmatprep.subr.bf16.mxu0 %v2368_v13  ;;  %5497 = vmatprep.subr.bf16.mxu1 %v2368_v13  ;;  %v1804_v13 = vrot.slane %v6285_v53, 5  ;;  %v6334_v16 = vand.u32 %v5605_v0, %v6287_v54  ;;  %v452_v0 = vld [vmem:[#allocation2 + $0x38] sm:$0xf] }
  0x83   : > { %1843 = vrot.lane.b32.xlu0 %v1791_v23, %s5851_s5  ;;  %v2365_v23 = vand.u32 %v6287_v54, %v2296_v15  ;;  %v1805_v15 = vrot.slane %v5574_v51, 5 }
  0x84   : > { %1707 = vrot.lane.b32.xlu1 %v1616_v22, %s5852_s6  ;;  %v1645_v22 = vshll.u32 %v6285_v53, 16  ;;  %8981 = vst [vmem:[#allocation28_spill] sm:$0xff] %v6334_v16 }
  0x85   : > { %2388 = vmatpush1.bf16.msra.mxu0 %v2365_v23  ;;  %5498 = vmatpush1.bf16.msra.mxu1 %v2365_v23  ;;  %v1660_v23 = vrot.slane %v1658_v5, 4  ;;  %v1806_v53 = vsel %vm857_vm2, %v1804_v13, %v1805_v15  ;;  %v1810_v5 = vrot.slane %v6318_v52, 5  ;;  %v5581_v15 = vld [vmem:[#allocation2 + $0xc] ss:$0 sps:$4 sm:$0x11]  }
  0x86   : > { %v1647_v35 = vrot.slane %v1645_v22, 5  ;;  %5429 = vmatprep.subr.bf16.mxu0 %v6334_v16 }
  0x87   : > { %1845 = vrot.lane.b32.xlu0 %v1792_v26, %s5851_s5  ;;  %v1799_v26 = vrot.slane %v5570_v12, 5  ;;  %v1803_v12 = vsel %vm857_vm2, %v1801_v55, %v1802_v46  ;;  %v5578_v46 = vld [vmem:[#allocation2 + $0xcc] ss:$0 sps:$4 sm:$0x11]  }
  0x88   : > { %1847 = vrot.lane.b32.xlu1 %v1794_v44, %s5851_s5  ;;  %v5117_v44 = vcombine.low %v1392_v34, %v6309_v40  ;;  %v1648_v45 = vor.u32 %v1647_v35, %v1644_v10 }
  0x89   : > { %v1800_v41 = vsel %vm857_vm2, %v1798_v25, %v1799_v26  ;;  %v442_v26 = vld [vmem:[#allocation2 + $0x4] sm:$0xf] }
  0x8a   : > { %v6349_v35 = vcombine.low %v442_v26, %v6338_v27  ;;  %v455_v26 = vld [vmem:[#allocation2 + $0x48] sm:$0xf] }
  0x8b   : > { %1709 = vrot.lane.b32.xlu0 %v1624_v58, %s5852_s6  ;;  %v1653_v58 = vshll.u32 %v5117_v44, 16 }
  0x8c   : > { %1849 = vrot.lane.b32.xlu1 %v1795_v57, %s5851_s5  ;;  %v1650_v57 = vshrl.u32 %v5117_v44, 16  ;;  %v650_v51 = vshrl.u32 %v6349_v35, 16 }
  0x8e   : > { %v1652_v19 = vrot.slane %v1650_v57, 4  ;;  %v6359_v57 = vld [vmem:[#allocation2 + $0x28] sm:$0xf] }
  0x8f   : > { %1851 = vrot.lane.b32.xlu0 %v1797_v6, %s5851_s5  ;;  %v2309_v6 = vrot.slane %v2307_v2, 1  ;;  %8985 = vst [vmem:[#allocation32_spill] sm:$0xff] %v6359_v57  ;;  %v451_v2 = vld [vmem:[#allocation2 + $0x34] sm:$0xf] }
  0x90   : > { %1711 = vrot.lane.b32.xlu1 %v1632_v20, %s5852_s6  ;;  %v1655_v20 = vrot.slane %v1653_v58, 5  ;;  %v658_v58 = vshrl.u32 %v6354_v42, 16 }
  0x91   : > { %v2310_v22 = vor.u32 %v2309_v6, %v2305_v1  ;;  %v661_v1 = vshll.u32 %v6354_v42, 16  ;;  %v6368_v6 = vcombine.low %v448_v56, %v6359_v57  ;;  %v858_v56 = vrot.slane %v6349_v35, 5 }
  0x92   : > { %v1656_v10 = vor.u32 %v1655_v20, %v1652_v19  ;;  %v660_v19 = vrot.slane %v658_v58, 4  ;;  %v859_v58 = vrot.slane %v5581_v15, 5 }
  0x93   : > { %1853 = vrot.lane.b32.xlu0 %v1798_v25, %s5851_s5  ;;  %v1663_v25 = vrot.slane %v1661_v7, 5  ;;  %v6345_v34 = vand.u32 %v6287_v54, %v2310_v22  ;;  %v1811_v7 = vrot.slane %v5578_v46, 5  ;;  %v663_v20 = vrot.slane %v661_v1, 5 }
  0x94   : > { %1855 = vrot.lane.b32.xlu1 %v1800_v41, %s5851_s5  ;;  %v6371_v22 = vcombine.low %v451_v2, %v452_v0  ;;  %v669_v46 = vshll.u32 %v6368_v6, 16  ;;  %v861_v1 = vrot.slane %v6354_v42, 5  ;;  %v8986_v57 = vrot.slane %v6368_v6, 5 }
  0x95   : > { %8984 = vst [vmem:[#allocation31_spill] sm:$0xff] %v6345_v34  ;;  %5395 = vmatprep.subr.bf16.mxu1 %v6345_v34  ;;  %v1664_v41 = vor.u32 %v1663_v25, %v1660_v23  ;;  %v5585_v23 = vld [vmem:[#allocation2 + $0x2c] ss:$0 sps:$4 sm:$0x11]   ;;  %v1812_v52 = vsel %vm857_vm2, %v1810_v5, %v1811_v7  ;;  %v454_v25 = vld [vmem:[#allocation2 + $0x44] sm:$0xf] }
  0x96   : > { %v6508_v34 = vld [vmem:[#allocation2 + $0xf0] sm:$0x8] }
  0x97   : > { %1713 = vrot.lane.b32.xlu0 %v1640_v24, %s5852_s6  ;;  %v1807_v24 = vrot.slane %v5117_v44, 5 }
  0x98   : > { %1715 = vrot.lane.b32.xlu1 %v1648_v45, %s5852_s6  ;;  %v1808_v45 = vrot.slane %v5577_v21, 5  ;;  %v5582_v21 = vld [vmem:[#allocation2 + $0x1c] ss:$0 sps:$4 sm:$0x11]  }
  0x99   : > { %v862_v2 = vrot.slane %v5582_v21, 5  ;;  %v5589_v21 = vld [vmem:[#allocation2 + $0x4c] ss:$0 sps:$4 sm:$0x11]  }
  0x9a   : > { %v1809_v44 = vsel %vm857_vm2, %v1807_v24, %v1808_v45  ;;  %v664_v45 = vor.u32 %v663_v20, %v660_v19  ;;  %v466_v19 = vld [vmem:[#allocation2 + $0x84] sm:$0xf] }
  0x9b   : > { %1857 = vrot.lane.b32.xlu0 %v1801_v55, %s5851_s5  ;;  %v653_v55 = vshll.u32 %v6349_v35, 16  ;;  %v6395_v35 = vrot.slane %v669_v46, 5  ;;  %v464_v46 = vld [vmem:[#allocation2 + $0x78] sm:$0xf] }
  0x9c   : > { %1859 = vrot.lane.b32.xlu1 %v1803_v12, %s5851_s5  ;;  %v652_v12 = vrot.slane %v650_v51, 4  ;;  %v674_v51 = vshrl.u32 %v6371_v22, 16 }
  0x9e   : > { %v6397_v42 = vrot.slane %v674_v51, 4  ;;  %v6413_v51 = vld [vmem:[#allocation2 + $0x6c] ss:$0 sps:$4 sm:$0x11]  }
  0x9f   : > { %1861 = vrot.lane.b32.xlu0 %v1804_v13, %s5851_s5  ;;  %v655_v13 = vrot.slane %v653_v55, 5  ;;  %v6381_v55 = vcombine.low %v454_v25, %v455_v26  ;;  %v460_v26 = vld [vmem:[#allocation2 + $0x64] sm:$0xf] }
  0xa0   : > { %1863 = vrot.lane.b32.xlu1 %v1806_v53, %s5851_s5  ;;  %v6374_v53 = vld [vmem:[#allocation2 + $0x3c] ss:$0 sps:$4 sm:$0x11]  }
  0xa1   : > { %v682_v15 = vshrl.u32 %v6381_v55, 16  ;;  %v685_v20 = vshll.u32 %v6381_v55, 16 }
  0xa3   : > { %1717 = vrot.lane.b32.xlu0 %v1656_v10, %s5852_s6  ;;  %v656_v10 = vor.u32 %v655_v13, %v652_v12  ;;  %v677_v12 = vshll.u32 %v6371_v22, 16  ;;  %v467_v13 = vld [vmem:[#allocation2 + $0x88] sm:$0xf]  ;;  %v6434_v27 = vrot.slane %v682_v15, 4  ;;  %v6436_v63 = vrot.slane %v685_v20, 5 }
  0xa4   : > { %1719 = vrot.lane.b32.xlu1 %v1664_v41, %s5852_s6  ;;  %v666_v41 = vshrl.u32 %v6368_v6, 16  ;;  %v871_v15 = vrot.slane %v5589_v21, 5  ;;  %v473_v20 = vld [vmem:[#allocation2 + $0xa8] sm:$0xf] }
  0xa5   : > { %v679_v14 = vrot.slane %v677_v12, 5  ;;  %v469_v12 = vld [vmem:[#allocation2 + $0x94] sm:$0xf] }
  0xa6   : > { %v6389_v0 = vrot.slane %v666_v41, 4  ;;  %v6407_v41 = vld [vmem:[#allocation2 + $0x5c] ss:$0 sps:$4 sm:$0x11]  }
  0xa7   : > { %1865 = vrot.lane.b32.xlu0 %v1807_v24, %s5851_s5  ;;  %v458_v24 = vld [vmem:[#allocation2 + $0x58] sm:$0xf] }
  0xa8   : > { %1867 = vrot.lane.b32.xlu1 %v1809_v44, %s5851_s5  ;;  %v865_v44 = vrot.slane %v5585_v23, 5  ;;  %v6386_v7 = vcombine.low %v457_v28, %v458_v24  ;;  %v860_v23 = vsel %vm857_vm2, %v858_v56, %v859_v58  ;;  %v463_v28 = vld [vmem:[#allocation2 + $0x74] sm:$0xf]  ;;  %v6438_v24 = vld [vmem:[#allocation2 + $0x10] sm:$0x8] }
  0xaa   : > { %v693_v25 = vshll.u32 %v6386_v7, 16  ;;  %v6428_v58 = vsel %vm857_vm2, %v8986_v57, %v865_v44  ;;  %v672_v57 = vor.u32 %v6395_v35, %v6389_v0  ;;  %v8987_v44 = vrot.slane %v6371_v22, 5 }
  0xab   : > { %1869 = vrot.lane.b32.xlu0 %v1810_v5, %s5851_s5  ;;  %v868_v5 = vrot.slane %v6374_v53, 5  ;;  %v461_v53 = vld [vmem:[#allocation2 + $0x68] sm:$0xf]  ;;  %v6460_v0 = vcombine.low %v469_v12, %v470_v32  ;;  %v874_v35 = vrot.slane %v6407_v41, 5  ;;  %v476_v12 = vld [vmem:[#allocation2 + $0xb8] sm:$0xf] }
  0xac   : > { %1871 = vrot.lane.b32.xlu1 %v1812_v52, %s5851_s5  ;;  %v472_v52 = vld [vmem:[#allocation2 + $0xa4] sm:$0xf]  ;;  %v6453_v11 = vrot.slane %v693_v25, 5  ;;  %v6467_v25 = vld [vmem:[#allocation2 + $0x7c] ss:$0 sps:$4 sm:$0x11]  }
  0xad   : > { %v9012_v43 = vrot.slane %v6386_v7, 5 }
  0xaf   : > { %777 = vrot.lane.b32.xlu0 %v656_v10, %s5852_s6  ;;  %v690_v10 = vshrl.u32 %v6386_v7, 16 }
  0xb0   : > { %779 = vrot.lane.b32.xlu1 %v664_v45, %s5852_s6  ;;  %v863_v45 = vsel %vm857_vm2, %v861_v1, %v862_v2  ;;  %v6455_v2 = vld [vmem:[#allocation2 + $0xd0] sm:$0x8] }
  0xb1   : > { %8988 = vst [vmem:[#allocation33_spill] sm:$0xff] %v6455_v2  ;;  %v6554_v2 = vld [vmem:[#allocation2 + $0xe4] sm:$0xf] }
  0xb2   : > { %8994 = vst [vmem:[#allocation36_spill] sm:$0xff] %v6554_v2 }
  0xb3   : > { %906 = vrot.lane.b32.xlu0 %v858_v56, %s5851_s5  ;;  %v6430_v56 = vcombine.low %v460_v26, %v461_v53  ;;  %v6448_v26 = vsel %vm857_vm2, %v8987_v44, %v868_v5  ;;  %v6450_v53 = vrot.slane %v690_v10, 4  ;;  %v680_v5 = vor.u32 %v679_v14, %v6397_v42 }
  0xb4   : > { %908 = vrot.lane.b32.xlu1 %v860_v23, %s5851_s5  ;;  %v6441_v23 = vcombine.low %v463_v28, %v464_v46  ;;  %v6458_v46 = vcombine.low %v466_v19, %v467_v13  ;;  %v6473_v19 = vcombine.low %v472_v52, %v473_v20  ;;  %v8989_v42 = vrot.slane %v6381_v55, 5  ;;  %v6502_v52 = vld [vmem:[#allocation2 + $0x20] sm:$0x8] }
  0xb5   : > { %v698_v21 = vshrl.u32 %v6430_v56, 16  ;;  %v701_v13 = vshll.u32 %v6430_v56, 16  ;;  %v722_v28 = vshrl.u32 %v6460_v0, 16  ;;  %v725_v44 = vshll.u32 %v6460_v0, 16 }
  0xb6   : > { %v706_v32 = vshrl.u32 %v6441_v23, 16  ;;  %v6480_v41 = vsel %vm857_vm2, %v8989_v42, %v871_v15  ;;  %v709_v10 = vshll.u32 %v6441_v23, 16  ;;  %v714_v20 = vshrl.u32 %v6458_v46, 16 }
  0xb7   : > { %910 = vrot.lane.b32.xlu0 %v861_v1, %s5851_s5  ;;  %8990 = vst [vmem:[#allocation34_spill] sm:$0xff] %v6480_v41  ;;  %v6485_v1 = vld [vmem:[#allocation2 + $0x8c] ss:$0 sps:$4 sm:$0x11]   ;;  %v717_v14 = vshll.u32 %v6458_v46, 16  ;;  %v880_v42 = vrot.slane %v6467_v25, 5 }
  0xb8   : > { %912 = vrot.lane.b32.xlu1 %v863_v45, %s5851_s5  ;;  %v475_v45 = vld [vmem:[#allocation2 + $0xb4] sm:$0xf]  ;;  %v6504_v4 = vrot.slane %v698_v21, 4  ;;  %v6506_v59 = vrot.slane %v701_v13, 5  ;;  %v733_v25 = vshll.u32 %v6473_v19, 16  ;;  %v6512_v15 = vrot.slane %v706_v32, 4 }
  0xb9   : > { %v6498_v17 = vcombine.low %v475_v45, %v476_v12  ;;  %v6514_v16 = vrot.slane %v709_v10, 5  ;;  %v6516_v45 = vld [vmem:[#allocation2 + $0x30] sm:$0x8]  ;;  %v883_v48 = vrot.slane %v6485_v1, 5  ;;  %v8991_v21 = vrot.slane %v6368_v6, 5  ;;  %v9007_v40 = vld [vmem:[#allocation33_spill] sm:$0xff] }
  0xba   : > { %v6523_v13 = vrot.slane %v714_v20, 4  ;;  %v6525_v54 = vrot.slane %v717_v14, 5  ;;  %v6527_v38 = vrot.slane %v722_v28, 4  ;;  %v6529_v32 = vld [vmem:[#allocation2 + $0x100] sm:$0x8]  ;;  %v6536_v1 = vrot.slane %v725_v44, 5 }
  0xbb   : > { %781 = vrot.lane.b32.xlu0 %v672_v57, %s5852_s6  ;;  %v6500_v57 = vld [vmem:[#allocation2 + $0xe0] sm:$0x8]  ;;  %v886_v6 = vrot.slane %v6496_v60, 5  ;;  %v738_v20 = vshrl.u32 %v6498_v17, 16  ;;  %v741_v14 = vshll.u32 %v6498_v17, 16  ;;  %v8993_v12 = vrot.slane %v6386_v7, 5 }
  0xbc   : > { %783 = vrot.lane.b32.xlu1 %v680_v5, %s5852_s6  ;;  %v730_v5 = vshrl.u32 %v6473_v19, 16  ;;  %v6531_v10 = vld [vmem:[#allocation2 + $0x40] sm:$0x8]  ;;  %v6552_v44 = vrot.slane %v733_v25, 5  ;;  %v8995_v25 = vrot.slane %v6371_v22, 5  ;;  %v8996_v41 = vrot.slane %v6413_v51, 5 }
  0xbd   : > { %v6548_v30 = vsel %vm857_vm2, %v8993_v12, %v874_v35  ;;  %v8997_v2 = vrot.slane %v6430_v56, 5  ;;  %v5607_v22 = vld [vmem:[#allocation2 + $0xbc] ss:$0 sps:$4 sm:$0x11]   ;;  %v8999_v35 = vrot.slane %v6458_v46, 5  ;;  %v6604_v39 = vrot.slane %v741_v14, 5 }
  0xbe   : > { %v9000_v14 = vor.u32 %v6436_v63, %v6434_v27  ;;  %v9003_v27 = vcombine.low %v6118_v36, %v6118_v36 }
  0xbf   : > { %914 = vrot.lane.b32.xlu0 %v8991_v21, %s5851_s5  ;;  %v696_v21 = vor.u32 %v6453_v11, %v6450_v53  ;;  %v6576_v11 = vsel %vm857_vm2, %v8997_v2, %v8996_v41  ;;  %v8998_v53 = vrot.slane %v6441_v23, 5  ;;  %v6600_v12 = vsel %vm857_vm2, %v8999_v35, %v883_v48  ;;  %v6621_v41 = vld [vmem:[#allocation2 + $0x50] sm:$0x8] }
  0xc0   : > { %916 = vrot.lane.b32.xlu1 %v6428_v58, %s5851_s5  ;;  %v6550_v58 = vrot.slane %v730_v5, 4  ;;  %v478_v5 = vld [vmem:[#allocation2 + $0xc4] sm:$0xf]  ;;  %v889_v2 = vrot.slane %v5606_v29, 5  ;;  %v892_v48 = vrot.slane %v5607_v22, 5  ;;  %v6644_v35 = vcombine.low %v481_v49, %v482_v8 }
  0xc1   : > { %v6541_v28 = vpop.permute.xlu0 %1873  ;;  %v6581_v62 = vsel %vm857_vm2, %v8998_v53, %v880_v42  ;;  %v6623_v42 = vld [vmem:[#allocation2 + $0x60] sm:$0x8] }
  0xc2   : > { %8992 = vst [vmem:[#allocation35_spill] sm:$0xff] %v6541_v28  ;;  %v1826_v60 = vpop.permute.xlu1 %1825  ;;  %v6558_v28 = vld [vmem:[#allocation2 + $0x24] sm:$0xf] }
  0xc3   : > { %918 = vrot.lane.b32.xlu0 %v8995_v25, %s5851_s5  ;;  %v479_v25 = vld [vmem:[#allocation2 + $0xc8] sm:$0xf] }
  0xc4   : > { %920 = vrot.lane.b32.xlu1 %v6448_v26, %s5851_s5  ;;  %v6602_v26 = vrot.slane %v738_v20, 4  ;;  %v6625_v61 = vcombine.low %v478_v5, %v479_v25  ;;  %v9001_v20 = vrot.slane %v6460_v0, 5 }
  0xc5   : > { %v6595_v53 = vpop.permute.xlu0 %1829 }
  0xc6   : > { %v1828_v51 = vpop.permute.xlu1 %1827  ;;  %v6633_v63 = vsel %vm857_vm2, %v9001_v20, %v886_v6  ;;  %v9002_v20 = vcombine.low %v6438_v24, %v6113_v31  ;;  %v9004_v31 = vrot.slane %v6381_v55, 5  ;;  %v9005_v24 = vrot.slane %v6473_v19, 5 }
  0xc7   : > { %785 = vrot.lane.b32.xlu0 %v9000_v14, %s5852_s6 }
  0xc8   : > { %787 = vrot.lane.b32.xlu1 %v696_v21, %s5852_s6  ;;  %v8945_v21 = vrot.slane %v6498_v17, 5  ;;  %v6666_v36 = vsel %vm857_vm2, %v9005_v24, %v889_v2  ;;  %v9010_v2 = vld [vmem:[#allocation7_spill] sm:$0xff] }
  0xc9   : > { %v1698_v25 = vpop.permute.xlu0 %1697 }
  0xca   : > { %v1876_v6 = vpop.permute.xlu1 %1875  ;;  %v1891_v29 = vsel %vm970_vm5, %v9002_v20, %v1698_v25  ;;  %v1893_v5 = vsel %vm970_vm5, %v9003_v27, %v1698_v25  ;;  %v6669_v27 = vld [vmem:[#allocation2 + $0xcc] ss:$0 sps:$4 sm:$0x11]   ;;  %v6676_v55 = vsel %vm857_vm2, %v8945_v21, %v892_v48  ;;  %v9009_v48 = vcombine.low %v9007_v40, %v9008_v33 }
  0xcb   : > { %v1970_v8 = vsel %vm1051_vm6, %v1891_v29, %v1826_v60  ;;  %v1972_v49 = vsel %vm1051_vm6, %v1893_v5, %v1828_v51  ;;  %922 = vrot.lane.b32.xlu0 %v9004_v31, %s5851_s5  ;;  %v9006_v60 = vld [vmem:[#allocation34_spill] sm:$0xff]  ;;  %v9011_v29 = vcombine.low %v9010_v2, %v9010_v2 }
  0xcc   : > { %v2033_v25 = vshrl.u32 %v1970_v8, 16  ;;  %v2036_v20 = vshll.u32 %v1970_v8, 16  ;;  %v2040_v14 = vshrl.u32 %v1972_v49, 16  ;;  %v2043_v9 = vshll.u32 %v1972_v49, 16  ;;  %924 = vrot.lane.b32.xlu1 %v9006_v60, %s5851_s5 }
  0xcd   : > { %v1722_v51 = vpop.permute.xlu0 %1721  ;;  %v6684_v8 = vld [vmem:[%s8895_s1 + $0x4] ss:$12 sps:$4 sm:$0x1f]  }
  0xce   : > { %v2035_v49 = vrot.slane %v2033_v25, 3  ;;  %v2038_v31 = vrot.slane %v2036_v20, 4  ;;  %v2042_v24 = vrot.slane %v2040_v14, 3  ;;  %v2045_v60 = vrot.slane %v2043_v9, 4  ;;  %v1832_v22 = vpop.permute.xlu1 %1831  ;;  %v9013_v9 = vld [vmem:[#allocation35_spill] sm:$0xff] }
  0xcf   : > { %v1951_v21 = vsel %vm970_vm5, %v9009_v48, %v1722_v51  ;;  %v1953_v5 = vsel %vm970_vm5, %v9011_v29, %v1722_v51  ;;  %926 = vrot.lane.b32.xlu0 %v9012_v43, %s5851_s5  ;;  %v9014_v25 = vcombine.low %v6502_v52, %v6558_v28 }
  0xd0   : > { %v2018_v20 = vsel %vm1051_vm6, %v1951_v21, %v9013_v9  ;;  %v2020_v33 = vsel %vm1051_vm6, %v1953_v5, %v1876_v6  ;;  %928 = vrot.lane.b32.xlu1 %v6548_v30, %s5851_s5  ;;  %v2039_v40 = vor.u32 %v2038_v31, %v2035_v49  ;;  %v2046_v2 = vor.u32 %v2045_v60, %v2042_v24  ;;  %v9017_v5 = vld [vmem:[#allocation25_spill] sm:$0xff] }
  0xd1   : > { %v2213_v48 = vshrl.u32 %v2018_v20, 16  ;;  %v2216_v51 = vshll.u32 %v2018_v20, 16  ;;  %v2220_v29 = vshrl.u32 %v2020_v33, 16  ;;  %v2223_v18 = vshll.u32 %v2020_v33, 16  ;;  %v1700_v7 = vpop.permute.xlu0 %1699  ;;  %v9021_v20 = vld [vmem:[#allocation9_spill] sm:$0xff] }
  0xd2   : > { %v1724_v43 = vpop.permute.xlu1 %1723  ;;  %v1896_v14 = vsel %vm970_vm5, %v9014_v25, %v1700_v7  ;;  %v9016_v21 = vcombine.low %v9015_v47, %v9015_v47  ;;  %v6713_v30 = vsel %vm1116_vm7, %v2039_v40, %v2046_v2  ;;  %v2792_v49 = vand.u32 %v6684_v8, %v9017_v5  ;;  %v5656_v31 = vld [vmem:[%s8895_s1 + $0x1c] ss:$12 sps:$4 sm:$0x3e]   ;;  %v9019_v25 = vld [vmem:[#allocation36_spill] sm:$0xff] }
  0xd3   : > { %v2215_v24 = vrot.slane %v2213_v48, 3  ;;  %v2218_v60 = vrot.slane %v2216_v51, 4  ;;  %v2222_v52 = vrot.slane %v2220_v29, 3  ;;  %v2225_v28 = vrot.slane %v2223_v18, 4  ;;  %5142 = vmatmul.mubr.msk.bf16.vlgmr.msra.gmra.mxu0 %vm2311_vm8, %v6713_v30 }
  0xd4   : > { %v1898_v6 = vsel %vm970_vm5, %v9016_v21, %v1700_v7  ;;  %v9018_v47 = vor.u32 %v6506_v59, %v6504_v4  ;;  %v9020_v9 = vcombine.low %v6500_v57, %v9019_v25  ;;  %v9022_v33 = vcombine.low %v9021_v20, %v9021_v20  ;;  %v9025_v21 = vld [vmem:[#allocation28_spill] sm:$0xff] }
  0xd5   : > { %v1974_v18 = vsel %vm1051_vm6, %v1896_v14, %v6595_v53  ;;  %v1976_v2 = vsel %vm1051_vm6, %v1898_v6, %v1832_v22  ;;  %v9023_v4 = vor.u32 %v6514_v16, %v6512_v15  ;;  %v1878_v29 = vpop.permute.xlu0 %1877  ;;  %v9024_v7 = vmov 0   ;;  %5430 = vmatpush3.bf16.msra.mxu0 %v9025_v21 }
  0xd6   : > { %789 = vrot.lane.b32.xlu0 %v9018_v47, %s5852_s6  ;;  %v1956_v8 = vsel %vm970_vm5, %v9020_v9, %v1724_v43  ;;  %v1958_v40 = vsel %vm970_vm5, %v9022_v33, %v1724_v43  ;;  %v2048_v59 = vshrl.u32 %v1974_v18, 16  ;;  %v2051_v48 = vshll.u32 %v1974_v18, 16  ;;  %2415 = vmatprep.mubr.bf16.mxu0 %v9024_v7  ;;  %v1880_v43 = vpop.permute.xlu1 %1879 }
  0xd7   : > { %791 = vrot.lane.b32.xlu1 %v9023_v4, %s5852_s6  ;;  %v2055_v57 = vshrl.u32 %v1976_v2, 16  ;;  %v2058_v51 = vshll.u32 %v1976_v2, 16  ;;  %v2022_v47 = vsel %vm1051_vm6, %v1956_v8, %v1878_v29  ;;  %v2219_v53 = vor.u32 %v2218_v60, %v2215_v24  ;;  %v6753_v24 = vld [vmem:[#allocation2 + $0x70] sm:$0x8] }
  0xd8   : > { %v2226_v14 = vor.u32 %v2225_v28, %v2222_v52  ;;  %v4082_v22 = vrot.slane %v5656_v31, 1  ;;  %v2050_v6 = vrot.slane %v2048_v59, 3  ;;  %v2053_v25 = vrot.slane %v2051_v48, 4  ;;  %v6757_v8 = vld [vmem:[#allocation2 + $0xdc] ss:$0 sps:$4 sm:$0x11]  }
  0xd9   : > { %v2057_v9 = vrot.slane %v2055_v57, 3  ;;  %v2060_v16 = vrot.slane %v2058_v51, 4  ;;  %v9026_v15 = vrot.slane %v6430_v56, 5  ;;  %v2024_v20 = vsel %vm1051_vm6, %v1958_v40, %v1880_v43  ;;  %v1702_v52 = vpop.permute.xlu0 %1701  ;;  %v9027_v48 = vld [vmem:[#allocation31_spill] sm:$0xff] }
  0xda   : > { %v2228_v33 = vshrl.u32 %v2022_v47, 16  ;;  %v2231_v18 = vshll.u32 %v2022_v47, 16  ;;  %v6749_v2 = vsel %vm1116_vm7, %v2219_v53, %v2226_v14  ;;  %v2235_v31 = vshrl.u32 %v2024_v20, 16  ;;  %v1726_v59 = vpop.permute.xlu1 %1725  ;;  %v9031_v53 = vld [vmem:[#allocation19_spill] sm:$0xff] }
  0xdb   : > { %930 = vrot.lane.b32.xlu0 %v9026_v15, %s5851_s5  ;;  %932 = vrot.lane.b32.xlu1 %v6576_v11, %s5851_s5  ;;  %v2238_v60 = vshll.u32 %v2024_v20, 16  ;;  %v2054_v56 = vor.u32 %v2053_v25, %v2050_v6  ;;  %v2061_v28 = vor.u32 %v2060_v16, %v2057_v9  ;;  %v9028_v11 = vshrl.u32 %v6625_v61, 16  ;;  %v6784_v20 = vld [vmem:[#allocation2 + $0x80] sm:$0x8] }
  0xdc   : > { %5154 = vmatmul.mubr.msk.bf16.vlgmr.msra.gmra.mxu1 %vm2311_vm8, %v6749_v2  ;;  %v2230_v40 = vrot.slane %v2228_v33, 3  ;;  %v2233_v4 = vrot.slane %v2231_v18, 4  ;;  %v9029_v51 = vshll.u32 %v6625_v61, 16  ;;  %v2237_v21 = vrot.slane %v2235_v31, 3 }
  0xdd   : > { %2535 = vmatprep.mubr.bf16.mxu1 %v9024_v7  ;;  %5396 = vmatpush3.bf16.msra.mxu1 %v9027_v48  ;;  %v6763_v57 = vrot.slane %v9028_v11, 4  ;;  %v2240_v43 = vrot.slane %v2238_v60, 4  ;;  %v9030_v47 = vrot.slane %v6441_v23, 5  ;;  %v8951_v6 = vrot.slane %v6644_v35, 5  ;;  %v1834_v31 = vpop.permute.xlu0 %1833 }
  0xde   : > { %v6767_v29 = vrot.slane %v9029_v51, 5  ;;  %2811 = vmatprep.subr.bf16.mxu1 %v2792_v49  ;;  %v2234_v25 = vor.u32 %v2233_v4, %v2230_v40  ;;  %v6776_v9 = vsel %vm1116_vm7, %v2054_v56, %v2061_v28  ;;  %v9032_v16 = vshrl.u32 %v6644_v35, 16  ;;  %v484_v40 = vld [vmem:[#allocation2 + $0xe4] sm:$0xf]  ;;  %v485_v4 = vld [vmem:[#allocation2 + $0xe8] sm:$0xf]  ;;  %v1836_v11 = vpop.permute.xlu1 %1835 }
  0xdf   : > { %934 = vrot.lane.b32.xlu0 %v9030_v47, %s5851_s5  ;;  %936 = vrot.lane.b32.xlu1 %v6581_v62, %s5851_s5  ;;  %v4136_v23 = vand.u32 %v4082_v22, %v9017_v5  ;;  %v2241_v33 = vor.u32 %v2240_v43, %v2237_v21  ;;  %v9033_v18 = vcombine.low %v6516_v45, %v6143_v3  ;;  %v9034_v62 = vshll.u32 %v6644_v35, 16  ;;  %v9037_v3 = vld [vmem:[#allocation12_spill] sm:$0xff]  ;;  %v488_v47 = vld [vmem:[#allocation2 + $0xf8] sm:$0xf] }
  0xe0   : > { %v6782_v15 = vrot.slane %v9032_v16, 4  ;;  %5143 = vmatmul.mubr.msk.bf16.gmra.mxu0 %vm2311_vm8, %v6776_v9  ;;  %v9035_v56 = vrot.slane %v6669_v27, 5  ;;  %v9036_v28 = vrot.slane %v6625_v61, 5  ;;  %v9038_v45 = vcombine.low %v9037_v3, %v9037_v3  ;;  %v487_v43 = vld [vmem:[#allocation2 + $0xf4] sm:$0xf] }
  0xe1   : > { %v1901_v49 = vsel %vm970_vm5, %v9033_v18, %v1702_v52  ;;  %v6795_v60 = vrot.slane %v9034_v62, 5  ;;  %2425 = vmatprep.mubr.bf16.mxu0 %v9024_v7  ;;  %v898_v21 = vrot.slane %v6757_v8, 5  ;;  %4155 = vmatprep.subr.bf16.mxu0 %v4136_v23  ;;  %v9040_v8 = vor.u32 %v6536_v1, %v6527_v38  ;;  %v9041_v23 = vld [vmem:[#allocation21_spill] sm:$0xff]  ;;  %v9044_v38 = vld [vmem:[#allocation11_spill] sm:$0xff] }
  0xe2   : > { %v6802_v22 = vsel %vm857_vm2, %v9036_v28, %v9035_v56  ;;  %v1903_v48 = vsel %vm970_vm5, %v9038_v45, %v1702_v52  ;;  %v1978_v51 = vsel %vm1051_vm6, %v1901_v49, %v1834_v31  ;;  %v6815_v56 = vsel %vm1116_vm7, %v2234_v25, %v2241_v33  ;;  %v9042_v25 = vld [vmem:[#allocation10_spill] sm:$0xff] }
  0xe3   : > { %v1980_v16 = vsel %vm1051_vm6, %v1903_v48, %v1836_v11  ;;  %v2063_v18 = vshrl.u32 %v1978_v51, 16  ;;  %v2066_v62 = vshll.u32 %v1978_v51, 16  ;;  %v9039_v52 = vor.u32 %v6525_v54, %v6523_v13  ;;  %795 = vrot.lane.b32.xlu1 %v9040_v8, %s5852_s6  ;;  %v1882_v13 = vpop.permute.xlu0 %1881 }
  0xe4   : > { %v2070_v49 = vshrl.u32 %v1980_v16, 16  ;;  %v2073_v31 = vshll.u32 %v1980_v16, 16  ;;  %v6827_v3 = vcombine.low %v484_v40, %v485_v4  ;;  %v9043_v33 = vcombine.low %v6508_v34, %v9042_v25  ;;  %5155 = vmatmul.mubr.msk.bf16.gmra.mxu1 %vm2311_vm8, %v6815_v56  ;;  %v1884_v16 = vpop.permute.xlu1 %1883 }
  0xe5   : > { %793 = vrot.lane.b32.xlu0 %v9039_v52, %s5852_s6  ;;  %v2065_v48 = vrot.slane %v2063_v18, 3  ;;  %v2068_v54 = vrot.slane %v2066_v62, 4  ;;  %v6835_v11 = vcombine.low %v487_v43, %v488_v47  ;;  %v9045_v1 = vcombine.low %v9044_v38, %v9044_v38  ;;  %2545 = vmatprep.mubr.bf16.mxu1 %v9024_v7  ;;  %v6854_v38 = vld [vmem:[#allocation2 + $0xa0] sm:$0x8] }
  0xe6   : > { %v1961_v45 = vsel %vm970_vm5, %v9043_v33, %v1726_v59  ;;  %v2072_v40 = vrot.slane %v2070_v49, 3  ;;  %v2075_v4 = vrot.slane %v2073_v31, 4  ;;  %v9046_v43 = vrot.slane %v6458_v46, 5  ;;  %v9047_v49 = vld [vmem:[#allocation29_spill] sm:$0xff]  ;;  %v9048_v46 = vld [vmem:[#allocation30_spill] sm:$0xff] }
  0xe7   : > { %v1963_v51 = vsel %vm970_vm5, %v9045_v1, %v1726_v59  ;;  %v2026_v34 = vsel %vm1051_vm6, %v1961_v45, %v1882_v13  ;;  %v2069_v18 = vor.u32 %v2068_v54, %v2065_v48  ;;  %940 = vrot.lane.b32.xlu1 %v6600_v12, %s5851_s5  ;;  %v6849_v59 = vld [vmem:[#allocation2 + $0xec] ss:$0 sps:$4 sm:$0x11]   ;;  %v1704_v54 = vpop.permute.xlu0 %1703  ;;  %v762_v13 = vshrl.u32 %v6827_v3, 16  ;;  %v9051_v31 = vld [vmem:[#allocation13_spill] sm:$0xff] }
  0xe8   : > { %v2028_v62 = vsel %vm1051_vm6, %v1963_v51, %v1884_v16  ;;  %v2243_v52 = vshrl.u32 %v2026_v34, 16  ;;  %v2246_v8 = vshll.u32 %v2026_v34, 16  ;;  %v2076_v47 = vor.u32 %v2075_v4, %v2072_v40  ;;  %v1728_v4 = vpop.permute.xlu1 %1727  ;;  %v6861_v34 = vld [vmem:[#allocation2 + $0x90] sm:$0x8] }
  0xe9   : > { %938 = vrot.lane.b32.xlu0 %v9046_v43, %s5851_s5  ;;  %v2250_v25 = vshrl.u32 %v2028_v62, 16  ;;  %v2253_v33 = vshll.u32 %v2028_v62, 16  ;;  %v765_v16 = vshll.u32 %v6827_v3, 16  ;;  %v6872_v43 = vsel %vm857_vm2, %v8951_v6, %v898_v21  ;;  %v5615_v1 = vld [vmem:[#allocation2 + $0xfc] ss:$0 sps:$4 sm:$0x11]  }
  0xea   : > { %v2245_v45 = vrot.slane %v2243_v52, 3  ;;  %v2248_v48 = vrot.slane %v2246_v8, 4  ;;  %v6864_v52 = vsel %vm1116_vm7, %v2069_v18, %v2076_v47  ;;  %v9049_v8 = vrot.slane %v6460_v0, 5 }
  0xeb   : > { %v2252_v51 = vrot.slane %v2250_v25, 3  ;;  %v2255_v40 = vrot.slane %v2253_v33, 4  ;;  %v770_v25 = vshrl.u32 %v6835_v11, 16  ;;  %5144 = vmatmul.mubr.msk.bf16.gmra.mxu0 %vm2311_vm8, %v6864_v52  ;;  %944 = vrot.lane.b32.xlu1 %v6633_v63, %s5851_s5  ;;  %v773_v18 = vshll.u32 %v6835_v11, 16 }
  0xec   : > { %v2249_v62 = vor.u32 %v2248_v48, %v2245_v45  ;;  %v901_v0 = vrot.slane %v6849_v59, 5  ;;  %v9050_v45 = vcombine.low %v6531_v10, %v6183_v50  ;;  %v1838_v48 = vpop.permute.xlu0 %1837  ;;  %2435 = vmatprep.mubr.bf16.mxu0 %v9024_v7  ;;  %v9052_v50 = vcombine.low %v9051_v31, %v9051_v31  ;;  %v9058_v59 = vld [vmem:[#allocation15_spill] sm:$0xff] }
  0xed   : > { %942 = vrot.lane.b32.xlu0 %v9049_v8, %s5851_s5  ;;  %v2256_v33 = vor.u32 %v2255_v40, %v2252_v51  ;;  %v6887_v51 = vrot.slane %v762_v13, 4  ;;  %v6889_v40 = vld [vmem:[#allocation2 + $0xa4] sm:$0xf]  ;;  %v6893_v8 = vld [vmem:[#allocation2 + $0x94] sm:$0xf]  ;;  %v6905_v6 = vrot.slane %v765_v16, 5  ;;  %v9054_v31 = vor.u32 %v6552_v44, %v6550_v58 }
  0xee   : > { %v1906_v21 = vsel %vm970_vm5, %v9050_v45, %v1704_v54  ;;  %v1908_v10 = vsel %vm970_vm5, %v9052_v50, %v1704_v54  ;;  %v1840_v45 = vpop.permute.xlu1 %1839  ;;  %v6914_v54 = vrot.slane %v770_v25, 4  ;;  %v9055_v16 = vor.u32 %v6604_v39, %v6602_v26  ;;  %v3153_v50 = vld [vmem:[#allocation2 + $0x24] sm:$0xf] }
  0xef   : > { %v1982_v13 = vsel %vm1051_vm6, %v1906_v21, %v1838_v48  ;;  %v6903_v28 = vsel %vm1116_vm7, %v2249_v62, %v2256_v33  ;;  %v1984_v63 = vsel %vm1051_vm6, %v1908_v10, %v1840_v45  ;;  %v6921_v62 = vrot.slane %v773_v18, 5  ;;  %v9056_v10 = vld [vmem:[#allocation14_spill] sm:$0xff] }
  0xf0   : > { %9053 = vst [vmem:[#allocation34_spill] sm:$0xff] %v6903_v28  ;;  %v2078_v14 = vshrl.u32 %v1982_v13, 16  ;;  %v2081_v12 = vshll.u32 %v1982_v13, 16  ;;  %5156 = vmatmul.mubr.msk.bf16.gmra.mxu1 %vm2311_vm8, %v6903_v28  ;;  %v2085_v21 = vshrl.u32 %v1984_v63, 16  ;;  %v2088_v48 = vshll.u32 %v1984_v63, 16  ;;  %799 = vrot.lane.b32.xlu1 %v9055_v16, %s5852_s6  ;;  %v1886_v63 = vpop.permute.xlu0 %1885 }
  0xf1   : > { %797 = vrot.lane.b32.xlu0 %v9054_v31, %s5852_s6  ;;  %2555 = vmatprep.mubr.bf16.mxu1 %v9024_v7  ;;  %v9057_v58 = vcombine.low %v6529_v32, %v9056_v10  ;;  %v904_v13 = vrot.slane %v5615_v1, 5  ;;  %v3154_v31 = vld [vmem:[#allocation2 + $0x28] sm:$0xf]  ;;  %v9059_v39 = vcombine.low %v9058_v59, %v9058_v59 }
  0xf2   : > { %v2080_v25 = vrot.slane %v2078_v14, 3  ;;  %v2083_v45 = vrot.slane %v2081_v12, 4  ;;  %v2087_v18 = vrot.slane %v2085_v21, 3  ;;  %v2090_v16 = vrot.slane %v2088_v48, 4  ;;  %v1888_v27 = vpop.permute.xlu1 %1887 }
  0xf3   : > { %v1966_v44 = vsel %vm970_vm5, %v9057_v58, %v1728_v4  ;;  %v1968_v26 = vsel %vm970_vm5, %v9059_v39, %v1728_v4  ;;  %v9060_v14 = vrot.slane %v6473_v19, 5  ;;  %v6939_v4 = vcombine.low %v3153_v50, %v3154_v31  ;;  %v6951_v19 = vld [vmem:[%s8895_s1] ss:$12 sps:$4 sm:$0x1f]  }
  0xf4   : > { %v2030_v33 = vsel %vm1051_vm6, %v1966_v44, %v1886_v63  ;;  %v2084_v47 = vor.u32 %v2083_v45, %v2080_v25  ;;  %v2032_v32 = vsel %vm1051_vm6, %v1968_v26, %v1888_v27  ;;  %v2091_v1 = vor.u32 %v2090_v16, %v2087_v18  ;;  %948 = vrot.lane.b32.xlu1 %v6666_v36, %s5851_s5  ;;  %v1706_v48 = vpop.permute.xlu0 %1705 }
  0xf5   : > { %v2258_v10 = vshrl.u32 %v2030_v33, 16  ;;  %v2261_v58 = vshll.u32 %v2030_v33, 16  ;;  %946 = vrot.lane.b32.xlu0 %v9060_v14, %s5851_s5  ;;  %v2265_v12 = vshrl.u32 %v2032_v32, 16  ;;  %v2268_v28 = vshll.u32 %v2032_v32, 16  ;;  %v9065_v14 = vld [vmem:[#allocation16_spill] sm:$0xff] }
  0xf6   : > { %v9061_v33 = vrot.slane %v6827_v3, 5  ;;  %v1842_v50 = vpop.permute.xlu1 %1841  ;;  %v9062_v45 = vcombine.low %v6621_v41, %v6225_v37  ;;  %v6961_v26 = vsel %vm1116_vm7, %v2084_v47, %v2091_v1  ;;  %v9063_v18 = vrot.slane %v6498_v17, 5  ;;  %v5620_v37 = vld [vmem:[#allocation2 + $0x2c] ss:$0 sps:$4 sm:$0x11]  }
  0xf7   : > { %v2260_v59 = vrot.slane %v2258_v10, 3  ;;  %v2263_v21 = vrot.slane %v2261_v58, 4  ;;  %v2267_v25 = vrot.slane %v2265_v12, 3  ;;  %v2270_v36 = vrot.slane %v2268_v28, 4  ;;  %v3156_v41 = vld [vmem:[#allocation2 + $0x34] sm:$0xf]  ;;  %5145 = vmatmul.mubr.msk.bf16.gmra.mxu0 %vm2311_vm8, %v6961_v26 }
  0xf8   : > { %v6946_v44 = vsel %vm857_vm2, %v9061_v33, %v901_v0  ;;  %v1911_v63 = vsel %vm970_vm5, %v9062_v45, %v1706_v48  ;;  %v9064_v28 = vrot.slane %v6835_v11, 5  ;;  %952 = vrot.lane.b32.xlu1 %v6676_v55, %s5851_s5  ;;  %v3361_v47 = vshrl.u32 %v6939_v4, 16  ;;  %v3157_v17 = vld [vmem:[#allocation2 + $0x38] sm:$0xf]  ;;  %v1844_v12 = vpop.permute.xlu0 %1843  ;;  %2445 = vmatprep.mubr.bf16.mxu0 %v9024_v7  ;;  %v6987_v55 = vld [vmem:[#allocation2 + $0xb0] sm:$0x8] }
  0xf9   : > { %v2264_v39 = vor.u32 %v2263_v21, %v2260_v59  ;;  %v1986_v0 = vsel %vm1051_vm6, %v1911_v63, %v1842_v50  ;;  %950 = vrot.lane.b32.xlu0 %v9063_v18, %s5851_s5  ;;  %v2271_v32 = vor.u32 %v2270_v36, %v2267_v25  ;;  %v9066_v1 = vcombine.low %v9065_v14, %v9065_v14  ;;  %v6985_v25 = vld [vmem:[#allocation2 + $0xc0] sm:$0x8]  ;;  %v3160_v59 = vld [vmem:[#allocation2 + $0x48] sm:$0xf] }
  0xfa   : > { %v6969_v16 = vsel %vm857_vm2, %v9064_v28, %v904_v13  ;;  %v2093_v10 = vshrl.u32 %v1986_v0, 16  ;;  %v2096_v58 = vshll.u32 %v1986_v0, 16  ;;  %v3364_v21 = vshll.u32 %v6939_v4, 16  ;;  %v1708_v45 = vpop.permute.xlu1 %1707  ;;  %v5657_v0 = vld [vmem:[%s8895_s1 + $0x20] ss:$12 sps:$4 sm:$0x3e]  }
  0xfb   : > { %v1913_v13 = vsel %vm970_vm5, %v9066_v1, %v1706_v48  ;;  %v6991_v48 = vsel %vm1116_vm7, %v2264_v39, %v2271_v32  ;;  %v7002_v14 = vcombine.low %v3156_v41, %v3157_v17  ;;  %v9068_v39 = vor.u32 %v6795_v60, %v6782_v15  ;;  %v7012_v1 = vld [vmem:[#allocation2 + $0xc4] sm:$0xf]  ;;  %v9070_v41 = vld [vmem:[#allocation17_spill] sm:$0xff] }
  0xfc   : > { %v2095_v36 = vrot.slane %v2093_v10, 3  ;;  %v2098_v50 = vrot.slane %v2096_v58, 4  ;;  %v1988_v63 = vsel %vm1051_vm6, %v1913_v13, %v1844_v12  ;;  %5157 = vmatmul.mubr.msk.bf16.gmra.mxu1 %vm2311_vm8, %v6991_v48  ;;  %v9067_v10 = vor.u32 %v6767_v29, %v6763_v57  ;;  %v7016_v57 = vld [vmem:[#allocation2 + $0xb4] sm:$0xf]  ;;  %v1846_v12 = vpop.permute.xlu0 %1845 }
  0xfd   : > { %v2100_v18 = vshrl.u32 %v1988_v63, 16  ;;  %v2103_v28 = vshll.u32 %v1988_v63, 16  ;;  %v3569_v58 = vrot.slane %v5620_v37, 5  ;;  %5397 = vmatprep.mubr.msk.bf16.mxu1 %vm2311_vm8, %v6713_v30  ;;  %803 = vrot.lane.b32.xlu1 %v9068_v39, %s5852_s6  ;;  %v7010_v32 = vrot.slane %v3361_v47, 4  ;;  %v9069_v37 = vld [vmem:[#allocation32_spill] sm:$0xff] }
  0xfe   : > { %801 = vrot.lane.b32.xlu0 %v9067_v10, %s5852_s6  ;;  %v9071_v17 = vcombine.low %v6623_v42, %v9070_v41  ;;  %v7026_v63 = vrot.slane %v3364_v21, 5  ;;  %v9072_v10 = vld [vmem:[#allocation18_spill] sm:$0xff]  ;;  %v1848_v31 = vpop.permute.xlu1 %1847  ;;  %v2099_v27 = vor.u32 %v2098_v50, %v2095_v36  ;;  %v4083_v33 = vrot.slane %v5657_v0, 1  ;;  %v5624_v0 = vld [vmem:[#allocation2 + $0x3c] ss:$0 sps:$4 sm:$0x11]  }
  0xff   : > { %v2102_v60 = vrot.slane %v2100_v18, 3  ;;  %v2105_v47 = vrot.slane %v2103_v28, 4  ;;  %v9073_v39 = vcombine.low %v9072_v10, %v9072_v10  ;;  %v3159_v30 = vld [vmem:[#allocation2 + $0x44] sm:$0xf]  ;;  %v9074_v21 = vrot.slane %v6625_v61, 5 }
 0x100   : > { %v1916_v15 = vsel %vm970_vm5, %v9071_v17, %v1708_v45  ;;  %v3369_v50 = vshrl.u32 %v7002_v14, 16  ;;  %v7048_v61 = vcombine.low %v3159_v30, %v3160_v59  ;;  %v9077_v59 = vrot.slane %v6644_v35, 5 }
 0x101   : > { %v1918_v13 = vsel %vm970_vm5, %v9073_v39, %v1708_v45  ;;  %v1990_v29 = vsel %vm1051_vm6, %v1916_v15, %v1846_v12  ;;  %v2106_v42 = vor.u32 %v2105_v47, %v2102_v60  ;;  %956 = vrot.lane.b32.xlu1 %v6802_v22, %s5851_s5  ;;  %v9075_v45 = vrot.slane %v6939_v4, 5 }
 0x102   : > { %v1992_v41 = vsel %vm1051_vm6, %v1918_v13, %v1848_v31  ;;  %v2108_v18 = vshrl.u32 %v1990_v29, 16  ;;  %v2111_v28 = vshll.u32 %v1990_v29, 16  ;;  %954 = vrot.lane.b32.xlu0 %v9074_v21, %s5851_s5  ;;  %v1710_v29 = vpop.permute.xlu0 %1709  ;;  %v1850_v12 = vpop.permute.xlu1 %1849  ;;  %v9076_v22 = vcombine.low %v6753_v24, %v9031_v53 }
 0x103   : > { %v2115_v17 = vshrl.u32 %v1992_v41, 16  ;;  %v2118_v10 = vshll.u32 %v1992_v41, 16  ;;  %v7042_v36 = vsel %vm857_vm2, %v9075_v45, %v3569_v58  ;;  %v7046_v15 = vsel %vm1116_vm7, %v2099_v27, %v2106_v42  ;;  %v3162_v45 = vld [vmem:[#allocation2 + $0x54] sm:$0xf] }
 0x104   : > { %v2110_v31 = vrot.slane %v2108_v18, 3  ;;  %v2113_v13 = vrot.slane %v2111_v28, 4  ;;  %v1921_v58 = vsel %vm970_vm5, %v9076_v22, %v1710_v29  ;;  %5146 = vmatmul.mubr.msk.bf16.gmra.mxu0 %vm2311_vm8, %v7046_v15  ;;  %v7057_v39 = vand.u32 %v4083_v33, %v9017_v5  ;;  %5398 = vmatmul.mubr.msk.bf16.vlgmr.msra.gmra.mxu1 %vm2311_vm8, %v6776_v9  ;;  %v7071_v28 = vld [vmem:[#allocation2 + $0x4c] ss:$0 sps:$4 sm:$0x11]   ;;  %v9078_v9 = vld [vmem:[#allocation20_spill] sm:$0xff] }
 0x105   : > { %v2117_v60 = vrot.slane %v2115_v17, 3  ;;  %v2120_v47 = vrot.slane %v2118_v10, 4  ;;  %v1994_v27 = vsel %vm1051_vm6, %v1921_v58, %v1850_v12  ;;  %v3372_v24 = vshll.u32 %v7002_v14, 16  ;;  %5401 = vmatprep.mubr.msk.bf16.mxu1 %vm2311_vm8, %v6864_v52  ;;  %960 = vrot.lane.b32.xlu1 %v6872_v43, %s5851_s5 }
 0x106   : > { %v2114_v41 = vor.u32 %v2113_v13, %v2110_v31  ;;  %958 = vrot.lane.b32.xlu0 %v9077_v59, %s5851_s5  ;;  %v3571_v53 = vrot.slane %v7002_v14, 5  ;;  %v2123_v42 = vshrl.u32 %v1994_v27, 16  ;;  %v2126_v18 = vshll.u32 %v1994_v27, 16  ;;  %v1852_v17 = vpop.permute.xlu0 %1851  ;;  %2455 = vmatprep.mubr.bf16.mxu0 %v9024_v7  ;;  %v7084_v31 = vld [vmem:[#allocation2 + $0x38] sm:$0xf] }
 0x107   : > { %v2121_v30 = vor.u32 %v2120_v47, %v2117_v60  ;;  %v3572_v33 = vrot.slane %v5624_v0, 5  ;;  %v9079_v35 = vcombine.low %v9078_v9, %v9078_v9  ;;  %v9080_v10 = vand.u32 %v6951_v19, %v9017_v5  ;;  %v3163_v0 = vld [vmem:[#allocation2 + $0x58] sm:$0xf]  ;;  %v1712_v47 = vpop.permute.xlu1 %1711 }
 0x108   : > { %v3367_v52 = vor.u32 %v7026_v63, %v7010_v32  ;;  %v3377_v43 = vshrl.u32 %v7048_v61, 16  ;;  %v2128_v60 = vrot.slane %v2126_v18, 4  ;;  %v9081_v27 = vor.u32 %v6905_v6, %v6887_v51 }
 0x109   : > { %v1923_v21 = vsel %vm970_vm5, %v9079_v35, %v1710_v29  ;;  %2812 = vmatpush1.bf16.msra.mxu1 %v9080_v10  ;;  %v2125_v29 = vrot.slane %v2123_v42, 3  ;;  %v7090_v19 = vsel %vm1116_vm7, %v2114_v41, %v2121_v30  ;;  %v7097_v59 = vrot.slane %v3369_v50, 4 }
 0x10a   : > { %v1996_v12 = vsel %vm1051_vm6, %v1923_v21, %v1852_v17  ;;  %5463 = vmatprep.subr.bf16.mxu1 %v7057_v39  ;;  %805 = vrot.lane.b32.xlu0 %v9081_v27, %s5852_s6  ;;  %v7099_v9 = vrot.slane %v3372_v24, 5  ;;  %v9082_v42 = vor.u32 %v6921_v62, %v6914_v54  ;;  %v7108_v41 = vsel %vm857_vm2, %v3571_v53, %v3572_v33  ;;  %v1854_v54 = vpop.permute.xlu0 %1853  ;;  %v9084_v21 = vld [vmem:[#allocation22_spill] sm:$0xff] }
 0x10b   : > { %v2130_v22 = vshrl.u32 %v1996_v12, 16  ;;  %v2133_v58 = vshll.u32 %v1996_v12, 16  ;;  %v3380_v30 = vshll.u32 %v7048_v61, 16  ;;  %v8954_v18 = vrot.slane %v7048_v61, 5  ;;  %v1856_v10 = vpop.permute.xlu1 %1855  ;;  %v7134_v27 = vld [vmem:[#allocation2] sm:$0x8] }
 0x10c   : > { %807 = vrot.lane.b32.xlu1 %v9082_v42, %s5852_s6  ;;  %v7112_v6 = vcombine.low %v3162_v45, %v3163_v0  ;;  %v9083_v51 = vcombine.low %v6784_v20, %v9041_v23  ;;  %v3575_v62 = vrot.slane %v7071_v28, 5  ;;  %v9085_v33 = vcombine.low %v9084_v21, %v9084_v21  ;;  %5147 = vmatmul.mubr.msk.bf16.gmra.mxu0 %vm2311_vm8, %v7090_v19  ;;  %v5632_v23 = vld [vmem:[#allocation2 + $0x5c] ss:$0 sps:$4 sm:$0x11]   ;;  %v7136_v42 = vld [vmem:[#allocation2 + $0x10] sm:$0x8] }
 0x10d   : > { %v2132_v24 = vrot.slane %v2130_v22, 3  ;;  %v2135_v35 = vrot.slane %v2133_v58, 4  ;;  %v2129_v45 = vor.u32 %v2128_v60, %v2125_v29  ;;  %v7126_v20 = vrot.slane %v3377_v43, 4  ;;  %5402 = vmatmul.mubr.msk.bf16.gmra.mxu1 %vm2311_vm8, %v6961_v26  ;;  %2465 = vmatprep.mubr.bf16.mxu0 %v9024_v7  ;;  %v3166_v21 = vld [vmem:[#allocation2 + $0x68] sm:$0xf] }
 0x10e   : > { %v1926_v50 = vsel %vm970_vm5, %v9083_v51, %v1712_v47  ;;  %v1928_v17 = vsel %vm970_vm5, %v9085_v33, %v1712_v47  ;;  %v9086_v47 = vrot.slane %v6827_v3, 5  ;;  %5405 = vmatprep.mubr.msk.bf16.mxu1 %vm2311_vm8, %v7046_v15  ;;  %v7142_v60 = vrot.slane %v3380_v30, 5  ;;  %v3165_v51 = vld [vmem:[#allocation2 + $0x64] sm:$0xf] }
 0x10f   : > { %v1998_v12 = vsel %vm1051_vm6, %v1926_v50, %v1854_v54  ;;  %v2136_v0 = vor.u32 %v2135_v35, %v2132_v24  ;;  %v2000_v22 = vsel %vm1051_vm6, %v1928_v17, %v1856_v10  ;;  %v3385_v26 = vshrl.u32 %v7112_v6, 16  ;;  %v1714_v24 = vpop.permute.xlu0 %1713  ;;  %v1716_v17 = vpop.permute.xlu1 %1715  ;;  %v7149_v10 = vld [vmem:[#allocation2 + $0x20] sm:$0x8] }
 0x110   : > { %v2138_v58 = vshrl.u32 %v1998_v12, 16  ;;  %v2141_v28 = vshll.u32 %v1998_v12, 16  ;;  %962 = vrot.lane.b32.xlu0 %v9086_v47, %s5851_s5  ;;  %v2145_v29 = vshrl.u32 %v2000_v22, 16  ;;  %v2148_v43 = vshll.u32 %v2000_v22, 16  ;;  %964 = vrot.lane.b32.xlu1 %v6946_v44, %s5851_s5 }
 0x111   : > { %v2137_v35 = vsel %vm1116_vm7, %v2129_v45, %v2136_v0  ;;  %v3388_v54 = vshll.u32 %v7112_v6, 16  ;;  %v8953_v44 = vrot.slane %v7112_v6, 5  ;;  %v3578_v30 = vrot.slane %v5632_v23, 5  ;;  %v7156_v45 = vld [vmem:[#allocation2 + $0x4] sm:$0xf] }
 0x112   : > { %v2140_v50 = vrot.slane %v2138_v58, 3  ;;  %v2143_v3 = vrot.slane %v2141_v28, 4  ;;  %v2147_v33 = vrot.slane %v2145_v29, 3  ;;  %v2150_v15 = vrot.slane %v2148_v43, 4  ;;  %v7160_v28 = vld [vmem:[#allocation2 + $0x14] sm:$0xf] }
 0x113   : > { %v9087_v22 = vrot.slane %v6835_v11, 5  ;;  %v3375_v58 = vor.u32 %v7099_v9, %v7097_v59  ;;  %v3383_v11 = vor.u32 %v7142_v60, %v7126_v20  ;;  %v7171_v59 = vsel %vm857_vm2, %v8954_v18, %v3575_v62  ;;  %v7175_v29 = vld [vmem:[#allocation2 + $0x30] sm:$0x8]  ;;  %v1860_v13 = vpop.permute.xlu1 %1859  ;;  %v9100_v60 = vld [vmem:[#allocation27_spill] sm:$0xff] }
 0x114   : > { %v2144_v12 = vor.u32 %v2143_v3, %v2140_v50  ;;  %v2151_v47 = vor.u32 %v2150_v15, %v2147_v33  ;;  %968 = vrot.lane.b32.xlu1 %v6969_v16, %s5851_s5  ;;  %v7173_v9 = vcombine.low %v3165_v51, %v3166_v21  ;;  %v9088_v43 = vcombine.low %v6861_v34, %v6893_v8  ;;  %v1858_v3 = vpop.permute.xlu0 %1857  ;;  %v7185_v15 = vld [vmem:[#allocation2 + $0x24] sm:$0xf] }
 0x115   : > { %966 = vrot.lane.b32.xlu0 %v9087_v22, %s5851_s5  ;;  %v7181_v33 = vrot.slane %v3385_v26, 4  ;;  %v7183_v16 = vrot.slane %v3388_v54, 5  ;;  %v9089_v22 = vld [vmem:[#allocation24_spill] sm:$0xff]  ;;  %5148 = vmatmul.mubr.msk.bf16.gmra.mxu0 %vm2311_vm8, %v2137_v35  ;;  %v7199_v26 = vsel %vm857_vm2, %v8953_v44, %v3578_v30  ;;  %v9092_v32 = vcombine.low %v6854_v38, %v6889_v40  ;;  %v3169_v40 = vld [vmem:[#allocation2 + $0x78] sm:$0xf] }
 0x116   : > { %v1931_v50 = vsel %vm970_vm5, %v9088_v43, %v1714_v24  ;;  %v9090_v51 = vcombine.low %v9089_v22, %v9089_v22  ;;  %v2152_v8 = vsel %vm1116_vm7, %v2144_v12, %v2151_v47  ;;  %5406 = vmatmul.mubr.msk.bf16.gmra.mxu1 %vm2311_vm8, %v7090_v19  ;;  %v5638_v47 = vld [vmem:[#allocation2 + $0x6c] ss:$0 sps:$4 sm:$0x11]   ;;  %v3393_v19 = vshrl.u32 %v7173_v9, 16  ;;  %2475 = vmatprep.mubr.bf16.mxu0 %v9024_v7  ;;  %v3168_v38 = vld [vmem:[#allocation2 + $0x74] sm:$0xf] }
 0x117   : > { %v2002_v34 = vsel %vm1051_vm6, %v1931_v50, %v1858_v3  ;;  %5409 = vmatprep.mubr.msk.bf16.mxu1 %vm2311_vm8, %v2137_v35  ;;  %v3396_v3 = vshll.u32 %v7173_v9, 16  ;;  %v1936_v63 = vsel %vm970_vm5, %v9092_v32, %v1716_v17  ;;  %v8955_v35 = vrot.slane %v7173_v9, 5  ;;  %v1864_v12 = vpop.permute.xlu1 %1863 }
 0x118   : > { %v1933_v21 = vsel %vm970_vm5, %v9090_v51, %v1714_v24  ;;  %v2153_v43 = vshrl.u32 %v2002_v34, 16  ;;  %v2156_v62 = vshll.u32 %v2002_v34, 16  ;;  %v7208_v24 = vld [vmem:[#allocation2 + $0x34] sm:$0xf]  ;;  %v1862_v51 = vpop.permute.xlu0 %1861 }
 0x119   : > { %v2004_v54 = vsel %vm1051_vm6, %v1933_v21, %v1860_v13  ;;  %3488 = vrot.lane.b32.xlu0 %v3367_v52, %s5852_s6  ;;  %v9091_v13 = vrot.slane %v6939_v4, 5  ;;  %v9093_v21 = vld [vmem:[#allocation23_spill] sm:$0xff]  ;;  %v2006_v23 = vsel %vm1051_vm6, %v1936_v63, %v1862_v51  ;;  %v3391_v63 = vor.u32 %v7183_v16, %v7181_v33 }
 0x11a   : > { %v2160_v30 = vshrl.u32 %v2004_v54, 16  ;;  %v2163_v50 = vshll.u32 %v2004_v54, 16  ;;  %v2155_v52 = vrot.slane %v2153_v43, 3  ;;  %v2158_v22 = vrot.slane %v2156_v62, 4 }
 0x11b   : > { %3616 = vrot.lane.b32.xlu1 %v9091_v13, %s5851_s5  ;;  %v9094_v4 = vcombine.low %v9093_v21, %v9093_v21  ;;  %v2168_v43 = vshrl.u32 %v2006_v23, 16  ;;  %v2171_v0 = vshll.u32 %v2006_v23, 16 }
 0x11c   : > { %v2162_v54 = vrot.slane %v2160_v30, 3  ;;  %v2165_v13 = vrot.slane %v2163_v50, 4  ;;  %v2159_v32 = vor.u32 %v2158_v22, %v2155_v52  ;;  %v7235_v52 = vcombine.low %v3168_v38, %v3169_v40  ;;  %v3172_v22 = vld [vmem:[#allocation2 + $0x88] sm:$0xf]  ;;  %v7250_v38 = vld [vmem:[#allocation2 + $0x58] sm:$0xf] }
 0x11d   : > { %v1938_v34 = vsel %vm970_vm5, %v9094_v4, %v1716_v17  ;;  %3618 = vrot.lane.b32.xlu0 %v7042_v36, %s5851_s5  ;;  %v3581_v17 = vrot.slane %v5638_v47, 5  ;;  %v2170_v30 = vrot.slane %v2168_v43, 3  ;;  %v2173_v50 = vrot.slane %v2171_v0, 4  ;;  %v1718_v4 = vpop.permute.xlu0 %1717  ;;  %5149 = vmatmul.mubr.msk.bf16.gmra.mxu0 %vm2311_vm8, %v2152_v8  ;;  %v7244_v47 = vld [vmem:[#allocation2 + $0x7c] ss:$0 sps:$4 sm:$0x11]  }
 0x11e   : > { %v2008_v62 = vsel %vm1051_vm6, %v1938_v34, %v1864_v12  ;;  %v2166_v44 = vor.u32 %v2165_v13, %v2162_v54  ;;  %v3171_v12 = vld [vmem:[#allocation2 + $0x84] sm:$0xf]  ;;  %v1720_v34 = vpop.permute.xlu1 %1719  ;;  %v7238_v36 = vrot.slane %v3393_v19, 4  ;;  %v7240_v54 = vrot.slane %v3396_v3, 5  ;;  %5410 = vmatmul.mubr.msk.bf16.gmra.mxu1 %vm2311_vm8, %v2152_v8  ;;  %v7246_v13 = vld [vmem:[#allocation2 + $0x48] sm:$0xf]  ;;  %2485 = vmatprep.mubr.bf16.mxu0 %v9024_v7 }
 0x11f   : > { %v2175_v18 = vshrl.u32 %v2008_v62, 16  ;;  %v2178_v21 = vshll.u32 %v2008_v62, 16  ;;  %3490 = vrot.lane.b32.xlu1 %v3375_v58, %s5852_s6  ;;  %v2174_v58 = vor.u32 %v2173_v50, %v2170_v30  ;;  %v7263_v8 = vcombine.low %v3171_v12, %v3172_v22  ;;  %v3174_v12 = vld [vmem:[#allocation2 + $0x94] sm:$0xf]  ;;  %v3175_v22 = vld [vmem:[#allocation2 + $0x98] sm:$0xf] }
 0x120   : > { %v2167_v0 = vsel %vm1116_vm7, %v2159_v32, %v2166_v44  ;;  %v7261_v44 = vsel %vm857_vm2, %v8955_v35, %v3581_v17  ;;  %v9095_v3 = vcombine.low %v6987_v55, %v7016_v57  ;;  %v3401_v14 = vshrl.u32 %v7235_v52, 16 }
 0x121   : > { %v2177_v23 = vrot.slane %v2175_v18, 3  ;;  %v2180_v51 = vrot.slane %v2178_v21, 4  ;;  %5413 = vmatprep.mubr.msk.bf16.mxu1 %vm2311_vm8, %v2167_v0  ;;  %3620 = vrot.lane.b32.xlu0 %v3571_v53, %s5851_s5  ;;  %v1866_v62 = vpop.permute.xlu0 %1865  ;;  %v3404_v53 = vshll.u32 %v7235_v52, 16  ;;  %v3583_v43 = vrot.slane %v7235_v52, 5  ;;  %v9096_v21 = vld [vmem:[#allocation26_spill] sm:$0xff] }
 0x122   : > { %v1941_v32 = vsel %vm970_vm5, %v9095_v3, %v1718_v4  ;;  %v9097_v17 = vcombine.low %v9096_v21, %v9096_v21  ;;  %v1868_v55 = vpop.permute.xlu1 %1867  ;;  %v3584_v19 = vrot.slane %v7244_v47, 5  ;;  %v7302_v20 = vcombine.low %v3174_v12, %v3175_v22  ;;  %v5646_v12 = vld [vmem:[#allocation2 + $0x8c] ss:$0 sps:$4 sm:$0x11]  }
 0x123   : > { %v2181_v40 = vor.u32 %v2180_v51, %v2177_v23  ;;  %3622 = vrot.lane.b32.xlu1 %v7108_v41, %s5851_s5  ;;  %v2010_v57 = vsel %vm1051_vm6, %v1941_v32, %v1866_v62  ;;  %v3399_v41 = vor.u32 %v7240_v54, %v7238_v36  ;;  %v3586_v33 = vrot.slane %v7263_v8, 5  ;;  %v7408_v54 = vld [vmem:[#allocation2 + $0x70] sm:$0x8] }
 0x124   : > { %v1943_v30 = vsel %vm970_vm5, %v9097_v17, %v1718_v4  ;;  %v2183_v51 = vshrl.u32 %v2010_v57, 16  ;;  %v2186_v3 = vshll.u32 %v2010_v57, 16  ;;  %v3409_v4 = vshrl.u32 %v7263_v8, 16  ;;  %v7300_v57 = vld [vmem:[#allocation2 + $0x40] sm:$0x8] }
 0x125   : > { %v7281_v50 = vsel %vm1116_vm7, %v2174_v58, %v2181_v40  ;;  %v2012_v23 = vsel %vm1051_vm6, %v1943_v30, %v1868_v55  ;;  %3492 = vrot.lane.b32.xlu0 %v3383_v11, %s5852_s6  ;;  %v3412_v58 = vshll.u32 %v7263_v8, 16  ;;  %v9098_v40 = vcombine.low %v6985_v25, %v7012_v1  ;;  %v1870_v30 = vpop.permute.xlu0 %1869  ;;  %5150 = vmatmul.mubr.msk.bf16.gmra.mxu0 %vm2311_vm8, %v2167_v0  ;;  %v7516_v8 = vld [vmem:[#allocation2 + $0x80] sm:$0x8] }
 0x126   : > { %v2190_v21 = vshrl.u32 %v2012_v23, 16  ;;  %v2193_v18 = vshll.u32 %v2012_v23, 16  ;;  %v2185_v62 = vrot.slane %v2183_v51, 3  ;;  %v2188_v17 = vrot.slane %v2186_v3, 4  ;;  %v1872_v1 = vpop.permute.xlu1 %1871  ;;  %5414 = vmatmul.mubr.msk.bf16.gmra.mxu1 %vm2311_vm8, %v7281_v50  ;;  %2495 = vmatprep.mubr.bf16.mxu0 %v9024_v7 }
 0x127   : > { %v1946_v32 = vsel %vm970_vm5, %v9098_v40, %v1720_v34  ;;  %v9099_v55 = vrot.slane %v7048_v61, 5  ;;  %v9101_v11 = vcombine.low %v9100_v60, %v9100_v60 }
 0x128   : > { %v2192_v35 = vrot.slane %v2190_v21, 3  ;;  %v2195_v25 = vrot.slane %v2193_v18, 4  ;;  %v2014_v51 = vsel %vm1051_vm6, %v1946_v32, %v1870_v30  ;;  %v2189_v3 = vor.u32 %v2188_v17, %v2185_v62  ;;  %v7316_v18 = vld [vmem:[#allocation2 + $0x44] sm:$0xf]  ;;  %v3178_v62 = vld [vmem:[#allocation2 + $0xa8] sm:$0xf] }
 0x129   : > { %3624 = vrot.lane.b32.xlu1 %v9099_v55, %s5851_s5  ;;  %v1948_v23 = vsel %vm970_vm5, %v9101_v11, %v1720_v34  ;;  %v2198_v40 = vshrl.u32 %v2014_v51, 16  ;;  %v2201_v55 = vshll.u32 %v2014_v51, 16  ;;  %3626 = vrot.lane.b32.xlu0 %v7171_v59, %s5851_s5  ;;  %v3177_v32 = vld [vmem:[#allocation2 + $0xa4] sm:$0xf]  ;;  %v778_v60 = vpop.permute.xlu0 %777  ;;  %v3420_v11 = vshll.u32 %v7302_v20, 16 }
 0x12a   : > { %v2016_v61 = vsel %vm1051_vm6, %v1948_v23, %v1872_v1  ;;  %v2196_v22 = vor.u32 %v2195_v25, %v2192_v35  ;;  %v3417_v35 = vshrl.u32 %v7302_v20, 16  ;;  %v780_v25 = vpop.permute.xlu1 %779  ;;  %v7326_v1 = vrot.slane %v3401_v14, 4 }
 0x12b   : > { %v2205_v34 = vshrl.u32 %v2016_v61, 16  ;;  %v2208_v21 = vshll.u32 %v2016_v61, 16  ;;  %v2200_v17 = vrot.slane %v2198_v40, 3  ;;  %v2203_v30 = vrot.slane %v2201_v55, 4  ;;  %v7330_v61 = vld [vmem:[#allocation2 + $0x50] sm:$0x8] }
 0x12c   : > { %v7328_v51 = vrot.slane %v3404_v53, 5  ;;  %v7333_v55 = vsel %vm1116_vm7, %v2189_v3, %v2196_v22  ;;  %v7336_v16 = vcombine.low %v3177_v32, %v3178_v62  ;;  %v9102_v14 = vrot.slane %v7112_v6, 5  ;;  %v7353_v62 = vld [vmem:[#allocation2 + $0x54] sm:$0xf] }
 0x12d   : > { %3494 = vrot.lane.b32.xlu1 %v3391_v63, %s5852_s6  ;;  %v2207_v59 = vrot.slane %v2205_v34, 3  ;;  %v2210_v23 = vrot.slane %v2208_v21, 4  ;;  %v2204_v40 = vor.u32 %v2203_v30, %v2200_v17  ;;  %5417 = vmatprep.mubr.msk.bf16.mxu1 %vm2311_vm8, %v7333_v55  ;;  %v7343_v53 = vrot.slane %v3409_v4, 4  ;;  %v907_v32 = vpop.permute.xlu0 %906 }
 0x12e   : > { %3628 = vrot.lane.b32.xlu0 %v9102_v14, %s5851_s5  ;;  %v7345_v34 = vrot.slane %v3412_v58, 5  ;;  %v3587_v21 = vrot.slane %v5646_v12, 5  ;;  %v9103_v3 = vcombine.low %v7134_v27, %v7156_v45  ;;  %v7357_v17 = vrot.slane %v3417_v35, 4  ;;  %v3180_v58 = vld [vmem:[#allocation2 + $0xb4] sm:$0xf]  ;;  %5151 = vmatmul.mubr.msk.bf16.gmra.mxu0 %vm2311_vm8, %v7281_v50 }
 0x12f   : > { %v2211_v63 = vor.u32 %v2210_v23, %v2207_v59  ;;  %v7359_v4 = vrot.slane %v3420_v11, 5  ;;  %v3181_v12 = vld [vmem:[#allocation2 + $0xb8] sm:$0xf]  ;;  %v9104_v27 = vcombine.low %v9047_v49, %v9047_v49  ;;  %v909_v59 = vpop.permute.xlu1 %908  ;;  %v7376_v35 = vsel %vm857_vm2, %v3583_v43, %v3584_v19  ;;  %v5652_v11 = vld [vmem:[#allocation2 + $0x9c] ss:$0 sps:$4 sm:$0x11]   ;;  %2505 = vmatprep.mubr.bf16.mxu0 %v9024_v7 }
 0x130   : > { %v973_v22 = vsel %vm970_vm5, %v9103_v3, %v778_v60  ;;  %v3407_v50 = vor.u32 %v7328_v51, %v7326_v1  ;;  %v3428_v47 = vshll.u32 %v7336_v16, 16  ;;  %v3415_v19 = vor.u32 %v7345_v34, %v7343_v53  ;;  %v7399_v1 = vld [vmem:[#allocation2 + $0x60] sm:$0x8] }
 0x131   : > { %3630 = vrot.lane.b32.xlu1 %v7199_v26, %s5851_s5  ;;  %v975_v45 = vsel %vm970_vm5, %v9104_v27, %v778_v60  ;;  %v1053_v30 = vsel %vm1051_vm6, %v973_v22, %v907_v32  ;;  %v7369_v26 = vsel %vm1116_vm7, %v2204_v40, %v2211_v63  ;;  %v3425_v60 = vshrl.u32 %v7336_v16, 16 }
 0x132   : > { %v1055_v49 = vsel %vm1051_vm6, %v975_v45, %v909_v59  ;;  %5418 = vmatmul.mubr.msk.bf16.gmra.mxu1 %vm2311_vm8, %v7369_v26  ;;  %3496 = vrot.lane.b32.xlu0 %v3399_v41, %s5852_s6  ;;  %v7397_v23 = vsel %vm857_vm2, %v3586_v33, %v3587_v21  ;;  %v7401_v51 = vcombine.low %v3180_v58, %v3181_v12  ;;  %v1117_v40 = vshrl.u32 %v1053_v30, 16  ;;  %v3183_v45 = vld [vmem:[#allocation2 + $0xc4] sm:$0xf] }
 0x133   : > { %5421 = vmatprep.mubr.msk.bf16.mxu1 %vm2311_vm8, %v6749_v2  ;;  %v1120_v63 = vshll.u32 %v1053_v30, 16  ;;  %v911_v2 = vpop.permute.xlu0 %910  ;;  %v9105_v14 = vrot.slane %v7173_v9, 5  ;;  %v8956_v41 = vrot.slane %v7302_v20, 5  ;;  %v9106_v21 = vcombine.low %v7136_v42, %v7160_v28  ;;  %v913_v58 = vpop.permute.xlu1 %912  ;;  %v7416_v9 = vld [vmem:[#allocation2 + $0x64] sm:$0xf] }
 0x134   : > { %v1124_v22 = vshrl.u32 %v1055_v49, 16  ;;  %v1127_v32 = vshll.u32 %v1055_v49, 16  ;;  %v3590_v12 = vrot.slane %v5652_v11, 5  ;;  %v7420_v30 = vrot.slane %v3425_v60, 4  ;;  %v7435_v49 = vld [vmem:[#allocation2 + $0x68] sm:$0xf] }
 0x135   : > { %3632 = vrot.lane.b32.xlu1 %v9105_v14, %s5851_s5  ;;  %v978_v3 = vsel %vm970_vm5, %v9106_v21, %v780_v25  ;;  %v7422_v59 = vrot.slane %v3428_v47, 5  ;;  %v7427_v42 = vld [vmem:[%s8895_s1 + $0x18] ss:$12 sps:$4 sm:$0x3e]   ;;  %v9107_v28 = vcombine.low %v9048_v46, %v9048_v46  ;;  %v7439_v47 = vld [vmem:[#allocation2 + $0x74] sm:$0xf] }
 0x136   : > { %v1057_v27 = vsel %vm1051_vm6, %v978_v3, %v911_v2  ;;  %3634 = vrot.lane.b32.xlu0 %v7261_v44, %s5851_s5  ;;  %v7443_v14 = vld [vmem:[#allocation2 + $0xac] ss:$0 sps:$4 sm:$0x11]   ;;  %v3433_v21 = vshrl.u32 %v7401_v51, 16  ;;  %v1119_v46 = vrot.slane %v1117_v40, 3  ;;  %v1122_v3 = vrot.slane %v1120_v63, 4  ;;  %5152 = vmatmul.mubr.msk.bf16.gmra.mxu0 %vm2311_vm8, %v7333_v55 }
 0x137   : > { %v980_v11 = vsel %vm970_vm5, %v9107_v28, %v780_v25  ;;  %v782_v28 = vpop.permute.xlu0 %781  ;;  %v7448_v44 = vld [vmem:[#allocation2 + $0x78] sm:$0xf]  ;;  %v1126_v6 = vrot.slane %v1124_v22, 3  ;;  %v1129_v0 = vrot.slane %v1127_v32, 4  ;;  %v1132_v2 = vshrl.u32 %v1057_v27, 16  ;;  %v784_v36 = vpop.permute.xlu1 %783  ;;  %2515 = vmatprep.mubr.bf16.mxu0 %v9024_v7  ;;  %v9108_v60 = vld [vmem:[#allocation34_spill] sm:$0xff] }
 0x138   : > { %v1059_v25 = vsel %vm1051_vm6, %v980_v11, %v913_v58  ;;  %v7457_v40 = vsel %vm857_vm2, %v8956_v41, %v3590_v12  ;;  %v3184_v63 = vld [vmem:[#allocation2 + $0xc8] sm:$0xf]  ;;  %v7472_v12 = vrot.slane %v3433_v21, 4  ;;  %v9109_v22 = vcombine.low %v7149_v10, %v7185_v15 }
 0x139   : > { %3498 = vrot.lane.b32.xlu1 %v3407_v50, %s5852_s6  ;;  %v1135_v50 = vshll.u32 %v1057_v27, 16  ;;  %v1139_v55 = vshrl.u32 %v1059_v25, 16  ;;  %v1142_v11 = vshll.u32 %v1059_v25, 16  ;;  %v1123_v27 = vor.u32 %v1122_v3, %v1119_v46 }
 0x13a   : > { %5422 = vmatmul.mubr.msk.bf16.gmra.mxu1 %vm2311_vm8, %v6815_v56  ;;  %3636 = vrot.lane.b32.xlu0 %v3583_v43, %s5851_s5  ;;  %v983_v41 = vsel %vm970_vm5, %v9109_v22, %v782_v28  ;;  %v7481_v25 = vcombine.low %v3183_v45, %v3184_v63  ;;  %v1130_v52 = vor.u32 %v1129_v0, %v1126_v6  ;;  %v7483_v43 = vrot.slane %v1132_v2, 3 }
 0x13b   : > { %5425 = vmatprep.mubr.msk.bf16.mxu1 %vm2311_vm8, %v9108_v60  ;;  %v915_v58 = vpop.permute.xlu0 %914  ;;  %v3436_v60 = vshll.u32 %v7401_v51, 16  ;;  %v9110_v21 = vcombine.low %v9069_v37, %v9069_v37  ;;  %v917_v15 = vpop.permute.xlu1 %916  ;;  %v7490_v3 = vrot.slane %v1135_v50, 4  ;;  %v1141_v32 = vrot.slane %v1139_v55, 3 }
 0x13c   : > { %v1061_v10 = vsel %vm1051_vm6, %v983_v41, %v915_v58  ;;  %v1144_v45 = vrot.slane %v1142_v11, 4  ;;  %v9111_v37 = vcombine.low %v7175_v29, %v7208_v24  ;;  %v9112_v41 = vcombine.low %v7084_v31, %v7084_v31 }
 0x13d   : > { %3638 = vrot.lane.b32.xlu1 %v7376_v35, %s5851_s5  ;;  %v985_v46 = vsel %vm970_vm5, %v9110_v21, %v782_v28  ;;  %v1147_v22 = vshrl.u32 %v1061_v10, 16  ;;  %v1150_v56 = vshll.u32 %v1061_v10, 16  ;;  %v1131_v29 = vsel %vm1116_vm7, %v1123_v27, %v1130_v52  ;;  %v7523_v27 = vld [vmem:[#allocation2 + $0xbc] ss:$0 sps:$4 sm:$0x11]  }
 0x13e   : > { %v1063_v35 = vsel %vm1051_vm6, %v985_v46, %v917_v15  ;;  %3500 = vrot.lane.b32.xlu0 %v3415_v19, %s5852_s6  ;;  %v988_v6 = vsel %vm970_vm5, %v9111_v37, %v784_v36  ;;  %v990_v2 = vsel %vm970_vm5, %v9112_v41, %v784_v36  ;;  %5153 = vmatmul.mubr.msk.bf16.gmra.mxu0 %vm2311_vm8, %v7369_v26  ;;  %v7521_v26 = vrot.slane %v3436_v60, 5 }
 0x13f   : > { %v1154_v63 = vshrl.u32 %v1063_v35, 16  ;;  %v1157_v0 = vshll.u32 %v1063_v35, 16  ;;  %v1149_v28 = vrot.slane %v1147_v22, 3  ;;  %v1152_v50 = vrot.slane %v1150_v56, 4  ;;  %v919_v58 = vpop.permute.xlu0 %918  ;;  %v921_v19 = vpop.permute.xlu1 %920  ;;  %5431 = vmatprep.mubr.msk.bf16.mxu0 %vm2311_vm8, %v1131_v29  ;;  %v3186_v35 = vld [vmem:[#allocation2 + $0xd4] sm:$0xf] }
 0x140   : > { %v1065_v34 = vsel %vm1051_vm6, %v988_v6, %v919_v58  ;;  %v1067_v11 = vsel %vm1051_vm6, %v990_v2, %v921_v19  ;;  %v1138_v52 = vor.u32 %v7490_v3, %v7483_v43  ;;  %v9113_v22 = vor.u32 %v7359_v4, %v7357_v17  ;;  %v7552_v58 = vld [vmem:[#allocation2 + $0xcc] ss:$0 sps:$4 sm:$0x11]  }
 0x141   : > { %3640 = vrot.lane.b32.xlu1 %v3586_v33, %s5851_s5  ;;  %v1156_v55 = vrot.slane %v1154_v63, 3  ;;  %v1159_v53 = vrot.slane %v1157_v0, 4  ;;  %v1153_v31 = vor.u32 %v1152_v50, %v1149_v28  ;;  %v1162_v24 = vshrl.u32 %v1065_v34, 16  ;;  %v3187_v63 = vld [vmem:[#allocation2 + $0xd8] sm:$0xf] }
 0x142   : > { %v1165_v36 = vshll.u32 %v1065_v34, 16  ;;  %5426 = vmatmul.mubr.msk.bf16.gmra.mxu1 %vm2311_vm8, %v6991_v48  ;;  %v1169_v56 = vshrl.u32 %v1067_v11, 16  ;;  %v1172_v21 = vshll.u32 %v1067_v11, 16  ;;  %3642 = vrot.lane.b32.xlu0 %v7397_v23, %s5851_s5  ;;  %v1145_v48 = vor.u32 %v1144_v45, %v1141_v32  ;;  %v7538_v45 = vld [vmem:[#allocation2 + $0x84] sm:$0xf] }
 0x143   : > { %v1160_v33 = vor.u32 %v1159_v53, %v1156_v55  ;;  %2829 = vmatprep.mubr.bf16.mxu1 %v9024_v7  ;;  %v1164_v46 = vrot.slane %v1162_v24, 3  ;;  %v786_v15 = vpop.permute.xlu0 %785  ;;  %v788_v60 = vpop.permute.xlu1 %787  ;;  %v9114_v37 = vrot.slane %v7427_v42, 1  ;;  %v3441_v43 = vshrl.u32 %v7481_v25, 16 }
 0x144   : > { %v1167_v10 = vrot.slane %v1165_v36, 4  ;;  %v1171_v0 = vrot.slane %v1169_v56, 3  ;;  %v1174_v23 = vrot.slane %v1172_v21, 4  ;;  %v5027_v17 = vcombine.low %v7516_v8, %v7538_v45 }
 0x145   : > { %3502 = vrot.lane.b32.xlu1 %v9113_v22, %s5852_s6  ;;  %v4133_v6 = vand.u32 %v9114_v37, %v9017_v5  ;;  %v7536_v3 = vsel %vm1116_vm7, %v1153_v31, %v1160_v33  ;;  %v3444_v4 = vshll.u32 %v7481_v25, 16  ;;  %v9115_v2 = vrot.slane %v7302_v20, 5 }
 0x146   : > { %v1168_v32 = vor.u32 %v1167_v10, %v1164_v46  ;;  %v1175_v41 = vor.u32 %v1174_v23, %v1171_v0  ;;  %v9116_v5 = vrot.slane %v7443_v14, 5  ;;  %v9117_v42 = vrot.slane %v7336_v16, 5  ;;  %v3189_v46 = vld [vmem:[#allocation2 + $0xe4] sm:$0xf] }
 0x147   : > { %3644 = vrot.lane.b32.xlu0 %v9115_v2, %s5851_s5  ;;  %v3595_v50 = vrot.slane %v7401_v51, 5  ;;  %v7554_v55 = vcombine.low %v3186_v35, %v3187_v63  ;;  %v9118_v53 = vcombine.low %v7300_v57, %v7316_v18  ;;  %v923_v19 = vpop.permute.xlu0 %922  ;;  %v7561_v20 = vsel %vm1116_vm7, %v1138_v52, %v1145_v48  ;;  %v925_v18 = vpop.permute.xlu1 %924 }
 0x148   : > { %v3594_v28 = vsel %vm857_vm2, %v9117_v42, %v9116_v5  ;;  %v3439_v14 = vor.u32 %v7521_v26, %v7472_v12  ;;  %v3596_v31 = vrot.slane %v7523_v27, 5  ;;  %v9119_v24 = vcombine.low %v7246_v13, %v7246_v13  ;;  %5432 = vmatmul.mubr.msk.bf16.vlgmr.msra.gmra.mxu0 %vm2311_vm8, %v7561_v20 }
 0x149   : > { %v993_v34 = vsel %vm970_vm5, %v9118_v53, %v786_v15  ;;  %3646 = vrot.lane.b32.xlu1 %v7457_v40, %s5851_s5  ;;  %v7576_v11 = vsel %vm1116_vm7, %v1168_v32, %v1175_v41  ;;  %v7578_v40 = vrot.slane %v3441_v43, 4  ;;  %5435 = vmatprep.mubr.msk.bf16.mxu0 %vm2311_vm8, %v7536_v3  ;;  %v7584_v13 = vrot.slane %v3444_v4, 5 }
 0x14a   : > { %v995_v36 = vsel %vm970_vm5, %v9119_v24, %v786_v15  ;;  %v1069_v57 = vsel %vm1051_vm6, %v993_v34, %v923_v19  ;;  %5177 = vmatmul.mubr.msk.bf16.vlgmr.msra.gmra.mxu1 %vm2311_vm8, %v1131_v29  ;;  %v9120_v27 = vor.u32 %v7422_v59, %v7420_v30  ;;  %v3599_v52 = vrot.slane %v7552_v58, 5  ;;  %4156 = vmatpush1.bf16.msra.mxu0 %v4133_v6  ;;  %v3190_v30 = vld [vmem:[#allocation2 + $0xe8] sm:$0xf]  ;;  %v7607_v6 = vld [vmem:[#allocation2 + $0x90] sm:$0x8] }
 0x14b   : > { %v1177_v33 = vshrl.u32 %v1069_v57, 16  ;;  %v1180_v12 = vshll.u32 %v1069_v57, 16  ;;  %v1071_v56 = vsel %vm1051_vm6, %v995_v36, %v925_v18  ;;  %2839 = vmatprep.mubr.bf16.mxu1 %v9024_v7  ;;  %v3449_v48 = vshrl.u32 %v7554_v55, 16  ;;  %v927_v35 = vpop.permute.xlu0 %926  ;;  %5464 = vmatpush3.bf16.msra.mxu1 %v7057_v39  ;;  %v7615_v34 = vld [vmem:[#allocation2 + $0x88] sm:$0xf] }
 0x14c   : > { %v1184_v21 = vshrl.u32 %v1071_v56, 16  ;;  %v1187_v26 = vshll.u32 %v1071_v56, 16  ;;  %3504 = vrot.lane.b32.xlu0 %v9120_v27, %s5852_s6  ;;  %v9121_v29 = vcombine.low %v7330_v61, %v7353_v62  ;;  %v3452_v63 = vshll.u32 %v7554_v55, 16  ;;  %v929_v62 = vpop.permute.xlu1 %928  ;;  %v7619_v24 = vld [vmem:[#allocation2 + $0x94] sm:$0xf] }
 0x14d   : > { %v1179_v15 = vrot.slane %v1177_v33, 3  ;;  %v1182_v22 = vrot.slane %v1180_v12, 4  ;;  %v9122_v59 = vcombine.low %v7250_v38, %v7250_v38  ;;  %v9123_v43 = vmov %v9117_v42  ;;  %v3192_v57 = vld [vmem:[#allocation2 + $0xf4] sm:$0xf] }
 0x14e   : > { %v998_v10 = vsel %vm970_vm5, %v9121_v29, %v788_v60  ;;  %v1186_v23 = vrot.slane %v1184_v21, 3  ;;  %v1189_v37 = vrot.slane %v1187_v26, 4  ;;  %3648 = vrot.lane.b32.xlu1 %v9123_v43, %s5851_s5  ;;  %v7613_v42 = vcombine.low %v3189_v46, %v3190_v30  ;;  %v3193_v21 = vld [vmem:[#allocation2 + $0xf8] sm:$0xf] }
 0x14f   : > { %v1000_v0 = vsel %vm970_vm5, %v9122_v59, %v788_v60  ;;  %v1073_v61 = vsel %vm1051_vm6, %v998_v10, %v927_v35  ;;  %v1183_v39 = vor.u32 %v1182_v22, %v1179_v15  ;;  %v7611_v60 = vld [vmem:[#allocation2 + $0xdc] ss:$0 sps:$4 sm:$0x11]   ;;  %v790_v16 = vpop.permute.xlu0 %789  ;;  %v5028_v19 = vcombine.low %v7615_v34, %v7615_v34 }
 0x150   : > { %v1192_v32 = vshrl.u32 %v1073_v61, 16  ;;  %v1195_v4 = vshll.u32 %v1073_v61, 16  ;;  %v1075_v41 = vsel %vm1051_vm6, %v1000_v0, %v929_v62  ;;  %v1190_v2 = vor.u32 %v1189_v37, %v1186_v23  ;;  %3650 = vrot.lane.b32.xlu0 %v3594_v28, %s5851_s5  ;;  %v792_v33 = vpop.permute.xlu1 %791  ;;  %5436 = vmatmul.mubr.msk.bf16.gmra.mxu0 %vm2311_vm8, %v7576_v11 }
 0x151   : > { %v1199_v38 = vshrl.u32 %v1075_v41, 16  ;;  %v1202_v5 = vshll.u32 %v1075_v41, 16  ;;  %v5029_v36 = vcombine.low %v7607_v6, %v7619_v24  ;;  %v3597_v12 = vsel %vm857_vm2, %v3595_v50, %v3596_v31 }
 0x152   : > { %v1194_v58 = vrot.slane %v1192_v32, 3  ;;  %v1197_v53 = vrot.slane %v1195_v4, 4  ;;  %3506 = vrot.lane.b32.xlu1 %v3439_v14, %s5852_s6  ;;  %v3598_v56 = vrot.slane %v7481_v25, 5  ;;  %5178 = vmatmul.mubr.msk.bf16.gmra.mxu1 %vm2311_vm8, %v7561_v20  ;;  %v7633_v27 = vsel %vm1116_vm7, %v1183_v39, %v1190_v2 }
 0x153   : > { %v1201_v18 = vrot.slane %v1199_v38, 3  ;;  %v1204_v28 = vrot.slane %v1202_v5, 4  ;;  %v7635_v46 = vrot.slane %v3449_v48, 4  ;;  %v7637_v29 = vrot.slane %v3452_v63, 5  ;;  %5439 = vmatprep.mubr.msk.bf16.mxu0 %vm2311_vm8, %v7633_v27  ;;  %2849 = vmatprep.mubr.bf16.mxu1 %v9024_v7  ;;  %v931_v15 = vpop.permute.xlu0 %930 }
 0x154   : > { %v1198_v26 = vor.u32 %v1197_v53, %v1194_v58  ;;  %v3447_v25 = vor.u32 %v7584_v13, %v7578_v40  ;;  %v3600_v14 = vsel %vm857_vm2, %v3598_v56, %v3599_v52  ;;  %v3457_v20 = vshrl.u32 %v7613_v42, 16  ;;  %3652 = vrot.lane.b32.xlu0 %v3595_v50, %s5851_s5  ;;  %v3195_v40 = vld [vmem:[#allocation2 + $0x104] sm:$0xf]  ;;  %v3196_v13 = vld [vmem:[#allocation2 + $0x108] sm:$0xf]  ;;  %v933_v30 = vpop.permute.xlu1 %932 }
 0x155   : > { %v1205_v10 = vor.u32 %v1204_v28, %v1201_v18  ;;  %v9124_v31 = vcombine.low %v7399_v1, %v7416_v9  ;;  %v3601_v22 = vrot.slane %v7554_v55, 5  ;;  %v3602_v35 = vrot.slane %v7611_v60, 5  ;;  %v5678_v38 = vld [vmem:[#allocation2 + $0xec] ss:$0 sps:$4 sm:$0x11]  }
 0x156   : > { %v7655_v63 = vcombine.low %v3192_v57, %v3193_v21  ;;  %v9125_v52 = vcombine.low %v7435_v49, %v7435_v49  ;;  %3654 = vrot.lane.b32.xlu1 %v3597_v12, %s5851_s5  ;;  %v3460_v51 = vshll.u32 %v7613_v42, 16  ;;  %v3455_v37 = vor.u32 %v7637_v29, %v7635_v46  ;;  %v7695_v29 = vld [vmem:[#allocation2 + $0xfc] ss:$0 sps:$4 sm:$0x11]  }
 0x157   : > { %v1003_v48 = vsel %vm970_vm5, %v9124_v31, %v790_v16  ;;  %v7663_v59 = vsel %vm1116_vm7, %v1198_v26, %v1205_v10  ;;  %v7670_v62 = vrot.slane %v3457_v20, 4  ;;  %v7672_v43 = vcombine.low %v3195_v40, %v3196_v13  ;;  %v935_v2 = vpop.permute.xlu0 %934 }
 0x158   : > { %v1005_v1 = vsel %vm970_vm5, %v9125_v52, %v790_v16  ;;  %v1077_v9 = vsel %vm1051_vm6, %v1003_v48, %v931_v15  ;;  %v9126_v39 = vcombine.low %v7408_v54, %v7439_v47  ;;  %3508 = vrot.lane.b32.xlu0 %v3447_v25, %s5852_s6  ;;  %v3465_v5 = vshrl.u32 %v7655_v63, 16  ;;  %v937_v54 = vpop.permute.xlu1 %936  ;;  %5440 = vmatmul.mubr.msk.bf16.gmra.mxu0 %vm2311_vm8, %v7663_v59  ;;  %v5743_v15 = vld [vmem:[#allocation2 + $0x98] sm:$0xf]  ;;  %v7698_v52 = vld [vmem:[#allocation2 + $0xa4] sm:$0xf] }
 0x159   : > { %v1207_v50 = vshrl.u32 %v1077_v9, 16  ;;  %v1210_v0 = vshll.u32 %v1077_v9, 16  ;;  %v1079_v23 = vsel %vm1051_vm6, %v1005_v1, %v933_v30  ;;  %v9127_v60 = vcombine.low %v7448_v44, %v7448_v44  ;;  %v7691_v44 = vld [vmem:[#allocation2 + $0xa0] sm:$0x8] }
 0x15a   : > { %v1214_v49 = vshrl.u32 %v1079_v23, 16  ;;  %v1217_v61 = vshll.u32 %v1079_v23, 16  ;;  %v1008_v32 = vsel %vm970_vm5, %v9126_v39, %v792_v33  ;;  %3656 = vrot.lane.b32.xlu1 %v3598_v56, %s5851_s5  ;;  %5179 = vmatmul.mubr.msk.bf16.gmra.mxu1 %vm2311_vm8, %v7536_v3  ;;  %v3468_v46 = vshll.u32 %v7655_v63, 16 }
 0x15b   : > { %v1209_v4 = vrot.slane %v1207_v50, 3  ;;  %v1212_v41 = vrot.slane %v1210_v0, 4  ;;  %v1010_v58 = vsel %vm970_vm5, %v9127_v60, %v792_v33  ;;  %v1081_v57 = vsel %vm1051_vm6, %v1008_v32, %v935_v2  ;;  %2859 = vmatprep.mubr.bf16.mxu1 %v9024_v7  ;;  %v794_v25 = vpop.permute.xlu0 %793 }
 0x15c   : > { %v1216_v53 = vrot.slane %v1214_v49, 3  ;;  %v1219_v16 = vrot.slane %v1217_v61, 4  ;;  %v1222_v18 = vshrl.u32 %v1081_v57, 16  ;;  %v1225_v28 = vshll.u32 %v1081_v57, 16  ;;  %3658 = vrot.lane.b32.xlu0 %v3600_v14, %s5851_s5  ;;  %v796_v13 = vpop.permute.xlu1 %795 }
 0x15d   : > { %v1213_v47 = vor.u32 %v1212_v41, %v1209_v4  ;;  %v1083_v12 = vsel %vm1051_vm6, %v1010_v58, %v937_v54  ;;  %v3462_v20 = vrot.slane %v3460_v51, 5  ;;  %v3605_v31 = vrot.slane %v5678_v38, 5 }
 0x15e   : > { %v1220_v33 = vor.u32 %v1219_v16, %v1216_v53  ;;  %v1229_v21 = vshrl.u32 %v1083_v12, 16  ;;  %v1232_v26 = vshll.u32 %v1083_v12, 16  ;;  %v1224_v56 = vrot.slane %v1222_v18, 3  ;;  %3510 = vrot.lane.b32.xlu1 %v3455_v37, %s5852_s6 }
 0x15f   : > { %v1227_v10 = vrot.slane %v1225_v28, 4  ;;  %v5030_v40 = vcombine.low %v5743_v15, %v5743_v15  ;;  %v5031_v1 = vcombine.low %v7691_v44, %v7698_v52  ;;  %v3603_v14 = vsel %vm857_vm2, %v3601_v22, %v3602_v35  ;;  %v939_v61 = vpop.permute.xlu0 %938 }
 0x160   : > { %v1231_v48 = vrot.slane %v1229_v21, 3  ;;  %v1234_v3 = vrot.slane %v1232_v26, 4  ;;  %v7704_v30 = vsel %vm1116_vm7, %v1213_v47, %v1220_v33  ;;  %v3604_v51 = vrot.slane %v7613_v42, 5  ;;  %3660 = vrot.lane.b32.xlu0 %v3601_v22, %s5851_s5  ;;  %v941_v45 = vpop.permute.xlu1 %940  ;;  %v3198_v22 = vld [vmem:[#allocation2 + $0x114] sm:$0xf] }
 0x161   : > { %v1228_v9 = vor.u32 %v1227_v10, %v1224_v56  ;;  %5443 = vmatprep.mubr.msk.bf16.mxu0 %vm2311_vm8, %v7704_v30  ;;  %v3467_v0 = vrot.slane %v3465_v5, 4  ;;  %v3470_v23 = vrot.slane %v3468_v46, 5  ;;  %v3473_v49 = vshrl.u32 %v7672_v43, 16  ;;  %v5686_v56 = vld [vmem:[#allocation2 + $0x10c] ss:$0 sps:$4 sm:$0x11]  }
 0x162   : > { %v1235_v50 = vor.u32 %v1234_v3, %v1231_v48  ;;  %v1013_v37 = vsel %vm970_vm5, %v5027_v17, %v794_v25  ;;  %v3463_v42 = vor.u32 %v3462_v20, %v7670_v62  ;;  %v3606_v35 = vsel %vm857_vm2, %v3604_v51, %v3605_v31  ;;  %3662 = vrot.lane.b32.xlu1 %v3603_v14, %s5851_s5  ;;  %v3199_v62 = vld [vmem:[#allocation2 + $0x118] sm:$0xf]  ;;  %v474_v31 = vld [vmem:[#allocation2 + $0xb0] sm:$0x8] }
 0x163   : > { %v3608_v39 = vrot.slane %v7695_v29, 5  ;;  %v1015_v32 = vsel %vm970_vm5, %v5028_v19, %v794_v25  ;;  %v1085_v8 = vsel %vm1051_vm6, %v1013_v37, %v939_v61  ;;  %v3607_v55 = vrot.slane %v7655_v63, 5  ;;  %5180 = vmatmul.mubr.msk.bf16.gmra.mxu1 %vm2311_vm8, %v7576_v11  ;;  %v943_v11 = vpop.permute.xlu0 %942  ;;  %v5746_v37 = vld [vmem:[#allocation2 + $0xb4] sm:$0xf] }
 0x164   : > { %v7729_v17 = vsel %vm1116_vm7, %v1228_v9, %v1235_v50  ;;  %v1237_v4 = vshrl.u32 %v1085_v8, 16  ;;  %v1240_v41 = vshll.u32 %v1085_v8, 16  ;;  %v1087_v2 = vsel %vm1051_vm6, %v1015_v32, %v941_v45  ;;  %2869 = vmatprep.mubr.bf16.mxu1 %v9024_v7  ;;  %3512 = vrot.lane.b32.xlu0 %v3463_v42, %s5852_s6  ;;  %v945_v12 = vpop.permute.xlu1 %944  ;;  %v5747_v42 = vld [vmem:[#allocation2 + $0xb8] sm:$0xf] }
 0x165   : > { %5444 = vmatmul.mubr.msk.bf16.gmra.mxu0 %vm2311_vm8, %v7729_v17  ;;  %v3476_v34 = vshll.u32 %v7672_v43, 16  ;;  %v1244_v19 = vshrl.u32 %v1087_v2, 16  ;;  %v1247_v38 = vshll.u32 %v1087_v2, 16  ;;  %v3471_v5 = vor.u32 %v3470_v23, %v3467_v0  ;;  %v7765_v23 = vld [vmem:[#allocation2 + $0x11c] ss:$0 sps:$4 sm:$0x11]  }
 0x166   : > { %v7740_v60 = vrot.slane %v3473_v49, 4  ;;  %v1018_v58 = vsel %vm970_vm5, %v5029_v36, %v796_v13  ;;  %v1239_v53 = vrot.slane %v1237_v4, 3  ;;  %v1242_v16 = vrot.slane %v1240_v41, 4  ;;  %3664 = vrot.lane.b32.xlu1 %v3604_v51, %s5851_s5 }
 0x167   : > { %v7747_v57 = vcombine.low %v3198_v22, %v3199_v62  ;;  %v1020_v54 = vsel %vm970_vm5, %v5030_v40, %v796_v13  ;;  %v1246_v47 = vrot.slane %v1244_v19, 3  ;;  %v1249_v18 = vrot.slane %v1247_v38, 4  ;;  %v798_v20 = vpop.permute.xlu0 %797  ;;  %v5745_v13 = vld [vmem:[#allocation2 + $0xa8] sm:$0xf] }
 0x168   : > { %v1089_v28 = vsel %vm1051_vm6, %v1018_v58, %v943_v11  ;;  %v1243_v33 = vor.u32 %v1242_v16, %v1239_v53  ;;  %v1091_v36 = vsel %vm1051_vm6, %v1020_v54, %v945_v12  ;;  %v3478_v29 = vrot.slane %v3476_v34, 5  ;;  %3666 = vrot.lane.b32.xlu0 %v3606_v35, %s5851_s5  ;;  %v800_v14 = vpop.permute.xlu1 %799  ;;  %v477_v12 = vld [vmem:[#allocation2 + $0xc0] sm:$0x8] }
 0x169   : > { %v1252_v6 = vshrl.u32 %v1089_v28, 16  ;;  %v1255_v24 = vshll.u32 %v1089_v28, 16  ;;  %v1250_v21 = vor.u32 %v1249_v18, %v1246_v47  ;;  %v1259_v26 = vshrl.u32 %v1091_v36, 16 }
 0x16a   : > { %v1262_v46 = vshll.u32 %v1091_v36, 16  ;;  %v3481_v48 = vshrl.u32 %v7747_v57, 16  ;;  %v3484_v3 = vshll.u32 %v7747_v57, 16  ;;  %v5032_v9 = vcombine.low %v5745_v13, %v5745_v13  ;;  %3514 = vrot.lane.b32.xlu1 %v3471_v5, %s5852_s6 }
 0x16b   : > { %v1254_v10 = vrot.slane %v1252_v6, 3  ;;  %v1257_v25 = vrot.slane %v1255_v24, 4  ;;  %v1261_v15 = vrot.slane %v1259_v26, 3  ;;  %5181 = vmatmul.mubr.msk.bf16.gmra.mxu1 %vm2311_vm8, %v7633_v27  ;;  %v7760_v50 = vsel %vm1116_vm7, %v1243_v33, %v1250_v21  ;;  %v947_v8 = vpop.permute.xlu0 %946 }
 0x16c   : > { %v1264_v40 = vrot.slane %v1262_v46, 4  ;;  %v3609_v0 = vsel %vm857_vm2, %v3607_v55, %v3608_v39  ;;  %v5033_v61 = vcombine.low %v474_v31, %v5746_v37  ;;  %v5034_v35 = vcombine.low %v5747_v42, %v5747_v42  ;;  %5447 = vmatprep.mubr.msk.bf16.mxu0 %vm2311_vm8, %v7760_v50  ;;  %2879 = vmatprep.mubr.bf16.mxu1 %v9024_v7  ;;  %v949_v41 = vpop.permute.xlu1 %948 }
 0x16d   : > { %v1258_v51 = vor.u32 %v1257_v25, %v1254_v10  ;;  %v3611_v27 = vrot.slane %v5686_v56, 5  ;;  %v1023_v32 = vsel %vm970_vm5, %v5031_v1, %v798_v20  ;;  %3668 = vrot.lane.b32.xlu0 %v3607_v55, %s5851_s5  ;;  %v3479_v39 = vor.u32 %v3478_v29, %v7740_v60  ;;  %v5748_v56 = vld [vmem:[#allocation2 + $0xc4] sm:$0xf] }
 0x16e   : > { %v1265_v49 = vor.u32 %v1264_v40, %v1261_v15  ;;  %v3483_v45 = vrot.slane %v3481_v48, 4  ;;  %v3486_v22 = vrot.slane %v3484_v3, 5  ;;  %v1025_v62 = vsel %vm970_vm5, %v5032_v9, %v798_v20  ;;  %3670 = vrot.lane.b32.xlu1 %v3609_v0, %s5851_s5  ;;  %v5749_v48 = vld [vmem:[#allocation2 + $0xc8] sm:$0xf]  ;;  %v480_v15 = vld [vmem:[#allocation2 + $0xd0] sm:$0x8] }
 0x16f   : > { %v1093_v4 = vsel %vm1051_vm6, %v1023_v32, %v947_v8  ;;  %v3610_v44 = vrot.slane %v7672_v43, 5  ;;  %v1095_v63 = vsel %vm1051_vm6, %v1025_v62, %v949_v41  ;;  %v3614_v55 = vrot.slane %v7765_v23, 5  ;;  %v951_v43 = vpop.permute.xlu0 %950  ;;  %v5750_v0 = vld [vmem:[#allocation2 + $0xd4] sm:$0xf] }
 0x170   : > { %v7781_v2 = vsel %vm1116_vm7, %v1258_v51, %v1265_v49  ;;  %v1267_v52 = vshrl.u32 %v1093_v4, 16  ;;  %v1270_v1 = vshll.u32 %v1093_v4, 16  ;;  %v1274_v34 = vshrl.u32 %v1095_v63, 16  ;;  %v953_v28 = vpop.permute.xlu1 %952 }
 0x171   : > { %5448 = vmatmul.mubr.msk.bf16.gmra.mxu0 %vm2311_vm8, %v7781_v2  ;;  %v1277_v19 = vshll.u32 %v1095_v63, 16  ;;  %v3612_v38 = vsel %vm857_vm2, %v3610_v44, %v3611_v27  ;;  %v3613_v5 = vrot.slane %v7747_v57, 5  ;;  %v1028_v60 = vsel %vm970_vm5, %v5033_v61, %v800_v14  ;;  %3516 = vrot.lane.b32.xlu0 %v3479_v39, %s5852_s6  ;;  %v5751_v61 = vld [vmem:[#allocation2 + $0xd8] sm:$0xf] }
 0x172   : > { %v1269_v58 = vrot.slane %v1267_v52, 3  ;;  %v1272_v53 = vrot.slane %v1270_v1, 4  ;;  %v3487_v16 = vor.u32 %v3486_v22, %v3483_v45  ;;  %v1030_v11 = vsel %vm970_vm5, %v5034_v35, %v800_v14  ;;  %3672 = vrot.lane.b32.xlu1 %v3610_v44, %s5851_s5 }
 0x173   : > { %v1276_v54 = vrot.slane %v1274_v34, 3  ;;  %v1279_v47 = vrot.slane %v1277_v19, 4  ;;  %v1097_v18 = vsel %vm1051_vm6, %v1028_v60, %v951_v43  ;;  %v1099_v24 = vsel %vm1051_vm6, %v1030_v11, %v953_v28  ;;  %5182 = vmatmul.mubr.msk.bf16.gmra.mxu1 %vm2311_vm8, %v7663_v59  ;;  %v802_v25 = vpop.permute.xlu0 %801 }
 0x174   : > { %v1273_v33 = vor.u32 %v1272_v53, %v1269_v58  ;;  %v1282_v57 = vshrl.u32 %v1097_v18, 16  ;;  %v1285_v6 = vshll.u32 %v1097_v18, 16  ;;  %v1289_v21 = vshrl.u32 %v1099_v24, 16  ;;  %2889 = vmatprep.mubr.bf16.mxu1 %v9024_v7  ;;  %v804_v40 = vpop.permute.xlu1 %803 }
 0x175   : > { %v1280_v36 = vor.u32 %v1279_v47, %v1276_v54  ;;  %v1292_v26 = vshll.u32 %v1099_v24, 16  ;;  %v5035_v10 = vcombine.low %v477_v12, %v5748_v56  ;;  %3674 = vrot.lane.b32.xlu0 %v3612_v38, %s5851_s5  ;;  %v5036_v3 = vcombine.low %v5749_v48, %v5749_v48  ;;  %v5752_v47 = vld [vmem:[#allocation2 + $0xe4] sm:$0xf]  ;;  %v486_v24 = vld [vmem:[#allocation2 + $0xf0] sm:$0x8] }
 0x176   : > { %v1284_v46 = vrot.slane %v1282_v57, 3  ;;  %v1287_v29 = vrot.slane %v1285_v6, 4  ;;  %v1291_v20 = vrot.slane %v1289_v21, 3  ;;  %3518 = vrot.lane.b32.xlu1 %v3487_v16, %s5852_s6  ;;  %v3615_v9 = vsel %vm857_vm2, %v3613_v5, %v3614_v55  ;;  %v5753_v57 = vld [vmem:[#allocation2 + $0xe8] sm:$0xf] }
 0x177   : > { %v1294_v31 = vrot.slane %v1292_v26, 4  ;;  %v7803_v13 = vsel %vm1116_vm7, %v1273_v33, %v1280_v36  ;;  %v1033_v51 = vsel %vm970_vm5, %v5035_v10, %v802_v25  ;;  %v5037_v23 = vcombine.low %v480_v15, %v5750_v0  ;;  %v955_v49 = vpop.permute.xlu0 %954  ;;  %v5754_v56 = vld [vmem:[#allocation2 + $0xf4] sm:$0xf] }
 0x178   : > { %v1288_v59 = vor.u32 %v1287_v29, %v1284_v46  ;;  %5451 = vmatprep.mubr.msk.bf16.mxu0 %vm2311_vm8, %v7803_v13  ;;  %v1035_v37 = vsel %vm970_vm5, %v5036_v3, %v802_v25  ;;  %v5038_v42 = vcombine.low %v5751_v61, %v5751_v61  ;;  %v1101_v35 = vsel %vm1051_vm6, %v1033_v51, %v955_v49  ;;  %v957_v27 = vpop.permute.xlu1 %956 }
 0x179   : > { %v1295_v14 = vor.u32 %v1294_v31, %v1291_v20  ;;  %3676 = vrot.lane.b32.xlu0 %v3613_v5, %s5851_s5  ;;  %v1297_v8 = vshrl.u32 %v1101_v35, 16  ;;  %v1300_v39 = vshll.u32 %v1101_v35, 16  ;;  %v1103_v45 = vsel %vm1051_vm6, %v1035_v37, %v957_v27  ;;  %v5755_v31 = vld [vmem:[#allocation2 + $0xf8] sm:$0xf] }
 0x17a   : > { %3678 = vrot.lane.b32.xlu1 %v3615_v9, %s5851_s5  ;;  %v1304_v22 = vshrl.u32 %v1103_v45, 16  ;;  %v1307_v62 = vshll.u32 %v1103_v45, 16  ;;  %v1038_v4 = vsel %vm970_vm5, %v5037_v23, %v804_v40  ;;  %v1040_v1 = vsel %vm970_vm5, %v5038_v42, %v804_v40  ;;  %v3152_v40 = vld [vmem:[#allocation2 + $0x20] sm:$0x8]  ;;  %v5756_v42 = vld [vmem:[#allocation2 + $0x24] sm:$0xf] }
 0x17b   : > { %v7813_v32 = vsel %vm1116_vm7, %v1288_v59, %v1295_v14  ;;  %5183 = vmatmul.mubr.msk.bf16.gmra.mxu1 %vm2311_vm8, %v7704_v30  ;;  %v1299_v41 = vrot.slane %v1297_v8, 3  ;;  %v1302_v44 = vrot.slane %v1300_v39, 4  ;;  %v959_v52 = vpop.permute.xlu0 %958  ;;  %v483_v30 = vld [vmem:[#allocation2 + $0xe0] sm:$0x8]  ;;  %v5040_v6 = vcombine.low %v5753_v57, %v5753_v57 }
 0x17c   : > { %5452 = vmatmul.mubr.msk.bf16.gmra.mxu0 %vm2311_vm8, %v7813_v32  ;;  %2899 = vmatprep.mubr.bf16.mxu1 %v9024_v7  ;;  %v1306_v63 = vrot.slane %v1304_v22, 3  ;;  %v1309_v55 = vrot.slane %v1307_v62, 4  ;;  %v1105_v34 = vsel %vm1051_vm6, %v1038_v4, %v959_v52  ;;  %v961_v19 = vpop.permute.xlu1 %960  ;;  %v5039_v18 = vcombine.low %v483_v30, %v5752_v47 }
 0x17d   : > { %v1303_v38 = vor.u32 %v1302_v44, %v1299_v41  ;;  %v1312_v5 = vshrl.u32 %v1105_v34, 16  ;;  %v1315_v60 = vshll.u32 %v1105_v34, 16  ;;  %v1107_v58 = vsel %vm1051_vm6, %v1040_v1, %v961_v19  ;;  %v5757_v19 = vld [vmem:[#allocation2 + $0x28] sm:$0xf] }
 0x17e   : > { %v1310_v53 = vor.u32 %v1309_v55, %v1306_v63  ;;  %v1319_v43 = vshrl.u32 %v1107_v58, 16  ;;  %v1322_v16 = vshll.u32 %v1107_v58, 16  ;;  %v5041_v10 = vcombine.low %v486_v24, %v5754_v56 }
 0x17f   : > { %v1314_v11 = vrot.slane %v1312_v5, 3  ;;  %v1317_v54 = vrot.slane %v1315_v60, 4  ;;  %v806_v28 = vpop.permute.xlu0 %805  ;;  %v5042_v48 = vcombine.low %v5755_v31, %v5755_v31  ;;  %v5209_v35 = vcombine.low %v3152_v40, %v5756_v42  ;;  %v3155_v5 = vld [vmem:[#allocation2 + $0x30] sm:$0x8]  ;;  %v3158_v31 = vld [vmem:[#allocation2 + $0x40] sm:$0x8] }
 0x180   : > { %v1321_v12 = vrot.slane %v1319_v43, 3  ;;  %v1324_v33 = vrot.slane %v1322_v16, 4  ;;  %v808_v36 = vpop.permute.xlu1 %807  ;;  %v7829_v26 = vsel %vm1116_vm7, %v1303_v38, %v1310_v53  ;;  %v1043_v29 = vsel %vm970_vm5, %v5039_v18, %v806_v28 }
 0x181   : > { %v1318_v21 = vor.u32 %v1317_v54, %v1314_v11  ;;  %5455 = vmatprep.mubr.msk.bf16.mxu0 %vm2311_vm8, %v7829_v26  ;;  %v1045_v20 = vsel %vm970_vm5, %v5040_v6, %v806_v28  ;;  %v1048_v23 = vsel %vm970_vm5, %v5041_v10, %v808_v36  ;;  %v1050_v27 = vsel %vm970_vm5, %v5042_v48, %v808_v36  ;;  %v5758_v28 = vld [vmem:[#allocation2 + $0x34] sm:$0xf]  ;;  %v5759_v6 = vld [vmem:[#allocation2 + $0x38] sm:$0xf] }
 0x182   : > { %v1325_v46 = vor.u32 %v1324_v33, %v1321_v12  ;;  %v5210_v30 = vcombine.low %v5757_v19, %v5757_v19  ;;  %v5211_v12 = vcombine.low %v3155_v5, %v5758_v28  ;;  %v5212_v24 = vcombine.low %v5759_v6, %v5759_v6 }
 0x183   : > { %5184 = vmatmul.mubr.msk.bf16.gmra.mxu1 %vm2311_vm8, %v7729_v17  ;;  %v963_v25 = vpop.permute.xlu0 %962 }
 0x184   : > { %2909 = vmatprep.mubr.bf16.mxu1 %v9024_v7  ;;  %v1109_v17 = vsel %vm1051_vm6, %v1043_v29, %v963_v25  ;;  %v965_v3 = vpop.permute.xlu1 %964  ;;  %v7838_v15 = vsel %vm1116_vm7, %v1318_v21, %v1325_v46 }
 0x185   : > { %v1327_v59 = vshrl.u32 %v1109_v17, 16  ;;  %v1330_v9 = vshll.u32 %v1109_v17, 16  ;;  %v1111_v14 = vsel %vm1051_vm6, %v1045_v20, %v965_v3  ;;  %5456 = vmatmul.mubr.msk.bf16.gmra.mxu0 %vm2311_vm8, %v7838_v15 }
 0x186   : > { %v1334_v51 = vshrl.u32 %v1111_v14, 16  ;;  %v1337_v0 = vshll.u32 %v1111_v14, 16 }
 0x187   : > { %v1329_v49 = vrot.slane %v1327_v59, 3  ;;  %v1332_v37 = vrot.slane %v1330_v9, 4  ;;  %v967_v61 = vpop.permute.xlu0 %966 }
 0x188   : > { %v1336_v8 = vrot.slane %v1334_v51, 3  ;;  %v1339_v39 = vrot.slane %v1337_v0, 4  ;;  %v1113_v45 = vsel %vm1051_vm6, %v1048_v23, %v967_v61  ;;  %v969_v22 = vpop.permute.xlu1 %968  ;;  %v5760_v51 = vld [vmem:[#allocation2 + $0x44] sm:$0xf]  ;;  %v5761_v61 = vld [vmem:[#allocation2 + $0x48] sm:$0xf] }
 0x189   : > { %v1333_v62 = vor.u32 %v1332_v37, %v1329_v49  ;;  %v1342_v4 = vshrl.u32 %v1113_v45, 16  ;;  %v1345_v41 = vshll.u32 %v1113_v45, 16  ;;  %v1115_v44 = vsel %vm1051_vm6, %v1050_v27, %v969_v22 }
 0x18a   : > { %v1340_v52 = vor.u32 %v1339_v39, %v1336_v8  ;;  %v1349_v1 = vshrl.u32 %v1115_v44, 16  ;;  %v1352_v63 = vshll.u32 %v1115_v44, 16  ;;  %v5213_v0 = vcombine.low %v3158_v31, %v5760_v51  ;;  %v3161_v39 = vld [vmem:[#allocation2 + $0x50] sm:$0x8] }
 0x18b   : > { %5185 = vmatmul.mubr.msk.bf16.gmra.mxu1 %vm2311_vm8, %v7760_v50  ;;  %v1344_v55 = vrot.slane %v1342_v4, 3  ;;  %v1347_v34 = vrot.slane %v1345_v41, 4  ;;  %v3489_v38 = vpop.permute.xlu0 %3488  ;;  %v5214_v42 = vcombine.low %v5761_v61, %v5761_v61 }
 0x18c   : > { %2919 = vmatprep.mubr.bf16.mxu1 %v9024_v7  ;;  %v1351_v60 = vrot.slane %v1349_v1, 3  ;;  %v1354_v58 = vrot.slane %v1352_v63, 4  ;;  %v3682_v53 = vsel %vm970_vm5, %v5209_v35, %v3489_v38  ;;  %v7853_v50 = vsel %vm1116_vm7, %v1333_v62, %v1340_v52 }
 0x18d   : > { %v3617_v43 = vpop.permute.xlu1 %3616  ;;  %v1348_v16 = vor.u32 %v1347_v34, %v1344_v55  ;;  %5459 = vmatprep.mubr.msk.bf16.mxu0 %vm2311_vm8, %v7853_v50  ;;  %v3684_v33 = vsel %vm970_vm5, %v5210_v30, %v3489_v38  ;;  %v5762_v55 = vld [vmem:[#allocation2 + $0x54] sm:$0xf]  ;;  %v5763_v30 = vld [vmem:[#allocation2 + $0x58] sm:$0xf] }
 0x18e   : > { %v3761_v11 = vsel %vm1051_vm6, %v3682_v53, %v3617_v43  ;;  %v1355_v54 = vor.u32 %v1354_v58, %v1351_v60  ;;  %v5215_v34 = vcombine.low %v3161_v39, %v5762_v55  ;;  %v5216_v38 = vcombine.low %v5763_v30, %v5763_v30  ;;  %v5766_v55 = vld [vmem:[#allocation2 + $0x74] sm:$0xf] }
 0x18f   : > { %v3824_v47 = vshrl.u32 %v3761_v11, 16  ;;  %v3827_v18 = vshll.u32 %v3761_v11, 16  ;;  %v3619_v57 = vpop.permute.xlu0 %3618 }
 0x190   : > { %v3763_v36 = vsel %vm1051_vm6, %v3684_v33, %v3619_v57  ;;  %v7860_v46 = vsel %vm1116_vm7, %v1348_v16, %v1355_v54 }
 0x191   : > { %v3491_v21 = vpop.permute.xlu1 %3490  ;;  %v3826_v29 = vrot.slane %v3824_v47, 3  ;;  %v3829_v56 = vrot.slane %v3827_v18, 4  ;;  %v3831_v10 = vshrl.u32 %v3763_v36, 16  ;;  %v3834_v25 = vshll.u32 %v3763_v36, 16  ;;  %5460 = vmatmul.mubr.msk.bf16.gmra.mxu0 %vm2311_vm8, %v7860_v46  ;;  %v3164_v18 = vld [vmem:[#allocation2 + $0x60] sm:$0x8] }
 0x192   : > { %v3687_v20 = vsel %vm970_vm5, %v5211_v12, %v3491_v21  ;;  %4173 = vmatprep.mubr.bf16.mxu0 %v9024_v7  ;;  %v3689_v3 = vsel %vm970_vm5, %v5212_v24, %v3491_v21 }
 0x193   : > { %5186 = vmatmul.mubr.msk.bf16.gmra.mxu1 %vm2311_vm8, %v7781_v2  ;;  %v3833_v48 = vrot.slane %v3831_v10, 3  ;;  %v3836_v17 = vrot.slane %v3834_v25, 4  ;;  %v3621_v40 = vpop.permute.xlu0 %3620  ;;  %v3830_v59 = vor.u32 %v3829_v56, %v3826_v29  ;;  %v7885_v43 = vpop.f32.mrf.mxu0  ;;  %v5764_v25 = vld [vmem:[#allocation2 + $0x64] sm:$0xf] }
 0x194   : > { %2929 = vmatprep.mubr.bf16.mxu1 %v9024_v7  ;;  %v3765_v14 = vsel %vm1051_vm6, %v3687_v20, %v3621_v40  ;;  %v5217_v20 = vcombine.low %v3164_v18, %v5764_v25 }
 0x195   : > { %v3837_v9 = vor.u32 %v3836_v17, %v3833_v48  ;;  %v3623_v2 = vpop.permute.xlu1 %3622  ;;  %v3839_v23 = vshrl.u32 %v3765_v14, 16  ;;  %v3842_v49 = vshll.u32 %v3765_v14, 16  ;;  %v7888_v12 = vpop.f32.mrf.mxu0  ;;  %v5765_v48 = vld [vmem:[#allocation2 + $0x68] sm:$0xf] }
 0x196   : > { %v3767_v37 = vsel %vm1051_vm6, %v3689_v3, %v3623_v2  ;;  %v5218_v17 = vcombine.low %v5765_v48, %v5765_v48 }
 0x197   : > { %v3846_v35 = vshrl.u32 %v3767_v37, 16  ;;  %v3849_v27 = vshll.u32 %v3767_v37, 16  ;;  %v7873_v8 = vsel %vm1116_vm7, %v3830_v59, %v3837_v9  ;;  %v3841_v45 = vrot.slane %v3839_v23, 3  ;;  %v3493_v62 = vpop.permute.xlu0 %3492  ;;  %v7898_v29 = vpop.f32.mrf.mxu0 }
 0x198   : > { %v3844_v22 = vrot.slane %v3842_v49, 4  ;;  %v3692_v44 = vsel %vm970_vm5, %v5213_v0, %v3493_v62  ;;  %v3694_v1 = vsel %vm970_vm5, %v5214_v42, %v3493_v62  ;;  %v3167_v42 = vld [vmem:[#allocation2 + $0x70] sm:$0x8] }
 0x199   : > { %v3848_v4 = vrot.slane %v3846_v35, 3  ;;  %v3851_v41 = vrot.slane %v3849_v27, 4  ;;  %5276 = vmatmul.mubr.msk.bf16.vlgmr.msra.gmra.mxu0 %vm2311_vm8, %v7873_v8 }
 0x19a   : > { %4183 = vmatprep.mubr.bf16.mxu0 %v9024_v7  ;;  %v3845_v5 = vor.u32 %v3844_v22, %v3841_v45 }
 0x19b   : > { %5187 = vmatmul.mubr.msk.bf16.gmra.mxu1 %vm2311_vm8, %v7803_v13  ;;  %v3625_v52 = vpop.permute.xlu1 %3624  ;;  %v3852_v60 = vor.u32 %v3851_v41, %v3848_v4  ;;  %v3627_v13 = vpop.permute.xlu0 %3626 }
 0x19c   : > { %v3769_v63 = vsel %vm1051_vm6, %v3692_v44, %v3625_v52  ;;  %2939 = vmatprep.mubr.bf16.mxu1 %v9024_v7  ;;  %v3771_v53 = vsel %vm1051_vm6, %v3694_v1, %v3627_v13  ;;  %v7904_v3 = vpop.f32.mrf.mxu1 }
 0x19d   : > { %v3854_v19 = vshrl.u32 %v3769_v63, 16  ;;  %v3857_v58 = vshll.u32 %v3769_v63, 16  ;;  %v3861_v11 = vshrl.u32 %v3771_v53, 16  ;;  %v3864_v54 = vshll.u32 %v3771_v53, 16  ;;  %9128 = vst [vmem:[#allocation33_spill] sm:$0xff] %v7904_v3 }
 0x19e   : > { %v7892_v36 = vsel %vm1116_vm7, %v3845_v5, %v3852_v60  ;;  %v7908_v23 = vpop.f32.mrf.mxu1 }
 0x19f   : > { %v3495_v16 = vpop.permute.xlu1 %3494  ;;  %v3856_v28 = vrot.slane %v3854_v19, 3  ;;  %v3863_v57 = vrot.slane %v3861_v11, 3  ;;  %v3866_v6 = vrot.slane %v3864_v54, 4  ;;  %v3859_v24 = vrot.slane %v3857_v58, 4  ;;  %9129 = vst [vmem:[#allocation6_spill] sm:$0xff] %v7908_v23 }
 0x1a0   : > { %v3697_v47 = vsel %vm970_vm5, %v5215_v34, %v3495_v16  ;;  %v3699_v33 = vsel %vm970_vm5, %v5216_v38, %v3495_v16  ;;  %v3629_v21 = vpop.permute.xlu0 %3628  ;;  %v7914_v45 = vpop.f32.mrf.mxu1  ;;  %v5219_v34 = vcombine.low %v3167_v42, %v5766_v55  ;;  %v5767_v19 = vld [vmem:[#allocation2 + $0x78] sm:$0xf] }
 0x1a1   : > { %5277 = vmatmul.mubr.msk.bf16.gmra.mxu0 %vm2311_vm8, %v7892_v36  ;;  %v3773_v56 = vsel %vm1051_vm6, %v3697_v47, %v3629_v21  ;;  %v3867_v9 = vor.u32 %v3866_v6, %v3863_v57  ;;  %v3860_v14 = vor.u32 %v3859_v24, %v3856_v28  ;;  %9130 = vst [vmem:[#allocation7_spill] sm:$0xff] %v7914_v45  ;;  %v3170_v57 = vld [vmem:[#allocation2 + $0x80] sm:$0x8] }
 0x1a2   : > { %4193 = vmatprep.mubr.bf16.mxu0 %v9024_v7  ;;  %v3869_v40 = vshrl.u32 %v3773_v56, 16  ;;  %v3872_v59 = vshll.u32 %v3773_v56, 16  ;;  %v7922_v1 = vpop.f32.mrf.mxu1  ;;  %v5220_v30 = vcombine.low %v5767_v19, %v5767_v19 }
 0x1a3   : > { %5188 = vmatmul.mubr.msk.bf16.gmra.mxu1 %vm2311_vm8, %v7813_v32  ;;  %v3631_v10 = vpop.permute.xlu1 %3630  ;;  %v7906_v32 = vpop.f32.mrf.mxu0  ;;  %v7917_v4 = vsel %vm1116_vm7, %v3860_v14, %v3867_v9  ;;  %9131 = vst [vmem:[#allocation35_spill] sm:$0xff] %v7922_v1  ;;  %v5769_v14 = vld [vmem:[#allocation2 + $0x88] sm:$0xf] }
 0x1a4   : > { %v3775_v31 = vsel %vm1051_vm6, %v3699_v33, %v3631_v10  ;;  %2949 = vmatprep.mubr.bf16.mxu1 %v9024_v7  ;;  %v3497_v0 = vpop.permute.xlu0 %3496  ;;  %v3871_v35 = vrot.slane %v3869_v40, 3  ;;  %v3874_v27 = vrot.slane %v3872_v59, 4  ;;  %v7931_v5 = vpop.f32.mrf.mxu1  ;;  %v5768_v40 = vld [vmem:[#allocation2 + $0x84] sm:$0xf] }
 0x1a5   : > { %v3876_v2 = vshrl.u32 %v3775_v31, 16  ;;  %v3879_v51 = vshll.u32 %v3775_v31, 16  ;;  %v3702_v49 = vsel %vm970_vm5, %v5217_v20, %v3497_v0  ;;  %v3704_v61 = vsel %vm970_vm5, %v5218_v17, %v3497_v0  ;;  %v7912_v39 = vpop.f32.mrf.mxu0  ;;  %9132 = vst [vmem:[#allocation8_spill] sm:$0xff] %v7931_v5 }
 0x1a6   : > { %v3875_v58 = vor.u32 %v3874_v27, %v3871_v35  ;;  %v7935_v47 = vpop.f32.mrf.mxu1  ;;  %v5221_v59 = vcombine.low %v3170_v57, %v5768_v40 }
 0x1a7   : > { %v3633_v37 = vpop.permute.xlu1 %3632  ;;  %v3878_v22 = vrot.slane %v3876_v2, 3  ;;  %v3881_v62 = vrot.slane %v3879_v51, 4  ;;  %v7920_v52 = vpop.f32.mrf.mxu0  ;;  %9133 = vst [vmem:[#allocation25_spill] sm:$0xff] %v7935_v47  ;;  %v5222_v2 = vcombine.low %v5769_v14, %v5769_v14 }
 0x1a8   : > { %v3635_v41 = vpop.permute.xlu0 %3634  ;;  %v3777_v44 = vsel %vm1051_vm6, %v3702_v49, %v3633_v37  ;;  %v7939_v21 = vpop.f32.mrf.mxu1 }
 0x1a9   : > { %5278 = vmatmul.mubr.msk.bf16.gmra.mxu0 %vm2311_vm8, %v7917_v4  ;;  %v3779_v63 = vsel %vm1051_vm6, %v3704_v61, %v3635_v41  ;;  %v3884_v60 = vshrl.u32 %v3777_v44, 16  ;;  %v3887_v13 = vshll.u32 %v3777_v44, 16  ;;  %v7933_v53 = vpop.f32.mrf.mxu0  ;;  %9134 = vst [vmem:[#allocation36_spill] sm:$0xff] %v7939_v21 }
 0x1aa   : > { %4203 = vmatprep.mubr.bf16.mxu0 %v9024_v7  ;;  %v3891_v16 = vshrl.u32 %v3779_v63, 16  ;;  %v3894_v11 = vshll.u32 %v3779_v63, 16  ;;  %v7956_v0 = vpop.f32.mrf.mxu1  ;;  %v3173_v63 = vld [vmem:[#allocation2 + $0x90] sm:$0x8] }
 0x1ab   : > { %5189 = vmatmul.mubr.msk.bf16.gmra.mxu1 %vm2311_vm8, %v7829_v26  ;;  %v3499_v38 = vpop.permute.xlu1 %3498  ;;  %v3882_v26 = vor.u32 %v3881_v62, %v3878_v22  ;;  %v3886_v6 = vrot.slane %v3884_v60, 3  ;;  %v3889_v24 = vrot.slane %v3887_v13, 4  ;;  %v7941_v56 = vpop.f32.mrf.mxu0  ;;  %9135 = vst [vmem:[#allocation9_spill] sm:$0xff] %v7956_v0 }
 0x1ac   : > { %2959 = vmatprep.mubr.bf16.mxu1 %v9024_v7  ;;  %v3637_v54 = vpop.permute.xlu0 %3636  ;;  %v3707_v18 = vsel %vm970_vm5, %v5219_v34, %v3499_v38  ;;  %v3709_v28 = vsel %vm970_vm5, %v5220_v30, %v3499_v38  ;;  %v3893_v10 = vrot.slane %v3891_v16, 3  ;;  %v3896_v25 = vrot.slane %v3894_v11, 4 }
 0x1ad   : > { %v7944_v20 = vsel %vm1116_vm7, %v3875_v58, %v3882_v26  ;;  %v3781_v31 = vsel %vm1051_vm6, %v3707_v18, %v3637_v54  ;;  %v7952_v9 = vpop.f32.mrf.mxu0  ;;  %v3890_v61 = vor.u32 %v3889_v24, %v3886_v6  ;;  %v5770_v54 = vld [vmem:[#allocation2 + $0x94] sm:$0xf] }
 0x1ae   : > { %v3899_v49 = vshrl.u32 %v3781_v31, 16  ;;  %v3897_v37 = vor.u32 %v3896_v25, %v3893_v10  ;;  %v5223_v18 = vcombine.low %v3173_v63, %v5770_v54 }
 0x1af   : > { %v3639_v33 = vpop.permute.xlu1 %3638  ;;  %v7958_v42 = vpop.f32.mrf.mxu0 }
 0x1b0   : > { %v3501_v48 = vpop.permute.xlu0 %3500  ;;  %v3783_v17 = vsel %vm1051_vm6, %v3709_v28, %v3639_v33  ;;  %v7960_v62 = vpop.f32.mrf.mxu1  ;;  %v3901_v34 = vrot.slane %v3899_v49, 3  ;;  %v7969_v58 = vsel %vm1116_vm7, %v3890_v61, %v3897_v37  ;;  %v5771_v28 = vld [vmem:[#allocation2 + $0x98] sm:$0xf] }
 0x1b1   : > { %5279 = vmatmul.mubr.msk.bf16.gmra.mxu0 %vm2311_vm8, %v7944_v20  ;;  %v3906_v35 = vshrl.u32 %v3783_v17, 16  ;;  %v3909_v27 = vshll.u32 %v3783_v17, 16  ;;  %9136 = vst [vmem:[#allocation28_spill] sm:$0xff] %v7960_v62  ;;  %v3712_v41 = vsel %vm970_vm5, %v5221_v59, %v3501_v48  ;;  %v3714_v44 = vsel %vm970_vm5, %v5222_v2, %v3501_v48  ;;  %v7966_v38 = vpop.f32.mrf.mxu0 }
 0x1b2   : > { %4213 = vmatprep.mubr.bf16.mxu0 %v9024_v7  ;;  %v7964_v30 = vpop.f32.mrf.mxu1  ;;  %v5224_v33 = vcombine.low %v5771_v28, %v5771_v28 }
 0x1b3   : > { %5190 = vmatmul.mubr.msk.bf16.gmra.mxu1 %vm2311_vm8, %v7838_v15  ;;  %v3641_v51 = vpop.permute.xlu1 %3640  ;;  %v3902_v15 = vshll.u32 %v3781_v31, 16  ;;  %9137 = vst [vmem:[#allocation31_spill] sm:$0xff] %v7964_v30  ;;  %v3908_v60 = vrot.slane %v3906_v35, 3  ;;  %v3911_v13 = vrot.slane %v3909_v27, 4  ;;  %v7981_v31 = vpop.f32.mrf.mxu0 }
 0x1b4   : > { %2969 = vmatprep.mubr.bf16.mxu1 %v9024_v7  ;;  %v3643_v22 = vpop.permute.xlu0 %3642  ;;  %v3785_v26 = vsel %vm1051_vm6, %v3712_v41, %v3641_v51  ;;  %v7979_v6 = vpop.f32.mrf.mxu1  ;;  %v3176_v51 = vld [vmem:[#allocation2 + $0xa0] sm:$0x8] }
 0x1b5   : > { %v3904_v19 = vrot.slane %v3902_v15, 4  ;;  %v3787_v11 = vsel %vm1051_vm6, %v3714_v44, %v3643_v22  ;;  %9138 = vst [vmem:[#allocation19_spill] sm:$0xff] %v7979_v6  ;;  %v3914_v24 = vshrl.u32 %v3785_v26, 16  ;;  %v3917_v10 = vshll.u32 %v3785_v26, 16  ;;  %v5773_v26 = vld [vmem:[#allocation2 + $0xa8] sm:$0xf] }
 0x1b6   : > { %v3921_v48 = vshrl.u32 %v3787_v11, 16  ;;  %v3924_v17 = vshll.u32 %v3787_v11, 16  ;;  %v7987_v15 = vpop.f32.mrf.mxu1 }
 0x1b7   : > { %v3503_v55 = vpop.permute.xlu1 %3502  ;;  %v3905_v25 = vor.u32 %v3904_v19, %v3901_v34  ;;  %v7984_v14 = vpop.f32.mrf.mxu0  ;;  %9140 = vst [vmem:[#allocation21_spill] sm:$0xff] %v7987_v15  ;;  %v3916_v37 = vrot.slane %v3914_v24, 3  ;;  %v3919_v61 = vrot.slane %v3917_v10, 4  ;;  %v5772_v34 = vld [vmem:[#allocation2 + $0xa4] sm:$0xf] }
 0x1b8   : > { %v3717_v59 = vsel %vm970_vm5, %v5223_v18, %v3503_v55  ;;  %9139 = vst [vmem:[#allocation12_spill] sm:$0xff] %v7984_v14  ;;  %v3719_v2 = vsel %vm970_vm5, %v5224_v33, %v3503_v55  ;;  %v3923_v35 = vrot.slane %v3921_v48, 3  ;;  %v3926_v27 = vrot.slane %v3924_v17, 4  ;;  %v3179_v17 = vld [vmem:[#allocation2 + $0xb0] sm:$0x8] }
 0x1b9   : > { %v3645_v16 = vpop.permute.xlu0 %3644  ;;  %5280 = vmatmul.mubr.msk.bf16.gmra.mxu0 %vm2311_vm8, %v7969_v58  ;;  %v7989_v22 = vpop.f32.mrf.mxu0  ;;  %v5225_v19 = vcombine.low %v3176_v51, %v5772_v34  ;;  %v3920_v33 = vor.u32 %v3919_v61, %v3916_v37 }
 0x1ba   : > { %4223 = vmatprep.mubr.bf16.mxu0 %v9024_v7  ;;  %9141 = vst [vmem:[#allocation10_spill] sm:$0xff] %v7989_v22  ;;  %v3789_v44 = vsel %vm1051_vm6, %v3717_v59, %v3645_v16  ;;  %v5226_v16 = vcombine.low %v5773_v26, %v5773_v26  ;;  %v3927_v28 = vor.u32 %v3926_v27, %v3923_v35  ;;  %v5787_v22 = vld [vmem:[#allocation2 + $0x114] sm:$0xf] }
 0x1bb   : > { %5191 = vmatmul.mubr.msk.bf16.gmra.mxu1 %vm2311_vm8, %v7853_v50  ;;  %v3647_v57 = vpop.permute.xlu1 %3646  ;;  %v3912_v50 = vor.u32 %v3911_v13, %v3908_v60  ;;  %v8002_v13 = vpop.f32.mrf.mxu0  ;;  %v3932_v18 = vshll.u32 %v3789_v44, 16 }
 0x1bc   : > { %2979 = vmatprep.mubr.bf16.mxu1 %v9024_v7  ;;  %v7995_v63 = vpop.f32.mrf.mxu1  ;;  %v3791_v55 = vsel %vm1051_vm6, %v3719_v2, %v3647_v57  ;;  %9143 = vst [vmem:[#allocation29_spill] sm:$0xff] %v8002_v13  ;;  %v8020_v61 = vsel %vm1116_vm7, %v3920_v33, %v3927_v28 }
 0x1bd   : > { %v7992_v41 = vsel %vm1116_vm7, %v3905_v25, %v3912_v50  ;;  %9142 = vst [vmem:[#allocation11_spill] sm:$0xff] %v7995_v63  ;;  %v3936_v57 = vshrl.u32 %v3791_v55, 16  ;;  %v3939_v24 = vshll.u32 %v3791_v55, 16  ;;  %v8012_v48 = vpop.f32.mrf.mxu0  ;;  %v3934_v51 = vrot.slane %v3932_v18, 4  ;;  %v5775_v18 = vld [vmem:[#allocation2 + $0xb8] sm:$0xf] }
 0x1be   : > { %v3505_v40 = vpop.permute.xlu0 %3504  ;;  %v8007_v54 = vpop.f32.mrf.mxu1  ;;  %9146 = vst [vmem:[#allocation14_spill] sm:$0xff] %v8012_v48  ;;  %v5786_v48 = vld [vmem:[#allocation2 + $0x118] sm:$0xf] }
 0x1bf   : > { %9144 = vst [vmem:[#allocation30_spill] sm:$0xff] %v8007_v54  ;;  %v3722_v25 = vsel %vm970_vm5, %v5225_v19, %v3505_v40  ;;  %v3941_v35 = vrot.slane %v3939_v24, 4  ;;  %v5774_v19 = vld [vmem:[#allocation2 + $0xb4] sm:$0xf]  ;;  %v5240_v13 = vcombine.low %v5786_v48, %v5786_v48 }
 0x1c0   : > { %v3649_v49 = vpop.permute.xlu1 %3648  ;;  %v8009_v10 = vpop.f32.mrf.mxu1  ;;  %v5227_v26 = vcombine.low %v3179_v17, %v5774_v19  ;;  %v3182_v19 = vld [vmem:[#allocation2 + $0xc0] sm:$0x8] }
 0x1c1   : > { %5281 = vmatmul.mubr.msk.bf16.gmra.mxu0 %vm2311_vm8, %v7992_v41  ;;  %9145 = vst [vmem:[#allocation13_spill] sm:$0xff] %v8009_v10  ;;  %v3793_v27 = vsel %vm1051_vm6, %v3722_v25, %v3649_v49  ;;  %v5228_v49 = vcombine.low %v5775_v18, %v5775_v18 }
 0x1c2   : > { %v3651_v60 = vpop.permute.xlu0 %3650  ;;  %4233 = vmatprep.mubr.bf16.mxu0 %v9024_v7  ;;  %v8015_v34 = vpop.f32.mrf.mxu1  ;;  %v3947_v24 = vshll.u32 %v3793_v27, 16 }
 0x1c3   : > { %5192 = vmatmul.mubr.msk.bf16.gmra.mxu1 %vm2311_vm8, %v7860_v46  ;;  %v3929_v46 = vshrl.u32 %v3789_v44, 16  ;;  %9147 = vst [vmem:[#allocation15_spill] sm:$0xff] %v8015_v34  ;;  %v3938_v44 = vrot.slane %v3936_v57, 3  ;;  %v3944_v57 = vshrl.u32 %v3793_v27, 16 }
 0x1c4   : > { %5465 = vmatprep.mubr.msk.bf16.mxu1 %vm2311_vm8, %v7873_v8  ;;  %v3507_v11 = vpop.permute.xlu1 %3506  ;;  %v3724_v8 = vsel %vm970_vm5, %v5226_v16, %v3505_v40  ;;  %v8017_v37 = vpop.f32.mrf.mxu0  ;;  %v3949_v27 = vrot.slane %v3947_v24, 4  ;;  %v5777_v24 = vld [vmem:[#allocation2 + $0xc8] sm:$0xf] }
 0x1c5   : > { %v3931_v2 = vrot.slane %v3929_v46, 3  ;;  %9148 = vst [vmem:[#allocation16_spill] sm:$0xff] %v8017_v37  ;;  %v8023_v55 = vpop.f32.mrf.mxu1  ;;  %v3795_v40 = vsel %vm1051_vm6, %v3724_v8, %v3651_v60  ;;  %v3942_v25 = vor.u32 %v3941_v35, %v3938_v44  ;;  %v3729_v54 = vsel %vm970_vm5, %v5228_v49, %v3507_v11 }
 0x1c6   : > { %v3653_v50 = vpop.permute.xlu0 %3652  ;;  %v8032_v46 = vpop.f32.mrf.mxu0  ;;  %v3951_v8 = vshrl.u32 %v3795_v40, 16  ;;  %v3954_v17 = vshll.u32 %v3795_v40, 16  ;;  %v3946_v15 = vrot.slane %v3944_v57, 3 }
 0x1c7   : > { %9149 = vst [vmem:[#allocation32_spill] sm:$0xff] %v8032_v46  ;;  %v8035_v33 = vpop.f32.mrf.mxu1 }
 0x1c8   : > { %v3655_v59 = vpop.permute.xlu1 %3654  ;;  %v8037_v60 = vpop.f32.mrf.mxu0  ;;  %v3953_v35 = vrot.slane %v3951_v8, 3  ;;  %v3956_v40 = vrot.slane %v3954_v17, 4 }
 0x1c9   : > { %5282 = vmatmul.mubr.msk.bf16.gmra.mxu0 %vm2311_vm8, %v8020_v61  ;;  %9150 = vst [vmem:[#allocation17_spill] sm:$0xff] %v8037_v60  ;;  %v8039_v34 = vpop.f32.mrf.mxu1 }
 0x1ca   : > { %v3509_v16 = vpop.permute.xlu0 %3508  ;;  %4243 = vmatprep.mubr.bf16.mxu0 %v9024_v7  ;;  %v8042_v18 = vpop.f32.mrf.mxu0 }
 0x1cb   : > { %5466 = vmatmul.mubr.msk.bf16.vlgmr.msra.gmra.mxu1 %vm2311_vm8, %v7892_v36  ;;  %v3935_v36 = vor.u32 %v3934_v51, %v3931_v2  ;;  %9151 = vst [vmem:[#allocation18_spill] sm:$0xff] %v8042_v18  ;;  %v8047_v2 = vpop.f32.mrf.mxu1  ;;  %v5776_v51 = vld [vmem:[#allocation2 + $0xc4] sm:$0xf] }
 0x1cc   : > { %5469 = vmatprep.mubr.msk.bf16.mxu1 %vm2311_vm8, %v7917_v4  ;;  %v3657_v28 = vpop.permute.xlu1 %3656  ;;  %v3727_v4 = vsel %vm970_vm5, %v5227_v26, %v3507_v11  ;;  %v5229_v44 = vcombine.low %v3182_v19, %v5776_v51  ;;  %v8049_v6 = vpop.f32.mrf.mxu0  ;;  %v3799_v11 = vsel %vm1051_vm6, %v3729_v54, %v3655_v59  ;;  %v3957_v19 = vor.u32 %v3956_v40, %v3953_v35  ;;  %v3188_v51 = vld [vmem:[#allocation2 + $0xe0] sm:$0x8]  ;;  %v5778_v40 = vld [vmem:[#allocation2 + $0xe4] sm:$0xf] }
 0x1cd   : > { %9152 = vst [vmem:[#allocation20_spill] sm:$0xff] %v8049_v6  ;;  %v8052_v30 = vsel %vm1116_vm7, %v3935_v36, %v3942_v25  ;;  %v3797_v26 = vsel %vm1051_vm6, %v3727_v4, %v3653_v50  ;;  %v8055_v62 = vpop.f32.mrf.mxu1  ;;  %v5230_v36 = vcombine.low %v5777_v24, %v5777_v24  ;;  %v3950_v25 = vor.u32 %v3949_v27, %v3946_v15  ;;  %v3185_v15 = vld [vmem:[#allocation2 + $0xd0] sm:$0x8]  ;;  %v5783_v6 = vld [vmem:[#allocation2 + $0xf8] sm:$0xf] }
 0x1ce   : > { %v3659_v10 = vpop.permute.xlu0 %3658  ;;  %v8066_v57 = vpop.f32.mrf.mxu0  ;;  %v3959_v17 = vshrl.u32 %v3797_v26, 16  ;;  %v3966_v54 = vshrl.u32 %v3799_v11, 16  ;;  %v3969_v59 = vshll.u32 %v3799_v11, 16  ;;  %v5233_v11 = vcombine.low %v3188_v51, %v5778_v40 }
 0x1cf   : > { %9153 = vst [vmem:[#allocation22_spill] sm:$0xff] %v8066_v57  ;;  %v8071_v8 = vpop.f32.mrf.mxu1  ;;  %v3734_v47 = vsel %vm970_vm5, %v5230_v36, %v3509_v16  ;;  %v3958_v3 = vsel %vm1116_vm7, %v3950_v25, %v3957_v19  ;;  %v5781_v19 = vld [vmem:[#allocation2 + $0xd8] sm:$0xf]  ;;  %v5236_v18 = vcombine.low %v5783_v6, %v5783_v6 }
 0x1d0   : > { %v8045_v63 = vpop.permute.xlu1 %3510  ;;  %v8073_v4 = vpop.f32.mrf.mxu0  ;;  %v3961_v5 = vrot.slane %v3959_v17, 3  ;;  %v3968_v45 = vrot.slane %v3966_v54, 3 }
 0x1d1   : > { %5283 = vmatmul.mubr.msk.bf16.gmra.mxu0 %vm2311_vm8, %v8052_v30  ;;  %9154 = vst [vmem:[#allocation24_spill] sm:$0xff] %v8073_v4  ;;  %v8076_v0 = vpop.f32.mrf.mxu1  ;;  %v5779_v4 = vld [vmem:[#allocation2 + $0xe8] sm:$0xf] }
 0x1d2   : > { %v8062_v49 = vpop.permute.xlu0 %3660  ;;  %4253 = vmatprep.mubr.bf16.mxu0 %v9024_v7  ;;  %v8078_v21 = vpop.f32.mrf.mxu0 }
 0x1d3   : > { %5470 = vmatmul.mubr.msk.bf16.gmra.mxu1 %vm2311_vm8, %v7944_v20  ;;  %v3962_v20 = vshll.u32 %v3797_v26, 16  ;;  %9155 = vst [vmem:[#allocation23_spill] sm:$0xff] %v8078_v21  ;;  %v8081_v26 = vpop.f32.mrf.mxu1  ;;  %v5234_v21 = vcombine.low %v5779_v4, %v5779_v4 }
 0x1d4   : > { %5473 = vmatprep.mubr.msk.bf16.mxu1 %vm2311_vm8, %v7969_v58  ;;  %v8069_v50 = vpop.permute.xlu1 %3662  ;;  %v3732_v58 = vsel %vm970_vm5, %v5229_v44, %v3509_v16  ;;  %v3971_v44 = vrot.slane %v3969_v59, 4  ;;  %v3803_v16 = vsel %vm1051_vm6, %v3734_v47, %v3659_v10  ;;  %v5232_v59 = vcombine.low %v5781_v19, %v5781_v19 }
 0x1d5   : > { %v3964_v1 = vrot.slane %v3962_v20, 4  ;;  %v3801_v35 = vsel %vm1051_vm6, %v3732_v58, %v3657_v28  ;;  %v8084_v23 = vpop.f32.mrf.mxu0  ;;  %v5780_v28 = vld [vmem:[#allocation2 + $0xd4] sm:$0xf]  ;;  %v3981_v10 = vshrl.u32 %v3803_v16, 16 }
 0x1d6   : > { %v3513_v24 = vpop.permute.xlu0 %3512  ;;  %9156 = vst [vmem:[#allocation26_spill] sm:$0xff] %v8084_v23  ;;  %v8087_v57 = vpop.f32.mrf.mxu1  ;;  %v5231_v36 = vcombine.low %v3185_v15, %v5780_v28  ;;  %v3974_v20 = vshrl.u32 %v3801_v35, 16  ;;  %v3977_v54 = vshll.u32 %v3801_v35, 16  ;;  %v3984_v15 = vshll.u32 %v3803_v16, 16  ;;  %v3194_v28 = vld [vmem:[#allocation2 + $0x100] sm:$0x8] }
 0x1d7   : > { %v8095_v25 = vpop.f32.mrf.mxu0  ;;  %v3965_v58 = vor.u32 %v3964_v1, %v3961_v5  ;;  %v3742_v47 = vsel %vm970_vm5, %v5233_v11, %v3513_v24  ;;  %v3744_v35 = vsel %vm970_vm5, %v5234_v21, %v3513_v24 }
 0x1d8   : > { %v3665_v27 = vpop.permute.xlu1 %3664  ;;  %9157 = vst [vmem:[#allocation27_spill] sm:$0xff] %v8095_v25  ;;  %v8098_v51 = vpop.f32.mrf.mxu1  ;;  %v3737_v19 = vsel %vm970_vm5, %v5231_v36, %v8045_v63  ;;  %v8108_v1 = vrot.slane %v3974_v20, 3  ;;  %v8110_v5 = vrot.slane %v3977_v54, 4  ;;  %v5782_v36 = vld [vmem:[#allocation2 + $0xf4] sm:$0xf]  ;;  %v3983_v54 = vrot.slane %v3981_v10, 3 }
 0x1d9   : > { %5284 = vmatmul.mubr.msk.bf16.gmra.mxu0 %vm2311_vm8, %v3958_v3  ;;  %v8101_v40 = vpop.f32.mrf.mxu0  ;;  %v5784_v20 = vld [vmem:[#allocation2 + $0x104] sm:$0xf]  ;;  %v3986_v46 = vrot.slane %v3984_v15, 4  ;;  %v5785_v10 = vld [vmem:[#allocation2 + $0x108] sm:$0xf] }
 0x1da   : > { %v3667_v17 = vpop.permute.xlu0 %3666  ;;  %4263 = vmatprep.mubr.bf16.mxu0 %v9024_v7  ;;  %9158 = vst [vmem:[#allocation34_spill] sm:$0xff] %v8101_v40  ;;  %v8106_v25 = vpop.f32.mrf.mxu1  ;;  %v5237_v60 = vcombine.low %v3194_v28, %v5784_v20  ;;  %v5238_v15 = vcombine.low %v5785_v10, %v5785_v10  ;;  %v3197_v10 = vld [vmem:[#allocation2 + $0x110] sm:$0x8] }
 0x1db   : > { %5474 = vmatmul.mubr.msk.bf16.gmra.mxu1 %vm2311_vm8, %v7992_v41  ;;  %v3972_v41 = vor.u32 %v3971_v44, %v3968_v45  ;;  %v3739_v45 = vsel %vm970_vm5, %v5232_v59, %v8045_v63  ;;  %v8114_v11 = vpop.f32.mrf.mxu0  ;;  %v3809_v44 = vsel %vm1051_vm6, %v3742_v47, %v3665_v27  ;;  %v3811_v16 = vsel %vm1051_vm6, %v3744_v35, %v3667_v17 }
 0x1dc   : > { %5477 = vmatprep.mubr.msk.bf16.mxu1 %vm2311_vm8, %v8020_v61  ;;  %v3515_v4 = vpop.permute.xlu1 %3514  ;;  %v3191_v61 = vld [vmem:[#allocation2 + $0xf0] sm:$0x8]  ;;  %9159 = vst [vmem:[#allocation37_spill] sm:$0xff] %v8114_v11  ;;  %v8117_v24 = vpop.f32.mrf.mxu1  ;;  %v3805_v63 = vsel %vm1051_vm6, %v3737_v19, %v8062_v49  ;;  %v3807_v47 = vsel %vm1051_vm6, %v3739_v45, %v8069_v50  ;;  %v4004_v6 = vshrl.u32 %v3809_v44, 16  ;;  %v4007_v17 = vshll.u32 %v3809_v44, 16 }
 0x1dd   : > { %v5235_v40 = vcombine.low %v3191_v61, %v5782_v36  ;;  %v8122_v59 = vpop.f32.mrf.mxu0  ;;  %v3973_v27 = vsel %vm1116_vm7, %v3965_v58, %v3972_v41  ;;  %v3980_v49 = vor.u32 %v8110_v5, %v8108_v1  ;;  %v4011_v50 = vshrl.u32 %v3811_v16, 16 }
 0x1de   : > { %9160 = vst [vmem:[#allocation38_spill] sm:$0xff] %v8122_v59  ;;  %v8127_v11 = vpop.f32.mrf.mxu1  ;;  %v4014_v41 = vshll.u32 %v3811_v16, 16  ;;  %v3989_v28 = vshrl.u32 %v3805_v63, 16  ;;  %v3992_v19 = vshll.u32 %v3805_v63, 16  ;;  %v3749_v44 = vsel %vm970_vm5, %v5236_v18, %v3515_v4 }
 0x1df   : > { %v3669_v23 = vpop.permute.xlu0 %3668  ;;  %v8135_v58 = vpop.f32.mrf.mxu0  ;;  %v3747_v45 = vsel %vm970_vm5, %v5235_v40, %v3515_v4  ;;  %v3987_v36 = vor.u32 %v3986_v46, %v3983_v54  ;;  %v3996_v20 = vshrl.u32 %v3807_v47, 16  ;;  %v3999_v1 = vshll.u32 %v3807_v47, 16 }
 0x1e0   : > { %v3671_v21 = vpop.permute.xlu1 %3670  ;;  %9161 = vst [vmem:[#allocation39_spill] sm:$0xff] %v8135_v58  ;;  %v4006_v16 = vrot.slane %v4004_v6, 3  ;;  %v4009_v58 = vrot.slane %v4007_v17, 4  ;;  %v4013_v18 = vrot.slane %v4011_v50, 3  ;;  %v4016_v46 = vrot.slane %v4014_v41, 4 }
 0x1e1   : > { %5285 = vmatmul.mubr.msk.bf16.gmra.mxu0 %vm2311_vm8, %v3973_v27  ;;  %v8142_v5 = vpop.f32.mrf.mxu0  ;;  %v3813_v4 = vsel %vm1051_vm6, %v3747_v45, %v3669_v23  ;;  %v3815_v54 = vsel %vm1051_vm6, %v3749_v44, %v3671_v21  ;;  %v4001_v14 = vrot.slane %v3999_v1, 4  ;;  %v3988_v50 = vsel %vm1116_vm7, %v3980_v49, %v3987_v36 }
 0x1e2   : > { %4273 = vmatprep.mubr.bf16.mxu0 %v9024_v7  ;;  %9162 = vst [vmem:[#allocation40_spill] sm:$0xff] %v8142_v5  ;;  %v3994_v5 = vrot.slane %v3992_v19, 4  ;;  %v4019_v21 = vshrl.u32 %v3813_v4, 16  ;;  %v4026_v19 = vshrl.u32 %v3815_v54, 16  ;;  %v4010_v45 = vor.u32 %v4009_v58, %v4006_v16 }
 0x1e3   : > { %5478 = vmatmul.mubr.msk.bf16.gmra.mxu1 %vm2311_vm8, %v8052_v30  ;;  %v3517_v35 = vpop.permute.xlu0 %3516  ;;  %v8138_v30 = vpop.f32.mrf.mxu1 }
 0x1e4   : > { %5481 = vmatprep.mubr.msk.bf16.mxu1 %vm2311_vm8, %v3958_v3  ;;  %v3673_v61 = vpop.permute.xlu1 %3672  ;;  %v3752_v3 = vsel %vm970_vm5, %v5237_v60, %v3517_v35  ;;  %v3754_v63 = vsel %vm970_vm5, %v5238_v15, %v3517_v35  ;;  %v8148_v40 = vpop.f32.mrf.mxu0  ;;  %v3991_v60 = vrot.slane %v3989_v28, 3  ;;  %v5239_v15 = vcombine.low %v3197_v10, %v5787_v22 }
 0x1e5   : > { %v8145_v59 = vpop.f32.mrf.mxu1  ;;  %v3817_v17 = vsel %vm1051_vm6, %v3752_v3, %v3673_v61  ;;  %v3998_v35 = vrot.slane %v3996_v20, 3  ;;  %v4022_v28 = vshll.u32 %v3813_v4, 16  ;;  %v4029_v61 = vshll.u32 %v3815_v54, 16 }
 0x1e6   : > { %v8155_v48 = vpop.f32.mrf.mxu0  ;;  %v4017_v22 = vor.u32 %v4016_v46, %v4013_v18  ;;  %v4034_v20 = vshrl.u32 %v3817_v17, 16  ;;  %v4037_v49 = vshll.u32 %v3817_v17, 16  ;;  %v4021_v46 = vrot.slane %v4019_v21, 3 }
 0x1e7   : > { %v3675_v37 = vpop.permute.xlu0 %3674  ;;  %v8152_v6 = vpop.f32.mrf.mxu1  ;;  %9163 = vst [vmem:[#allocation41_spill] sm:$0xff] %v8155_v48  ;;  %v4002_v10 = vor.u32 %v4001_v14, %v3998_v35  ;;  %v4024_v4 = vrot.slane %v4022_v28, 4  ;;  %v4028_v54 = vrot.slane %v4026_v19, 3  ;;  %v4031_v17 = vrot.slane %v4029_v61, 4 }
 0x1e8   : > { %v3519_v47 = vpop.permute.xlu1 %3518  ;;  %v3819_v41 = vsel %vm1051_vm6, %v3754_v63, %v3675_v37  ;;  %v8164_v44 = vpop.f32.mrf.mxu0 }
 0x1e9   : > { %v8159_v23 = vpop.f32.mrf.mxu1  ;;  %5286 = vmatmul.mubr.msk.bf16.gmra.mxu0 %vm2311_vm8, %v3988_v50  ;;  %9165 = vst [vmem:[#allocation43_spill] sm:$0xff] %v8164_v44  ;;  %v4041_v36 = vshrl.u32 %v3819_v41, 16  ;;  %v4044_v1 = vshll.u32 %v3819_v41, 16  ;;  %v3757_v58 = vsel %vm970_vm5, %v5239_v15, %v3519_v47  ;;  %v3759_v16 = vsel %vm970_vm5, %v5240_v13, %v3519_v47 }
 0x1ea   : > { %9164 = vst [vmem:[#allocation42_spill] sm:$0xff] %v8159_v23  ;;  %4283 = vmatprep.mubr.bf16.mxu0 %v9024_v7  ;;  %v8169_v63 = vpop.f32.mrf.mxu0  ;;  %v4039_v41 = vrot.slane %v4037_v49, 4  ;;  %v4025_v28 = vor.u32 %v4024_v4, %v4021_v46  ;;  %v4032_v19 = vor.u32 %v4031_v17, %v4028_v54 }
 0x1eb   : > { %5482 = vmatmul.mubr.msk.bf16.gmra.mxu1 %vm2311_vm8, %v3973_v27  ;;  %v8167_v37 = vpop.f32.mrf.mxu1  ;;  %v3677_v3 = vpop.permute.xlu0 %3676  ;;  %v3995_v27 = vor.u32 %v3994_v5, %v3991_v60  ;;  %9167 = vst [vmem:[#allocation45_spill] sm:$0xff] %v8169_v63  ;;  %v4018_v5 = vsel %vm1116_vm7, %v4010_v45, %v4017_v22  ;;  %v4043_v60 = vrot.slane %v4041_v36, 3  ;;  %v4046_v35 = vrot.slane %v4044_v1, 4 }
 0x1ec   : > { %5485 = vmatprep.mubr.msk.bf16.mxu1 %vm2311_vm8, %v3988_v50  ;;  %9166 = vst [vmem:[#allocation44_spill] sm:$0xff] %v8167_v37  ;;  %v3679_v18 = vpop.permute.xlu1 %3678  ;;  %v8175_v23 = vpop.f32.mrf.mxu0  ;;  %v4036_v37 = vrot.slane %v4034_v20, 3  ;;  %v3821_v15 = vsel %vm1051_vm6, %v3757_v58, %v3677_v3 }
 0x1ed   : > { %v8173_v50 = vpop.f32.mrf.mxu1  ;;  %9169 = vst [vmem:[#allocation47_spill] sm:$0xff] %v8175_v23  ;;  %v3823_v13 = vsel %vm1051_vm6, %v3759_v16, %v3679_v18  ;;  %v4003_v21 = vsel %vm1116_vm7, %v3995_v27, %v4002_v10  ;;  %v4049_v22 = vshrl.u32 %v3821_v15, 16  ;;  %v4052_v20 = vshll.u32 %v3821_v15, 16 }
 0x1ee   : > { %9168 = vst [vmem:[#allocation46_spill] sm:$0xff] %v8173_v50  ;;  %v8182_v47 = vpop.f32.mrf.mxu0  ;;  %v4056_v49 = vshrl.u32 %v3823_v13, 16  ;;  %v4059_v36 = vshll.u32 %v3823_v13, 16  ;;  %v4040_v1 = vor.u32 %v4039_v41, %v4036_v37  ;;  %v4047_v27 = vor.u32 %v4046_v35, %v4043_v60 }
 0x1ef   : > { %v8178_v14 = vpop.f32.mrf.mxu1  ;;  %9171 = vst [vmem:[#allocation49_spill] sm:$0xff] %v8182_v47  ;;  %v4033_v16 = vsel %vm1116_vm7, %v4025_v28, %v4032_v19  ;;  %v4051_v46 = vrot.slane %v4049_v22, 3  ;;  %v4054_v4 = vrot.slane %v4052_v20, 4 }
 0x1f0   : > { %9170 = vst [vmem:[#allocation48_spill] sm:$0xff] %v8178_v14  ;;  %v8189_v45 = vpop.f32.mrf.mxu0  ;;  %v4058_v54 = vrot.slane %v4056_v49, 3  ;;  %v4061_v17 = vrot.slane %v4059_v36, 4  ;;  %v4048_v13 = vsel %vm1116_vm7, %v4040_v1, %v4047_v27 }
 0x1f1   : > { %5287 = vmatmul.mubr.msk.bf16.gmra.mxu0 %vm2311_vm8, %v4003_v21  ;;  %9173 = vst [vmem:[#allocation51_spill] sm:$0xff] %v8189_v45  ;;  %v4055_v60 = vor.u32 %v4054_v4, %v4051_v46 }
 0x1f2   : > { %v8185_v61 = vpop.f32.mrf.mxu1  ;;  %4293 = vmatprep.mubr.bf16.mxu0 %v9024_v7  ;;  %v8195_v10 = vpop.f32.mrf.mxu0  ;;  %v4062_v35 = vor.u32 %v4061_v17, %v4058_v54 }
 0x1f3   : > { %9172 = vst [vmem:[#allocation50_spill] sm:$0xff] %v8185_v61  ;;  %5486 = vmatmul.mubr.msk.bf16.gmra.mxu1 %vm2311_vm8, %v4003_v21  ;;  %9175 = vst [vmem:[#allocation53_spill] sm:$0xff] %v8195_v10 }
 0x1f4   : > { %5489 = vmatprep.mubr.msk.bf16.mxu1 %vm2311_vm8, %v4018_v5  ;;  %v8193_v3 = vpop.f32.mrf.mxu1  ;;  %v8200_v18 = vpop.f32.mrf.mxu0 }
 0x1f5   : > { %9174 = vst [vmem:[#allocation52_spill] sm:$0xff] %v8193_v3  ;;  %9177 = vst [vmem:[#allocation55_spill] sm:$0xff] %v8200_v18 }
 0x1f6   : > { %v8197_v58 = vpop.f32.mrf.mxu1  ;;  %v8205_v37 = vpop.f32.mrf.mxu0 }
 0x1f7   : > { %9176 = vst [vmem:[#allocation54_spill] sm:$0xff] %v8197_v58  ;;  %9179 = vst [vmem:[#allocation57_spill] sm:$0xff] %v8205_v37 }
 0x1f8   : > { %v8202_v15 = vpop.f32.mrf.mxu1  ;;  %v8211_v21 = vpop.f32.mrf.mxu0 }
 0x1f9   : > { %9178 = vst [vmem:[#allocation56_spill] sm:$0xff] %v8202_v15  ;;  %5288 = vmatmul.mubr.msk.bf16.gmra.mxu0 %vm2311_vm8, %v4018_v5  ;;  %9181 = vst [vmem:[#allocation59_spill] sm:$0xff] %v8211_v21  ;;  %v4063_v5 = vsel %vm1116_vm7, %v4055_v60, %v4062_v35 }
 0x1fa   : > { %v8207_v41 = vpop.f32.mrf.mxu1  ;;  %4303 = vmatprep.mubr.bf16.mxu0 %v9024_v7  ;;  %v8217_v19 = vpop.f32.mrf.mxu0 }
 0x1fb   : > { %9180 = vst [vmem:[#allocation58_spill] sm:$0xff] %v8207_v41  ;;  %5490 = vmatmul.mubr.msk.bf16.gmra.mxu1 %vm2311_vm8, %v4033_v16  ;;  %9183 = vst [vmem:[#allocation61_spill] sm:$0xff] %v8217_v19 }
 0x1fc   : > { %5493 = vmatprep.mubr.msk.bf16.mxu1 %vm2311_vm8, %v4048_v13  ;;  %v8215_v28 = vpop.f32.mrf.mxu1  ;;  %v8221_v20 = vpop.f32.mrf.mxu0 }
 0x1fd   : > { %9182 = vst [vmem:[#allocation60_spill] sm:$0xff] %v8215_v28  ;;  %9185 = vst [vmem:[#allocation63_spill] sm:$0xff] %v8221_v20 }
 0x1fe   : > { %v8219_v22 = vpop.f32.mrf.mxu1  ;;  %v8226_v36 = vpop.f32.mrf.mxu0 }
 0x1ff   : > { %9184 = vst [vmem:[#allocation62_spill] sm:$0xff] %v8219_v22  ;;  %9187 = vst [vmem:[#allocation65_spill] sm:$0xff] %v8226_v36 }
 0x200   : > { %v8224_v49 = vpop.f32.mrf.mxu1  ;;  %v8232_v27 = vpop.f32.mrf.mxu0 }
 0x201   : > { %9186 = vst [vmem:[#allocation64_spill] sm:$0xff] %v8224_v49  ;;  %5289 = vmatmul.mubr.msk.bf16.gmra.mxu0 %vm2311_vm8, %v4033_v16  ;;  %9189 = vst [vmem:[#allocation67_spill] sm:$0xff] %v8232_v27 }
 0x202   : > { %v8228_v1 = vpop.f32.mrf.mxu1  ;;  %4313 = vmatprep.mubr.bf16.mxu0 %v9024_v7  ;;  %v8237_v4 = vpop.f32.mrf.mxu0 }
 0x203   : > { %9188 = vst [vmem:[#allocation66_spill] sm:$0xff] %v8228_v1  ;;  %5494 = vmatmul.mubr.msk.bf16.gmra.mxu1 %vm2311_vm8, %v4063_v5  ;;  %9191 = vst [vmem:[#allocation69_spill] sm:$0xff] %v8237_v4 }
 0x204   : > { %v8235_v46 = vpop.f32.mrf.mxu1  ;;  %v8241_v17 = vpop.f32.mrf.mxu0 }
 0x205   : > { %9190 = vst [vmem:[#allocation68_spill] sm:$0xff] %v8235_v46  ;;  %9193 = vst [vmem:[#allocation71_spill] sm:$0xff] %v8241_v17 }
 0x206   : > { %v8239_v54 = vpop.f32.mrf.mxu1 }
 0x207   : > { %9192 = vst [vmem:[#allocation70_spill] sm:$0xff] %v8239_v54 }
 0x208   : > { %v8243_v60 = vpop.f32.mrf.mxu1  ;;  %v5433_v35 = vpop.f32.mrf.mxu0 }
 0x209   : > { %9194 = vst [vmem:[#allocation72_spill] sm:$0xff] %v8243_v60  ;;  %v8248_v16 = vadd.f32 %v5433_v35, %v8023_v55  ;;  %5290 = vmatmul.mubr.msk.bf16.gmra.mxu0 %vm2311_vm8, %v4048_v13 }
 0x20a   : > { %v8245_v1 = vpop.f32.mrf.mxu1  ;;  %v3024_v49 = vpop.f32.mrf.mxu0  ;;  %4323 = vmatprep.mubr.bf16.mxu0 %v9024_v7 }
 0x20b   : > { %v8255_v22 = vadd.f32 %v3024_v49, %v8035_v33 }
 0x20c   : > { %v8252_v46 = vpop.f32.mrf.mxu1  ;;  %v5434_v54 = vpop.f32.mrf.mxu0 }
 0x20d   : > { %v8260_v60 = vadd.f32 %v5434_v54, %v8039_v34 }
 0x20e   : > { %v8257_v28 = vpop.f32.mrf.mxu1  ;;  %v3027_v41 = vpop.f32.mrf.mxu0 }
 0x20f   : > { %v8265_v55 = vadd.f32 %v3027_v41, %v8047_v2 }
 0x210   : > { %v8262_v17 = vpop.f32.mrf.mxu1  ;;  %v5437_v13 = vpop.f32.mrf.mxu0 }
 0x211   : > { %v8270_v7 = vadd.f32 %v5437_v13, %v8055_v62  ;;  %5291 = vmatmul.mubr.msk.bf16.gmra.mxu0 %vm2311_vm8, %v4063_v5 }
 0x212   : > { %v8267_v35 = vpop.f32.mrf.mxu1  ;;  %v3040_v33 = vpop.f32.mrf.mxu0 }
 0x213   : > { %v8276_v34 = vadd.f32 %v3040_v33, %v8071_v8 }
 0x214   : > { %v8273_v49 = vpop.f32.mrf.mxu1  ;;  %v5438_v54 = vpop.f32.mrf.mxu0 }
 0x215   : > { %9195 = vst [vmem:[#allocation73_spill] sm:$0xff] %v8276_v34  ;;  %v8281_v2 = vadd.f32 %v5438_v54, %v8076_v0 }
 0x216   : > { %v8278_v15 = vpop.f32.mrf.mxu1  ;;  %v3043_v41 = vpop.f32.mrf.mxu0 }
 0x217   : > { %9196 = vst [vmem:[#allocation74_spill] sm:$0xff] %v8281_v2  ;;  %v8286_v62 = vadd.f32 %v3043_v41, %v8081_v26 }
 0x218   : > { %v8283_v4 = vpop.f32.mrf.mxu1  ;;  %v5441_v13 = vpop.f32.mrf.mxu0 }
 0x219   : > { %9197 = vst [vmem:[#allocation75_spill] sm:$0xff] %v8286_v62  ;;  %v8291_v58 = vadd.f32 %v5441_v13, %v8087_v57 }
 0x21a   : > { %v8288_v5 = vpop.f32.mrf.mxu1  ;;  %v3056_v8 = vpop.f32.mrf.mxu0 }
 0x21b   : > { %9198 = vst [vmem:[#allocation76_spill] sm:$0xff] %v8291_v58  ;;  %v8296_v27 = vadd.f32 %v3056_v8, %v8098_v51 }
 0x21c   : > { %v8293_v33 = vpop.f32.mrf.mxu1  ;;  %v5442_v0 = vpop.f32.mrf.mxu0 }
 0x21d   : > { %9199 = vst [vmem:[#allocation77_spill] sm:$0xff] %v8296_v27  ;;  %v8301_v3 = vadd.f32 %v5442_v0, %v8106_v25  ;;  %v4593_v27 = vlaneseq }
 0x21e   : > { %v8298_v54 = vpop.f32.mrf.mxu1  ;;  %v3059_v26 = vpop.f32.mrf.mxu0 }
 0x21f   : > { %9200 = vst [vmem:[#allocation78_spill] sm:$0xff] %v8301_v3  ;;  %v8306_v36 = vadd.f32 %v3059_v26, %v8117_v24  ;;  %v8392_v62 = vshrl.u32 %v4593_v27, 7 }
 0x220   : > { %v8303_v41 = vpop.f32.mrf.mxu1 }
 0x221   : > { %9201 = vst [vmem:[#allocation79_spill] sm:$0xff] %v8306_v36  ;;  %v4599_v27 = vsub.s32 1, %v8392_v62 }
 0x223   : > { %v8308_v57 = vpop.f32.mrf.mxu1 }
 0x225   : > { %v5445_v13 = vpop.f32.mrf.mxu0  ;;  %v8313_v51 = vpop.f32.mrf.mxu1 }
 0x226   : > { %v8311_v61 = vadd.f32 %v5445_v13, %v8127_v11 }
 0x227   : > { %v3072_v8 = vpop.f32.mrf.mxu0  ;;  %v8318_v25 = vpop.f32.mrf.mxu1 }
 0x228   : > { %9202 = vst [vmem:[#allocation80_spill] sm:$0xff] %v8311_v61  ;;  %v8316_v20 = vadd.f32 %v3072_v8, %v8138_v30 }
 0x229   : > { %v5446_v0 = vpop.f32.mrf.mxu0  ;;  %v8323_v24 = vpop.f32.mrf.mxu1 }
 0x22a   : > { %9203 = vst [vmem:[#allocation81_spill] sm:$0xff] %v8316_v20  ;;  %v8321_v14 = vadd.f32 %v5446_v0, %v8145_v59 }
 0x22b   : > { %v3075_v26 = vpop.f32.mrf.mxu0  ;;  %v8328_v11 = vpop.f32.mrf.mxu1 }
 0x22c   : > { %9204 = vst [vmem:[#allocation82_spill] sm:$0xff] %v8321_v14  ;;  %v8326_v19 = vadd.f32 %v3075_v26, %v8152_v6 }
 0x22d   : > { %v8330_v13 = vpop.f32.mrf.mxu1 }
 0x22e   : > { %9205 = vst [vmem:[#allocation83_spill] sm:$0xff] %v8326_v19 }
 0x22f   : > { %v8332_v50 = vpop.f32.mrf.mxu1 }
 0x231   : > { %v8334_v30 = vpop.f32.mrf.mxu0  ;;  %v8336_v8 = vpop.f32.mrf.mxu1 }
 0x232   : > { %9206 = vst [vmem:[#allocation84_spill] sm:$0xff] %v8334_v30 }
 0x233   : > { %v8338_v21 = vpop.f32.mrf.mxu0  ;;  %v8340_v59 = vpop.f32.mrf.mxu1 }
 0x234   : > { %9207 = vst [vmem:[#allocation85_spill] sm:$0xff] %v8338_v21 }
 0x235   : > { %v8342_v0 = vpop.f32.mrf.mxu0  ;;  %v8344_v14 = vpop.f32.mrf.mxu1 }
 0x236   : > { %9208 = vst [vmem:[#allocation86_spill] sm:$0xff] %v8342_v0 }
 0x237   : > { %v8346_v6 = vpop.f32.mrf.mxu1  ;;  %v8348_v26 = vpop.f32.mrf.mxu0 }
 0x238   : > { %9209 = vst [vmem:[#allocation87_spill] sm:$0xff] %v8348_v26 }
 0x239   : > { %v8350_v19 = vpop.f32.mrf.mxu1 }
 0x23b   : > { %v8352_v37 = vpop.f32.mrf.mxu1 }
 0x23c   : > { %v8354_v20 = vpop.f32.mrf.mxu0 }
 0x23d   : > { %9210 = vst [vmem:[#allocation88_spill] sm:$0xff] %v8354_v20  ;;  %v8356_v30 = vpop.f32.mrf.mxu1 }
 0x23e   : > { %v8358_v18 = vpop.f32.mrf.mxu0 }
 0x23f   : > { %9211 = vst [vmem:[#allocation89_spill] sm:$0xff] %v8358_v18  ;;  %v8360_v21 = vpop.f32.mrf.mxu1 }
 0x240   : > { %v8362_v10 = vpop.f32.mrf.mxu0 }
 0x241   : > { %9212 = vst [vmem:[#allocation90_spill] sm:$0xff] %v8362_v10  ;;  %v8364_v0 = vpop.f32.mrf.mxu1 }
 0x242   : > { %v8368_v36 = vpop.f32.mrf.mxu0 }
 0x243   : > { %v8366_v61 = vpop.f32.mrf.mxu1  ;;  %9213 = vst [vmem:[#allocation91_spill] sm:$0xff] %v8368_v36 }
 0x245   : > { %v8370_v26 = vpop.f32.mrf.mxu1  ;;  %v8374_v3 = vpop.f32.mrf.mxu0 }
 0x246   : > { %9214 = vst [vmem:[#allocation92_spill] sm:$0xff] %v8374_v3 }
 0x247   : > { %v8372_v45 = vpop.f32.mrf.mxu1  ;;  %v8378_v47 = vpop.f32.mrf.mxu0 }
 0x248   : > { %9215 = vst [vmem:[#allocation93_spill] sm:$0xff] %v8378_v47 }
 0x249   : > { %v8376_v20 = vpop.f32.mrf.mxu1  ;;  %v8382_v23 = vpop.f32.mrf.mxu0 }
 0x24a   : > { %9217 = vst [vmem:[#allocation95_spill] sm:$0xff] %v8382_v23  ;;  %v4595_v23 = vsub.s32 0, %v8392_v62 }
 0x24b   : > { %v8380_v18 = vpop.f32.mrf.mxu1  ;;  %v8388_v36 = vpop.f32.mrf.mxu0 }
 0x24c   : > { %9216 = vst [vmem:[#allocation94_spill] sm:$0xff] %v8380_v18  ;;  %9220 = vst [vmem:[#allocation98_spill] sm:$0xff] %v8388_v36  ;;  %v8410_v36 = vld [vmem:[%s8896_s2] sm:$0x7] }
 0x24d   : > { %v8384_v10 = vpop.f32.mrf.mxu1  ;;  %v8427_v2 = vrot.slane %v8410_v36, %v4599_v27 }
 0x24e   : > { %9218 = vst [vmem:[#allocation96_spill] sm:$0xff] %v8384_v10 }
 0x24f   : > { %v8386_v58 = vpop.f32.mrf.mxu1 }
 0x250   : > { %9219 = vst [vmem:[#allocation97_spill] sm:$0xff] %v8386_v58 }
 0x251   : > { %v8390_v63 = vpop.f32.mrf.mxu1  ;;  %v8396_v44 = vpop.f32.mrf.mxu0 }
 0x252   : > { %9221 = vst [vmem:[#allocation99_spill] sm:$0xff] %v8390_v63  ;;  %9223 = vst [vmem:[#allocation101_spill] sm:$0xff] %v8396_v44  ;;  %v2834_v63 = vadd.f32 %v8252_v46, %v7888_v12  ;;  %v2838_v12 = vadd.f32 %v8262_v17, %v7906_v32  ;;  %v2844_v32 = vadd.f32 %v8273_v49, %v7920_v52 }
 0x253   : > { %v8394_v3 = vpop.f32.mrf.mxu1  ;;  %v8400_v18 = vpop.f32.mrf.mxu0  ;;  %v2848_v49 = vadd.f32 %v8283_v4, %v7941_v56  ;;  %v2854_v4 = vadd.f32 %v8293_v33, %v7958_v42  ;;  %v2858_v33 = vadd.f32 %v8303_v41, %v7981_v31  ;;  %v9234_v41 = vld [vmem:[#allocation10_spill] sm:$0xff] }
 0x254   : > { %9222 = vst [vmem:[#allocation100_spill] sm:$0xff] %v8394_v3  ;;  %9225 = vst [vmem:[#allocation103_spill] sm:$0xff] %v8400_v18  ;;  %v2832_v18 = vadd.f32 %v8245_v1, %v7885_v43  ;;  %v2836_v43 = vadd.f32 %v8257_v28, %v7898_v29  ;;  %v2842_v29 = vadd.f32 %v8267_v35, %v7912_v39 }
 0x255   : > { %v8398_v47 = vpop.f32.mrf.mxu1  ;;  %v8405_v48 = vpop.f32.mrf.mxu0  ;;  %v2846_v35 = vadd.f32 %v8278_v15, %v7933_v53  ;;  %v2852_v15 = vadd.f32 %v8288_v5, %v7952_v9  ;;  %v2856_v5 = vadd.f32 %v8298_v54, %v7966_v38  ;;  %v9233_v54 = vld [vmem:[#allocation12_spill] sm:$0xff] }
 0x256   : > { %9224 = vst [vmem:[#allocation102_spill] sm:$0xff] %v8398_v47  ;;  %9227 = vst [vmem:[#allocation105_spill] sm:$0xff] %v8405_v48  ;;  %v8420_v47 = vrot.slane %v8410_v36, %v4595_v23 }
 0x257   : > { %v8403_v10 = vpop.f32.mrf.mxu1  ;;  %v8415_v44 = vpop.f32.mrf.mxu0 }
 0x258   : > { %9226 = vst [vmem:[#allocation104_spill] sm:$0xff] %v8403_v10  ;;  %9229 = vst [vmem:[#allocation107_spill] sm:$0xff] %v8415_v44 }
 0x259   : > { %v8413_v3 = vpop.f32.mrf.mxu1  ;;  %v4175_v48 = vpop.f32.mrf.mxu0 }
 0x25a   : > { %9228 = vst [vmem:[#allocation106_spill] sm:$0xff] %v8413_v3  ;;  %v4495_v58 = vadd.f32 %v4175_v48, %v2832_v18 }
 0x25b   : > { %v8422_v10 = vpop.f32.mrf.mxu1  ;;  %v4177_v44 = vpop.f32.mrf.mxu0 }
 0x25c   : > { %9230 = vst [vmem:[#allocation108_spill] sm:$0xff] %v8422_v10  ;;  %v4608_v23 = vadd.f32 %v8420_v47, %v4495_v58  ;;  %v4496_v1 = vadd.f32 %v4177_v44, %v2834_v63 }
 0x25d   : > { %v8429_v3 = vpop.f32.mrf.mxu1  ;;  %v4179_v10 = vpop.f32.mrf.mxu0 }
 0x25e   : > { %9231 = vst [vmem:[#allocation109_spill] sm:$0xff] %v8429_v3  ;;  %v4704_v48 = vmax.f32 %v4608_v23, 0.0  ;;  %v4609_v18 = vadd.f32 %v8427_v2, %v4496_v1  ;;  %v4498_v46 = vadd.f32 %v4179_v10, %v2836_v43 }
 0x25f   : > { %v8434_v34 = vpop.f32.mrf.mxu1  ;;  %v4181_v3 = vpop.f32.mrf.mxu0 }
 0x260   : > { %9232 = vst [vmem:[#allocation110_spill] sm:$0xff] %v8434_v34  ;;  %4800 = vst [vmem:[%s5936_s4] sm:$0xff] %v4704_v48  ;;  %v4705_v44 = vmax.f32 %v4609_v18, 0.0  ;;  %v4611_v63 = vadd.f32 %v8420_v47, %v4498_v46  ;;  %v4499_v58 = vadd.f32 %v4181_v3, %v2838_v12 }
 0x261   : > { %v8439_v27 = vpop.f32.mrf.mxu1  ;;  %v4185_v34 = vpop.f32.mrf.mxu0 }
 0x262   : > { %4801 = vst [vmem:[%s5936_s4 + $0x8] sm:$0xff] %v4705_v44  ;;  %v4707_v10 = vmax.f32 %v4611_v63, 0.0  ;;  %v4612_v17 = vadd.f32 %v8427_v2, %v4499_v58  ;;  %v4501_v43 = vadd.f32 %v4185_v34, %v2842_v29 }
 0x263   : > { %v8445_v28 = vpop.f32.mrf.mxu1  ;;  %v4187_v39 = vpop.f32.mrf.mxu0 }
 0x264   : > { %4803 = vst [vmem:[%s5936_s4 + $0x18] sm:$0xff] %v4707_v10  ;;  %v4708_v3 = vmax.f32 %v4612_v17, 0.0  ;;  %v4614_v1 = vadd.f32 %v8420_v47, %v4501_v43  ;;  %v4502_v12 = vadd.f32 %v4187_v39, %v2844_v32 }
 0x265   : > { %v8451_v23 = vpop.f32.mrf.mxu1  ;;  %v4189_v52 = vpop.f32.mrf.mxu0 }
 0x266   : > { %4804 = vst [vmem:[%s5936_s4 + $0x20] sm:$0xff] %v4708_v3  ;;  %v4710_v34 = vmax.f32 %v4614_v1, 0.0  ;;  %v4615_v18 = vadd.f32 %v8427_v2, %v4502_v12  ;;  %v4504_v46 = vadd.f32 %v4189_v52, %v2846_v35 }
 0x267   : > { %v8457_v48 = vpop.f32.mrf.mxu1  ;;  %v4191_v53 = vpop.f32.mrf.mxu0 }
 0x268   : > { %4806 = vst [vmem:[%s5936_s4 + $0x30] sm:$0xff] %v4710_v34  ;;  %v4711_v44 = vmax.f32 %v4615_v18, 0.0  ;;  %v4617_v63 = vadd.f32 %v8420_v47, %v4504_v46  ;;  %v4505_v58 = vadd.f32 %v4191_v53, %v2848_v49  ;;  %v2862_v46 = vadd.f32 %v8308_v57, %v9233_v54  ;;  %v9237_v54 = vld [vmem:[#allocation16_spill] sm:$0xff] }
 0x269   : > { %v8463_v29 = vpop.f32.mrf.mxu1  ;;  %v4195_v56 = vpop.f32.mrf.mxu0 }
 0x26a   : > { %4807 = vst [vmem:[%s5936_s4 + $0x38] sm:$0xff] %v4711_v44  ;;  %v4713_v10 = vmax.f32 %v4617_v63, 0.0  ;;  %v4618_v17 = vadd.f32 %v8427_v2, %v4505_v58  ;;  %v4507_v43 = vadd.f32 %v4195_v56, %v2852_v15  ;;  %v2864_v58 = vadd.f32 %v8313_v51, %v9234_v41  ;;  %v9238_v41 = vld [vmem:[#allocation32_spill] sm:$0xff] }
 0x26b   : > { %v8469_v32 = vpop.f32.mrf.mxu1  ;;  %v4197_v9 = vpop.f32.mrf.mxu0 }
 0x26c   : > { %4809 = vst [vmem:[%s5936_s4 + $0x48] sm:$0xff] %v4713_v10  ;;  %v4714_v35 = vmax.f32 %v4618_v17, 0.0  ;;  %v4620_v3 = vadd.f32 %v8420_v47, %v4507_v43  ;;  %v4508_v1 = vadd.f32 %v4197_v9, %v2854_v4  ;;  %v9235_v43 = vld [vmem:[#allocation29_spill] sm:$0xff] }
 0x26d   : > { %v8475_v39 = vpop.f32.mrf.mxu1  ;;  %v4199_v42 = vpop.f32.mrf.mxu0  ;;  %v2866_v9 = vadd.f32 %v8318_v25, %v9235_v43  ;;  %v9239_v43 = vld [vmem:[#allocation17_spill] sm:$0xff] }
 0x26e   : > { %4810 = vst [vmem:[%s5936_s4 + $0x50] sm:$0xff] %v4714_v35  ;;  %v4716_v52 = vmax.f32 %v4620_v3, 0.0  ;;  %v4621_v49 = vadd.f32 %v8427_v2, %v4508_v1  ;;  %v4510_v34 = vadd.f32 %v4199_v42, %v2856_v5  ;;  %v9236_v42 = vld [vmem:[#allocation14_spill] sm:$0xff] }
 0x26f   : > { %v8481_v12 = vpop.f32.mrf.mxu1  ;;  %v4201_v38 = vpop.f32.mrf.mxu0 }
 0x270   : > { %4812 = vst [vmem:[%s5936_s4 + $0x60] sm:$0xff] %v4716_v52  ;;  %v4717_v53 = vmax.f32 %v4621_v49, 0.0  ;;  %v4623_v15 = vadd.f32 %v8420_v47, %v4510_v34  ;;  %v4511_v44 = vadd.f32 %v4201_v38, %v2858_v33  ;;  %v2868_v33 = vadd.f32 %v8323_v24, %v9236_v42  ;;  %v9240_v42 = vld [vmem:[#allocation18_spill] sm:$0xff] }
 0x271   : > { %v8487_v18 = vpop.f32.mrf.mxu1  ;;  %v4205_v31 = vpop.f32.mrf.mxu0 }
 0x272   : > { %4813 = vst [vmem:[%s5936_s4 + $0x68] sm:$0xff] %v4717_v53  ;;  %v4719_v56 = vmax.f32 %v4623_v15, 0.0  ;;  %v4624_v4 = vadd.f32 %v8427_v2, %v4511_v44  ;;  %v4513_v10 = vadd.f32 %v4205_v31, %v2862_v46  ;;  %v2872_v46 = vadd.f32 %v8328_v11, %v9237_v54  ;;  %v9241_v54 = vld [vmem:[#allocation20_spill] sm:$0xff] }
 0x273   : > { %v8493_v63 = vpop.f32.mrf.mxu1  ;;  %v4207_v57 = vpop.f32.mrf.mxu0 }
 0x274   : > { %4815 = vst [vmem:[%s5936_s4 + $0x78] sm:$0xff] %v4719_v56  ;;  %v4720_v5 = vmax.f32 %v4624_v4, 0.0  ;;  %v4626_v35 = vadd.f32 %v8420_v47, %v4513_v10  ;;  %v4514_v3 = vadd.f32 %v4207_v57, %v2864_v58  ;;  %v2874_v58 = vadd.f32 %v8330_v13, %v9238_v41  ;;  %v9242_v41 = vld [vmem:[#allocation22_spill] sm:$0xff] }
 0x275   : > { %v8499_v17 = vpop.f32.mrf.mxu1  ;;  %v4209_v51 = vpop.f32.mrf.mxu0 }
 0x276   : > { %4816 = vst [vmem:[%s5936_s4 + $0x80] sm:$0xff] %v4720_v5  ;;  %v4722_v52 = vmax.f32 %v4626_v35, 0.0  ;;  %v4627_v49 = vadd.f32 %v8427_v2, %v4514_v3  ;;  %v4516_v34 = vadd.f32 %v4209_v51, %v2866_v9  ;;  %v2876_v9 = vadd.f32 %v8332_v50, %v9239_v43 }
 0x277   : > { %v8505_v1 = vpop.f32.mrf.mxu1  ;;  %v4211_v25 = vpop.f32.mrf.mxu0  ;;  %v4603_v43 = vsub.s32 2, %v8392_v62 }
 0x278   : > { %4818 = vst [vmem:[%s5936_s4 + $0x90] sm:$0xff] %v4722_v52  ;;  %v4723_v53 = vmax.f32 %v4627_v49, 0.0  ;;  %v4629_v15 = vadd.f32 %v8420_v47, %v4516_v34  ;;  %v4517_v44 = vadd.f32 %v4211_v25, %v2868_v33  ;;  %v2878_v33 = vadd.f32 %v8336_v8, %v9240_v42 }
 0x279   : > { %v8511_v38 = vpop.f32.mrf.mxu1  ;;  %v4215_v24 = vpop.f32.mrf.mxu0 }
 0x27a   : > { %4819 = vst [vmem:[%s5936_s4 + $0x98] sm:$0xff] %v4723_v53  ;;  %v4725_v56 = vmax.f32 %v4629_v15, 0.0  ;;  %v4630_v4 = vadd.f32 %v8427_v2, %v4517_v44  ;;  %v4519_v10 = vadd.f32 %v4215_v24, %v2872_v46  ;;  %v2882_v46 = vadd.f32 %v8340_v59, %v9241_v54 }
 0x27b   : > { %v8517_v31 = vpop.f32.mrf.mxu1  ;;  %v4217_v11 = vpop.f32.mrf.mxu0  ;;  %v8563_v54 = vrot.slane %v8410_v36, %v4603_v43 }
 0x27c   : > { %4821 = vst [vmem:[%s5936_s4 + $0xa8] sm:$0xff] %v4725_v56  ;;  %v4726_v5 = vmax.f32 %v4630_v4, 0.0  ;;  %v4632_v35 = vadd.f32 %v8420_v47, %v4519_v10  ;;  %v4520_v3 = vadd.f32 %v4217_v11, %v2874_v58  ;;  %v2884_v58 = vadd.f32 %v8344_v14, %v9242_v41 }
 0x27d   : > { %v8523_v57 = vpop.f32.mrf.mxu1  ;;  %v4219_v13 = vpop.f32.mrf.mxu0 }
 0x27e   : > { %4822 = vst [vmem:[%s5936_s4 + $0xb0] sm:$0xff] %v4726_v5  ;;  %v4728_v52 = vmax.f32 %v4632_v35, 0.0  ;;  %v4633_v49 = vadd.f32 %v8427_v2, %v4520_v3  ;;  %v4522_v34 = vadd.f32 %v4219_v13, %v2876_v9  ;;  %v9243_v9 = vld [vmem:[#allocation24_spill] sm:$0xff] }
 0x27f   : > { %v8529_v51 = vpop.f32.mrf.mxu1  ;;  %v4221_v50 = vpop.f32.mrf.mxu0  ;;  %v2886_v5 = vadd.f32 %v8346_v6, %v9243_v9 }
 0x280   : > { %4824 = vst [vmem:[%s5936_s4 + $0xc0] sm:$0xff] %v4728_v52  ;;  %v4729_v53 = vmax.f32 %v4633_v49, 0.0  ;;  %v4635_v15 = vadd.f32 %v8420_v47, %v4522_v34  ;;  %v4523_v44 = vadd.f32 %v4221_v50, %v2878_v33  ;;  %v9244_v33 = vld [vmem:[#allocation23_spill] sm:$0xff] }
 0x281   : > { %v8535_v25 = vpop.f32.mrf.mxu1  ;;  %v4225_v8 = vpop.f32.mrf.mxu0  ;;  %v2888_v52 = vadd.f32 %v8350_v19, %v9244_v33 }
 0x282   : > { %4825 = vst [vmem:[%s5936_s4 + $0xc8] sm:$0xff] %v4729_v53  ;;  %v4731_v56 = vmax.f32 %v4635_v15, 0.0  ;;  %v4636_v4 = vadd.f32 %v8427_v2, %v4523_v44  ;;  %v4525_v10 = vadd.f32 %v4225_v8, %v2882_v46  ;;  %v9245_v46 = vld [vmem:[#allocation26_spill] sm:$0xff]  ;;  %v9246_v8 = vld [vmem:[#allocation27_spill] sm:$0xff] }
 0x283   : > { %v8541_v24 = vpop.f32.mrf.mxu1  ;;  %v4227_v59 = vpop.f32.mrf.mxu0  ;;  %v2892_v53 = vadd.f32 %v8352_v37, %v9245_v46  ;;  %v2894_v41 = vadd.f32 %v8356_v30, %v9246_v8  ;;  %v9247_v37 = vld [vmem:[#allocation34_spill] sm:$0xff] }
 0x284   : > { %4827 = vst [vmem:[%s5936_s4 + $0xd8] sm:$0xff] %v4731_v56  ;;  %v4732_v35 = vmax.f32 %v4636_v4, 0.0  ;;  %v4638_v3 = vadd.f32 %v8420_v47, %v4525_v10  ;;  %v4526_v14 = vadd.f32 %v4227_v59, %v2884_v58  ;;  %v2896_v43 = vadd.f32 %v8360_v21, %v9247_v37  ;;  %v9249_v46 = vld [vmem:[#allocation38_spill] sm:$0xff] }
 0x285   : > { %v8547_v11 = vpop.f32.mrf.mxu1  ;;  %v4229_v42 = vpop.f32.mrf.mxu0 }
 0x286   : > { %4828 = vst [vmem:[%s5936_s4 + $0xe0] sm:$0xff] %v4732_v35  ;;  %v4734_v49 = vmax.f32 %v4638_v3, 0.0  ;;  %v4639_v62 = vadd.f32 %v8427_v2, %v4526_v14  ;;  %v4528_v34 = vadd.f32 %v4229_v42, %v2886_v5  ;;  %v9248_v42 = vld [vmem:[#allocation37_spill] sm:$0xff] }
 0x287   : > { %v8554_v13 = vpop.f32.mrf.mxu1  ;;  %v4231_v6 = vpop.f32.mrf.mxu0  ;;  %v2898_v33 = vadd.f32 %v8364_v0, %v9248_v42 }
 0x288   : > { %4830 = vst [vmem:[%s5936_s4 + $0xf0] sm:$0xff] %v4734_v49  ;;  %v4735_v15 = vmax.f32 %v4639_v62, 0.0  ;;  %v4641_v19 = vadd.f32 %v8420_v47, %v4528_v34  ;;  %v4529_v44 = vadd.f32 %v4231_v6, %v2888_v52 }
 0x289   : > { %v8560_v50 = vpop.f32.mrf.mxu1  ;;  %v4235_v58 = vpop.f32.mrf.mxu0 }
 0x28a   : > { %4831 = vst [vmem:[%s5936_s4 + $0xf8] sm:$0xff] %v4735_v15  ;;  %v4737_v4 = vmax.f32 %v4641_v19, 0.0  ;;  %v4642_v36 = vadd.f32 %v8427_v2, %v4529_v44  ;;  %v4531_v10 = vadd.f32 %v4235_v58, %v2892_v53  ;;  %v2902_v53 = vadd.f32 %v8366_v61, %v9249_v46 }
 0x28b   : > { %v5467_v56 = vpop.f32.mrf.mxu1  ;;  %v4237_v9 = vpop.f32.mrf.mxu0 }
 0x28c   : > { %v4503_v59 = vadd.f32 %v5467_v56, %v8248_v16  ;;  %4833 = vst [vmem:[%s5936_s4 + $0x108] sm:$0xff] %v4737_v4  ;;  %v4738_v35 = vmax.f32 %v4642_v36, 0.0  ;;  %v4644_v3 = vadd.f32 %v8420_v47, %v4531_v10  ;;  %v4532_v14 = vadd.f32 %v4237_v9, %v2894_v41  ;;  %v9250_v56 = vld [vmem:[#allocation39_spill] sm:$0xff] }
 0x28d   : > { %v4368_v5 = vpop.f32.mrf.mxu1  ;;  %v4239_v16 = vpop.f32.mrf.mxu0  ;;  %v2904_v4 = vadd.f32 %v8370_v26, %v9250_v56 }
 0x28e   : > { %v4616_v30 = vadd.f32 %v8563_v54, %v4503_v59  ;;  %v4497_v52 = vadd.f32 %v4368_v5, %v8255_v22  ;;  %4834 = vst [vmem:[%s5936_s4 + $0x110] sm:$0xff] %v4738_v35  ;;  %v4740_v21 = vmax.f32 %v4644_v3, 0.0  ;;  %v4645_v34 = vadd.f32 %v8427_v2, %v4532_v14  ;;  %v9251_v5 = vld [vmem:[#allocation40_spill] sm:$0xff] }
 0x28f   : > { %v5468_v49 = vpop.f32.mrf.mxu1  ;;  %v4534_v6 = vadd.f32 %v4239_v16, %v2896_v43  ;;  %v4241_v44 = vpop.f32.mrf.mxu0  ;;  %v2908_v16 = vadd.f32 %v8376_v20, %v8148_v40 }
 0x290   : > { %v4712_v62 = vmax.f32 %v4616_v30, 0.0  ;;  %v4610_v15 = vadd.f32 %v8563_v54, %v4497_v52  ;;  %v4506_v19 = vadd.f32 %v5468_v49, %v8260_v60  ;;  %4836 = vst [vmem:[%s5936_s4 + $0x120] sm:$0xff] %v4740_v21  ;;  %v4741_v22 = vmax.f32 %v4645_v34, 0.0  ;;  %v9252_v49 = vld [vmem:[#allocation73_spill] sm:$0xff] }
 0x291   : > { %v4371_v0 = vpop.f32.mrf.mxu1  ;;  %v4647_v8 = vadd.f32 %v8420_v47, %v4534_v6  ;;  %v4535_v41 = vadd.f32 %v4241_v44, %v2898_v33  ;;  %v4245_v10 = vpop.f32.mrf.mxu0  ;;  %v9255_v44 = vld [vmem:[#allocation94_spill] sm:$0xff] }
 0x292   : > { %4808 = vst [vmem:[%s5936_s4 + $0x40] sm:$0xff] %v4712_v62  ;;  %v4500_v58 = vadd.f32 %v4371_v0, %v8265_v55  ;;  %v4706_v61 = vmax.f32 %v4610_v15, 0.0  ;;  %v4619_v36 = vadd.f32 %v8563_v54, %v4506_v19  ;;  %4837 = vst [vmem:[%s5936_s4 + $0x128] sm:$0xff] %v4741_v22  ;;  %v4537_v9 = vadd.f32 %v4245_v10, %v2902_v53  ;;  %v9253_v53 = vld [vmem:[#allocation74_spill] sm:$0xff]  ;;  %v9254_v19 = vld [vmem:[#allocation41_spill] sm:$0xff] }
 0x293   : > { %v5471_v60 = vpop.f32.mrf.mxu1  ;;  %v4743_v59 = vmax.f32 %v4647_v8, 0.0  ;;  %v4648_v37 = vadd.f32 %v8427_v2, %v4535_v41  ;;  %v2906_v55 = vadd.f32 %v8372_v45, %v9251_v5  ;;  %v4247_v3 = vpop.f32.mrf.mxu0  ;;  %v2912_v40 = vadd.f32 %v9255_v44, %v9254_v19 }
 0x294   : > { %v4613_v43 = vadd.f32 %v8563_v54, %v4500_v58  ;;  %4802 = vst [vmem:[%s5936_s4 + $0x10] sm:$0xff] %v4706_v61  ;;  %v4715_v26 = vmax.f32 %v4619_v36, 0.0  ;;  %v4515_v35 = vadd.f32 %v5471_v60, %v8270_v7  ;;  %v4650_v33 = vadd.f32 %v8420_v47, %v4537_v9  ;;  %v9256_v61 = vld [vmem:[#allocation43_spill] sm:$0xff]  ;;  %v9257_v36 = vld [vmem:[#allocation96_spill] sm:$0xff] }
 0x295   : > { %v4384_v30 = vpop.f32.mrf.mxu1  ;;  %4839 = vst [vmem:[%s5936_s4 + $0x138] sm:$0xff] %v4743_v59  ;;  %v4744_v14 = vmax.f32 %v4648_v37, 0.0  ;;  %v4538_v52 = vadd.f32 %v4247_v3, %v2904_v4  ;;  %v4249_v62 = vpop.f32.mrf.mxu0  ;;  %v2914_v10 = vadd.f32 %v9257_v36, %v9256_v61  ;;  %v9258_v59 = vld [vmem:[#allocation75_spill] sm:$0xff]  ;;  %v9259_v3 = vld [vmem:[#allocation45_spill] sm:$0xff]  ;;  %v9267_v61 = vld [vmem:[#allocation78_spill] sm:$0xff] }
 0x296   : > { %v4709_v42 = vmax.f32 %v4613_v43, 0.0  ;;  %4811 = vst [vmem:[%s5936_s4 + $0x58] sm:$0xff] %v4715_v26  ;;  %v4628_v45 = vadd.f32 %v8563_v54, %v4515_v35  ;;  %v4509_v21 = vadd.f32 %v4384_v30, %v9252_v49  ;;  %v4746_v7 = vmax.f32 %v4650_v33, 0.0  ;;  %v9260_v30 = vld [vmem:[#allocation97_spill] sm:$0xff]  ;;  %v9261_v33 = vld [vmem:[#allocation76_spill] sm:$0xff] }
 0x297   : > { %v5472_v34 = vpop.f32.mrf.mxu1  ;;  %4840 = vst [vmem:[%s5936_s4 + $0x140] sm:$0xff] %v4744_v14  ;;  %v4651_v6 = vadd.f32 %v8427_v2, %v4538_v52  ;;  %v4540_v46 = vadd.f32 %v4249_v62, %v2906_v55  ;;  %v4251_v22 = vpop.f32.mrf.mxu0  ;;  %v2916_v14 = vadd.f32 %v9260_v30, %v9259_v3  ;;  %v9270_v3 = vld [vmem:[#allocation79_spill] sm:$0xff] }
 0x298   : > { %4805 = vst [vmem:[%s5936_s4 + $0x28] sm:$0xff] %v4709_v42  ;;  %v4518_v15 = vadd.f32 %v5472_v34, %v9253_v53  ;;  %v4724_v20 = vmax.f32 %v4628_v45, 0.0  ;;  %v4622_v0 = vadd.f32 %v8563_v54, %v4509_v21  ;;  %4842 = vst [vmem:[%s5936_s4 + $0x150] sm:$0xff] %v4746_v7  ;;  %v4541_v4 = vadd.f32 %v4251_v22, %v2908_v16  ;;  %v9262_v34 = vld [vmem:[#allocation77_spill] sm:$0xff] }
 0x299   : > { %v4387_v8 = vpop.f32.mrf.mxu1  ;;  %v4747_v41 = vmax.f32 %v4651_v6, 0.0  ;;  %v4653_v58 = vadd.f32 %v8420_v47, %v4540_v46  ;;  %v4255_v43 = vpop.f32.mrf.mxu0  ;;  %v9263_v6 = vld [vmem:[#allocation47_spill] sm:$0xff] }
 0x29a   : > { %v4631_v56 = vadd.f32 %v8563_v54, %v4518_v15  ;;  %4820 = vst [vmem:[%s5936_s4 + $0xa0] sm:$0xff] %v4724_v20  ;;  %v4718_v60 = vmax.f32 %v4622_v0, 0.0  ;;  %v4512_v37 = vadd.f32 %v4387_v8, %v9258_v59  ;;  %v4654_v26 = vadd.f32 %v8427_v2, %v4541_v4  ;;  %v9264_v46 = vld [vmem:[#allocation99_spill] sm:$0xff] }
 0x29b   : > { %v5475_v9 = vpop.f32.mrf.mxu1  ;;  %4843 = vst [vmem:[%s5936_s4 + $0x158] sm:$0xff] %v4747_v41  ;;  %v4749_v5 = vmax.f32 %v4653_v58, 0.0  ;;  %v4543_v35 = vadd.f32 %v4255_v43, %v2912_v40  ;;  %v4257_v16 = vpop.f32.mrf.mxu0  ;;  %v2918_v53 = vadd.f32 %v9264_v46, %v9263_v6  ;;  %v9265_v41 = vld [vmem:[#allocation49_spill] sm:$0xff]  ;;  %v9266_v58 = vld [vmem:[#allocation100_spill] sm:$0xff] }
 0x29c   : > { %v4727_v55 = vmax.f32 %v4631_v56, 0.0  ;;  %4814 = vst [vmem:[%s5936_s4 + $0x70] sm:$0xff] %v4718_v60  ;;  %v4625_v42 = vadd.f32 %v8563_v54, %v4512_v37  ;;  %v4527_v52 = vadd.f32 %v5475_v9, %v9261_v33  ;;  %v4750_v49 = vmax.f32 %v4654_v26, 0.0 }
 0x29d   : > { %v4400_v45 = vpop.f32.mrf.mxu1  ;;  %4845 = vst [vmem:[%s5936_s4 + $0x168] sm:$0xff] %v4749_v5  ;;  %v4656_v21 = vadd.f32 %v8420_v47, %v4543_v35  ;;  %v4544_v62 = vadd.f32 %v4257_v16, %v2914_v10  ;;  %v4259_v44 = vpop.f32.mrf.mxu0  ;;  %v2922_v56 = vadd.f32 %v9266_v58, %v9265_v41  ;;  %v9268_v5 = vld [vmem:[#allocation51_spill] sm:$0xff]  ;;  %v9276_v41 = vld [vmem:[#allocation81_spill] sm:$0xff] }
 0x29e   : > { %4823 = vst [vmem:[%s5936_s4 + $0xb8] sm:$0xff] %v4727_v55  ;;  %v4521_v7 = vadd.f32 %v4400_v45, %v9262_v34  ;;  %v4721_v15 = vmax.f32 %v4625_v42, 0.0  ;;  %v4640_v19 = vadd.f32 %v8563_v54, %v4527_v52  ;;  %4846 = vst [vmem:[%s5936_s4 + $0x170] sm:$0xff] %v4750_v49  ;;  %v4546_v8 = vadd.f32 %v4259_v44, %v2916_v14  ;;  %v9269_v55 = vld [vmem:[#allocation102_spill] sm:$0xff]  ;;  %v9271_v45 = vld [vmem:[#allocation80_spill] sm:$0xff] }
 0x29f   : > { %v5476_v40 = vpop.f32.mrf.mxu1  ;;  %v4752_v20 = vmax.f32 %v4656_v21, 0.0  ;;  %v4657_v0 = vadd.f32 %v8427_v2, %v4544_v62  ;;  %v4261_v10 = vpop.f32.mrf.mxu0  ;;  %v2924_v26 = vadd.f32 %v9269_v55, %v9268_v5  ;;  %v9272_v21 = vld [vmem:[#allocation53_spill] sm:$0xff]  ;;  %v9273_v62 = vld [vmem:[#allocation104_spill] sm:$0xff] }
 0x2a0   : > { %v4634_v22 = vadd.f32 %v8563_v54, %v4521_v7  ;;  %4817 = vst [vmem:[%s5936_s4 + $0x88] sm:$0xff] %v4721_v15  ;;  %v4736_v4 = vmax.f32 %v4640_v19, 0.0  ;;  %v4530_v36 = vadd.f32 %v5476_v40, %v9267_v61  ;;  %v4659_v43 = vadd.f32 %v8420_v47, %v4546_v8  ;;  %v9280_v5 = vld [vmem:[#allocation108_spill] sm:$0xff] }
 0x2a1   : > { %v4403_v60 = vpop.f32.mrf.mxu1  ;;  %4848 = vst [vmem:[%s5936_s4 + $0x180] sm:$0xff] %v4752_v20  ;;  %v4753_v59 = vmax.f32 %v4657_v0, 0.0  ;;  %v4547_v9 = vadd.f32 %v4261_v10, %v2918_v53  ;;  %v4265_v14 = vpop.f32.mrf.mxu0  ;;  %v2926_v34 = vadd.f32 %v9273_v62, %v9272_v21  ;;  %v9274_v20 = vld [vmem:[#allocation55_spill] sm:$0xff]  ;;  %v9275_v0 = vld [vmem:[#allocation106_spill] sm:$0xff]  ;;  %v9284_v21 = vld [vmem:[#allocation85_spill] sm:$0xff] }
 0x2a2   : > { %v4730_v37 = vmax.f32 %v4634_v22, 0.0  ;;  %4832 = vst [vmem:[%s5936_s4 + $0x100] sm:$0xff] %v4736_v4  ;;  %v4643_v35 = vadd.f32 %v8563_v54, %v4530_v36  ;;  %v4524_v30 = vadd.f32 %v4403_v60, %v9270_v3  ;;  %v4755_v33 = vmax.f32 %v4659_v43, 0.0 }
 0x2a3   : > { %v5479_v42 = vpop.f32.mrf.mxu1  ;;  %4849 = vst [vmem:[%s5936_s4 + $0x188] sm:$0xff] %v4753_v59  ;;  %v4660_v52 = vadd.f32 %v8427_v2, %v4547_v9  ;;  %v4549_v16 = vadd.f32 %v4265_v14, %v2922_v56  ;;  %v4267_v46 = vpop.f32.mrf.mxu0  ;;  %v2928_v22 = vadd.f32 %v9275_v0, %v9274_v20  ;;  %v9277_v59 = vld [vmem:[#allocation42_spill] sm:$0xff]  ;;  %v9279_v9 = vld [vmem:[#allocation57_spill] sm:$0xff] }
 0x2a4   : > { %4826 = vst [vmem:[%s5936_s4 + $0xd0] sm:$0xff] %v4730_v37  ;;  %v4539_v49 = vadd.f32 %v5479_v42, %v9271_v45  ;;  %v4739_v7 = vmax.f32 %v4643_v35, 0.0  ;;  %v4637_v6 = vadd.f32 %v8563_v54, %v4524_v30  ;;  %4851 = vst [vmem:[%s5936_s4 + $0x198] sm:$0xff] %v4755_v33  ;;  %v4550_v40 = vadd.f32 %v4267_v46, %v2924_v26  ;;  %v9278_v37 = vld [vmem:[#allocation84_spill] sm:$0xff]  ;;  %v9281_v35 = vld [vmem:[#allocation82_spill] sm:$0xff] }
 0x2a5   : > { %v4416_v53 = vpop.f32.mrf.mxu1  ;;  %v4756_v15 = vmax.f32 %v4660_v52, 0.0  ;;  %v4662_v19 = vadd.f32 %v8420_v47, %v4549_v16  ;;  %v4269_v56 = vpop.f32.mrf.mxu0  ;;  %v3097_v43 = vadd.f32 %v9278_v37, %v9277_v59  ;;  %v2932_v55 = vadd.f32 %v9280_v5, %v9279_v9  ;;  %v9282_v16 = vld [vmem:[#allocation83_spill] sm:$0xff] }
 0x2a6   : > { %v4652_v44 = vadd.f32 %v8563_v54, %v4539_v49  ;;  %4835 = vst [vmem:[%s5936_s4 + $0x118] sm:$0xff] %v4739_v7  ;;  %v4733_v8 = vmax.f32 %v4637_v6, 0.0  ;;  %v4533_v58 = vadd.f32 %v4416_v53, %v9276_v41  ;;  %v4663_v10 = vadd.f32 %v8427_v2, %v4550_v40  ;;  %v9283_v49 = vld [vmem:[#allocation44_spill] sm:$0xff]  ;;  %v9286_v7 = vld [vmem:[#allocation109_spill] sm:$0xff] }
 0x2a7   : > { %v5480_v4 = vpop.f32.mrf.mxu1  ;;  %4852 = vst [vmem:[%s5936_s4 + $0x1a0] sm:$0xff] %v4756_v15  ;;  %v4758_v61 = vmax.f32 %v4662_v19, 0.0  ;;  %v4552_v60 = vadd.f32 %v4269_v56, %v2926_v34  ;;  %v4271_v30 = vpop.f32.mrf.mxu0  ;;  %v3089_v62 = vadd.f32 %v9284_v21, %v9283_v49  ;;  %v9285_v34 = vld [vmem:[#allocation59_spill] sm:$0xff]  ;;  %v9290_v56 = vld [vmem:[#allocation110_spill] sm:$0xff] }
 0x2a8   : > { %v4748_v36 = vmax.f32 %v4652_v44, 0.0  ;;  %4829 = vst [vmem:[%s5936_s4 + $0xe8] sm:$0xff] %v4733_v8  ;;  %v4646_v26 = vadd.f32 %v8563_v54, %v4533_v58  ;;  %v4542_v3 = vadd.f32 %v5480_v4, %v9281_v35  ;;  %v4759_v42 = vmax.f32 %v4663_v10, 0.0  ;;  %v9288_v8 = vld [vmem:[#allocation86_spill] sm:$0xff]  ;;  %v9289_v58 = vld [vmem:[#allocation61_spill] sm:$0xff] }
 0x2a9   : > { %v4419_v14 = vpop.f32.mrf.mxu1  ;;  %4854 = vst [vmem:[%s5936_s4 + $0x1b0] sm:$0xff] %v4758_v61  ;;  %v4665_v33 = vadd.f32 %v8420_v47, %v4552_v60  ;;  %v4553_v52 = vadd.f32 %v4271_v30, %v2928_v22  ;;  %v2934_v6 = vadd.f32 %v9286_v7, %v9285_v34  ;;  %v4275_v15 = vpop.f32.mrf.mxu0  ;;  %v9287_v22 = vld [vmem:[#allocation46_spill] sm:$0xff]  ;;  %v2936_v4 = vadd.f32 %v9290_v56, %v9289_v58  ;;  %v9295_v34 = vld [vmem:[#allocation88_spill] sm:$0xff] }
 0x2aa   : > { %4844 = vst [vmem:[%s5936_s4 + $0x160] sm:$0xff] %v4748_v36  ;;  %v4536_v45 = vadd.f32 %v4419_v14, %v9282_v16  ;;  %v4742_v46 = vmax.f32 %v4646_v26, 0.0  ;;  %v4655_v53 = vadd.f32 %v8563_v54, %v4542_v3  ;;  %4855 = vst [vmem:[%s5936_s4 + $0x1b8] sm:$0xff] %v4759_v42  ;;  %v4555_v0 = vadd.f32 %v4275_v15, %v2932_v55  ;;  %v9291_v55 = vld [vmem:[#allocation48_spill] sm:$0xff]  ;;  %v9292_v26 = vld [vmem:[#allocation87_spill] sm:$0xff] }
 0x2ab   : > { %v5483_v19 = vpop.f32.mrf.mxu1  ;;  %v4761_v44 = vmax.f32 %v4665_v33, 0.0  ;;  %v4666_v40 = vadd.f32 %v8427_v2, %v4553_v52  ;;  %v3100_v41 = vadd.f32 %v9288_v8, %v9287_v22  ;;  %v4277_v10 = vpop.f32.mrf.mxu0  ;;  %v3092_v35 = vadd.f32 %v9292_v26, %v9291_v55  ;;  %v9293_v3 = vld [vmem:[#allocation63_spill] sm:$0xff]  ;;  %v9294_v21 = vld [vmem:[#allocation50_spill] sm:$0xff]  ;;  %v9298_v22 = vld [vmem:[#allocation89_spill] sm:$0xff] }
 0x2ac   : > { %v4649_v20 = vadd.f32 %v8563_v54, %v4536_v45  ;;  %4838 = vst [vmem:[%s5936_s4 + $0x130] sm:$0xff] %v4742_v46  ;;  %v4751_v61 = vmax.f32 %v4655_v53, 0.0  ;;  %v4551_v36 = vadd.f32 %v5483_v19, %v3097_v43  ;;  %v4668_v9 = vadd.f32 %v8420_v47, %v4555_v0  ;;  %v9297_v0 = vld [vmem:[#allocation52_spill] sm:$0xff]  ;;  %v9302_v55 = vld [vmem:[#allocation69_spill] sm:$0xff] }
 0x2ad   : > { %v4432_v60 = vpop.f32.mrf.mxu1  ;;  %4857 = vst [vmem:[%s5936_s4 + $0x1c8] sm:$0xff] %v4761_v44  ;;  %v4762_v59 = vmax.f32 %v4666_v40, 0.0  ;;  %v4556_v5 = vadd.f32 %v4277_v10, %v2934_v6  ;;  %v2938_v30 = vadd.f32 %v8439_v27, %v9293_v3  ;;  %v4279_v42 = vpop.f32.mrf.mxu0  ;;  %v3113_v7 = vadd.f32 %v9295_v34, %v9294_v21  ;;  %v9296_v6 = vld [vmem:[#allocation65_spill] sm:$0xff] }
 0x2ae   : > { %v4745_v37 = vmax.f32 %v4649_v20, 0.0  ;;  %4847 = vst [vmem:[%s5936_s4 + $0x178] sm:$0xff] %v4751_v61  ;;  %v4664_v14 = vadd.f32 %v8563_v54, %v4551_v36  ;;  %v4545_v43 = vadd.f32 %v4432_v60, %v3089_v62  ;;  %v4764_v52 = vmax.f32 %v4668_v9, 0.0  ;;  %v9301_v9 = vld [vmem:[#allocation90_spill] sm:$0xff] }
 0x2af   : > { %v5484_v33 = vpop.f32.mrf.mxu1  ;;  %4858 = vst [vmem:[%s5936_s4 + $0x1d0] sm:$0xff] %v4762_v59  ;;  %v4669_v16 = vadd.f32 %v8427_v2, %v4556_v5  ;;  %v4558_v45 = vadd.f32 %v4279_v42, %v2936_v4  ;;  %v2942_v27 = vadd.f32 %v8445_v28, %v9296_v6  ;;  %v4281_v53 = vpop.f32.mrf.mxu0  ;;  %v3105_v8 = vadd.f32 %v9298_v22, %v9297_v0 }
 0x2b0   : > { %4841 = vst [vmem:[%s5936_s4 + $0x148] sm:$0xff] %v4745_v37  ;;  %v4554_v49 = vadd.f32 %v5484_v33, %v3100_v41  ;;  %v4760_v46 = vmax.f32 %v4664_v14, 0.0  ;;  %v4658_v62 = vadd.f32 %v8563_v54, %v4545_v43  ;;  %4860 = vst [vmem:[%s5936_s4 + $0x1e0] sm:$0xff] %v4764_v52  ;;  %v4559_v20 = vadd.f32 %v4281_v53, %v2938_v30  ;;  %v9299_v41 = vld [vmem:[#allocation67_spill] sm:$0xff]  ;;  %v9300_v37 = vld [vmem:[#allocation54_spill] sm:$0xff] }
 0x2b1   : > { %v4435_v15 = vpop.f32.mrf.mxu1  ;;  %v4765_v19 = vmax.f32 %v4669_v16, 0.0  ;;  %v4671_v44 = vadd.f32 %v8420_v47, %v4558_v45  ;;  %v2944_v28 = vadd.f32 %v8451_v23, %v9299_v41  ;;  %v4285_v4 = vpop.f32.mrf.mxu0  ;;  %v3116_v5 = vadd.f32 %v9301_v9, %v9300_v37  ;;  %v9303_v52 = vld [vmem:[#allocation56_spill] sm:$0xff]  ;;  %v9304_v16 = vld [vmem:[#allocation91_spill] sm:$0xff] }
 0x2b2   : > { %v4667_v40 = vadd.f32 %v8563_v54, %v4554_v49  ;;  %4856 = vst [vmem:[%s5936_s4 + $0x1c0] sm:$0xff] %v4760_v46  ;;  %v4754_v58 = vmax.f32 %v4658_v62, 0.0  ;;  %v4548_v56 = vadd.f32 %v4435_v15, %v3092_v35  ;;  %v4672_v60 = vadd.f32 %v8427_v2, %v4559_v20  ;;  %v9305_v49 = vld [vmem:[#allocation71_spill] sm:$0xff]  ;;  %v9306_v15 = vld [vmem:[#allocation58_spill] sm:$0xff] }
 0x2b3   : > { %v5487_v61 = vpop.f32.mrf.mxu1  ;;  %4861 = vst [vmem:[%s5936_s4 + $0x1e8] sm:$0xff] %v4765_v19  ;;  %v4767_v36 = vmax.f32 %v4671_v44, 0.0  ;;  %v4561_v59 = vadd.f32 %v4285_v4, %v2942_v27  ;;  %v2946_v26 = vadd.f32 %v8457_v48, %v9302_v55  ;;  %v4287_v3 = vpop.f32.mrf.mxu0  ;;  %v3108_v45 = vadd.f32 %v9304_v16, %v9303_v52  ;;  %v9307_v19 = vld [vmem:[#allocation92_spill] sm:$0xff] }
 0x2b4   : > { %v4763_v10 = vmax.f32 %v4667_v40, 0.0  ;;  %4850 = vst [vmem:[%s5936_s4 + $0x190] sm:$0xff] %v4754_v58  ;;  %v4661_v23 = vadd.f32 %v8563_v54, %v4548_v56  ;;  %v4563_v35 = vadd.f32 %v5487_v61, %v3113_v7  ;;  %v4768_v14 = vmax.f32 %v4672_v60, 0.0  ;;  %v9308_v40 = vld [vmem:[#allocation33_spill] sm:$0xff]  ;;  %v9309_v4 = vld [vmem:[#allocation60_spill] sm:$0xff] }
 0x2b5   : > { %v4448_v30 = vpop.f32.mrf.mxu1  ;;  %4863 = vst [vmem:[%s5936_s4 + $0x1f8] sm:$0xff] %v4767_v36  ;;  %v4674_v43 = vadd.f32 %v8420_v47, %v4561_v59  ;;  %v4562_v42 = vadd.f32 %v4287_v3, %v2944_v28  ;;  %v2948_v48 = vadd.f32 %v8463_v29, %v9305_v49  ;;  %v4289_v7 = vpop.f32.mrf.mxu0  ;;  %v3129_v44 = vadd.f32 %v9307_v19, %v9306_v15  ;;  %v9310_v61 = vld [vmem:[#allocation93_spill] sm:$0xff]  ;;  %v9313_v3 = vld [vmem:[#allocation95_spill] sm:$0xff] }
 0x2b6   : > { %4859 = vst [vmem:[%s5936_s4 + $0x1d8] sm:$0xff] %v4763_v10  ;;  %v4557_v33 = vadd.f32 %v4448_v30, %v3105_v8  ;;  %v4757_v21 = vmax.f32 %v4661_v23, 0.0  ;;  %v4676_v34 = vadd.f32 %v8563_v54, %v4563_v35  ;;  %4864 = vst [vmem:[%s5936_s4 + $0x200] sm:$0xff] %v4768_v14  ;;  %v4564_v53 = vadd.f32 %v4289_v7, %v2946_v26  ;;  %v9311_v10 = vld [vmem:[#allocation6_spill] sm:$0xff]  ;;  %v9314_v14 = vld [vmem:[#allocation7_spill] sm:$0xff] }
 0x2b7   : > { %v5488_v6 = vpop.f32.mrf.mxu1  ;;  %v4770_v27 = vmax.f32 %v4674_v43, 0.0  ;;  %v4675_v46 = vadd.f32 %v8427_v2, %v4562_v42  ;;  %v2952_v29 = vadd.f32 %v8469_v32, %v9308_v40  ;;  %v4291_v22 = vpop.f32.mrf.mxu0  ;;  %v3121_v36 = vadd.f32 %v9310_v61, %v9309_v4  ;;  %v9312_v35 = vld [vmem:[#allocation62_spill] sm:$0xff] }
 0x2b8   : > { %v4670_v62 = vadd.f32 %v8563_v54, %v4557_v33  ;;  %4853 = vst [vmem:[%s5936_s4 + $0x1a8] sm:$0xff] %v4757_v21  ;;  %v4772_v20 = vmax.f32 %v4676_v34, 0.0  ;;  %v4566_v0 = vadd.f32 %v5488_v6, %v3116_v5  ;;  %v4677_v58 = vadd.f32 %v8420_v47, %v4564_v53  ;;  %v9315_v21 = vld [vmem:[#allocation64_spill] sm:$0xff]  ;;  %v9316_v34 = vld [vmem:[#allocation98_spill] sm:$0xff]  ;;  %v9317_v6 = vld [vmem:[#allocation35_spill] sm:$0xff] }
 0x2b9   : > { %v4451_v8 = vpop.f32.mrf.mxu1  ;;  %4866 = vst [vmem:[%s5936_s4 + $0x210] sm:$0xff] %v4770_v27  ;;  %v4771_v41 = vmax.f32 %v4675_v46, 0.0  ;;  %v4565_v56 = vadd.f32 %v4291_v22, %v2948_v48  ;;  %v2954_v60 = vadd.f32 %v8475_v39, %v9311_v10  ;;  %v4295_v37 = vpop.f32.mrf.mxu0  ;;  %v3132_v30 = vadd.f32 %v9313_v3, %v9312_v35  ;;  %v9320_v22 = vld [vmem:[#allocation8_spill] sm:$0xff] }
 0x2ba   : > { %v4766_v28 = vmax.f32 %v4670_v62, 0.0  ;;  %4868 = vst [vmem:[%s5936_s4 + $0x220] sm:$0xff] %v4772_v20  ;;  %v4679_v32 = vadd.f32 %v8563_v54, %v4566_v0  ;;  %v4560_v59 = vadd.f32 %v4451_v8, %v3108_v45  ;;  %v4773_v5 = vmax.f32 %v4677_v58, 0.0  ;;  %v9319_v20 = vld [vmem:[#allocation101_spill] sm:$0xff]  ;;  %v9321_v10 = vld [vmem:[#allocation68_spill] sm:$0xff] }
 0x2bb   : > { %v5491_v9 = vpop.f32.mrf.mxu1  ;;  %4867 = vst [vmem:[%s5936_s4 + $0x218] sm:$0xff] %v4771_v41  ;;  %v4678_v55 = vadd.f32 %v8427_v2, %v4565_v56  ;;  %v4567_v26 = vadd.f32 %v4295_v37, %v2952_v29  ;;  %v2956_v39 = vadd.f32 %v8481_v12, %v9314_v14  ;;  %v4297_v33 = vpop.f32.mrf.mxu0  ;;  %v3124_v7 = vadd.f32 %v9316_v34, %v9315_v21  ;;  %v9318_v29 = vld [vmem:[#allocation66_spill] sm:$0xff]  ;;  %v9325_v14 = vld [vmem:[#allocation105_spill] sm:$0xff] }
 0x2bc   : > { %4862 = vst [vmem:[%s5936_s4 + $0x1f0] sm:$0xff] %v4766_v28  ;;  %v4575_v23 = vadd.f32 %v5491_v9, %v3129_v44  ;;  %v4775_v43 = vmax.f32 %v4679_v32, 0.0  ;;  %v4673_v42 = vadd.f32 %v8563_v54, %v4560_v59  ;;  %4869 = vst [vmem:[%s5936_s4 + $0x228] sm:$0xff] %v4773_v5  ;;  %v4568_v48 = vadd.f32 %v4297_v33, %v2954_v60  ;;  %v9322_v60 = vld [vmem:[#allocation103_spill] sm:$0xff]  ;;  %v9323_v59 = vld [vmem:[#allocation25_spill] sm:$0xff] }
 0x2bd   : > { %v4464_v52 = vpop.f32.mrf.mxu1  ;;  %v4774_v16 = vmax.f32 %v4678_v55, 0.0  ;;  %v4680_v45 = vadd.f32 %v8420_v47, %v4567_v26  ;;  %v2958_v12 = vadd.f32 %v8487_v18, %v9317_v6  ;;  %v4299_v62 = vpop.f32.mrf.mxu0  ;;  %v3145_v0 = vadd.f32 %v9319_v20, %v9318_v29  ;;  %v9327_v34 = vld [vmem:[#allocation9_spill] sm:$0xff]  ;;  %v9330_v29 = vld [vmem:[#allocation28_spill] sm:$0xff] }
 0x2be   : > { %v4688_v49 = vadd.f32 %v8563_v54, %v4575_v23  ;;  %4871 = vst [vmem:[%s5936_s4 + $0x238] sm:$0xff] %v4775_v43  ;;  %v4769_v27 = vmax.f32 %v4673_v42, 0.0  ;;  %v4569_v46 = vadd.f32 %v4464_v52, %v3121_v36  ;;  %v4681_v44 = vadd.f32 %v8427_v2, %v4568_v48  ;;  %v9326_v43 = vld [vmem:[#allocation36_spill] sm:$0xff] }
 0x2bf   : > { %v5492_v53 = vpop.f32.mrf.mxu1  ;;  %4870 = vst [vmem:[%s5936_s4 + $0x230] sm:$0xff] %v4774_v16  ;;  %v4776_v15 = vmax.f32 %v4680_v45, 0.0  ;;  %v4570_v40 = vadd.f32 %v4299_v62, %v2956_v39  ;;  %v2962_v8 = vadd.f32 %v8493_v63, %v9320_v22  ;;  %v4301_v28 = vpop.f32.mrf.mxu0  ;;  %v3137_v32 = vadd.f32 %v9322_v60, %v9321_v10 }
 0x2c0   : > { %v4784_v19 = vmax.f32 %v4688_v49, 0.0  ;;  %4865 = vst [vmem:[%s5936_s4 + $0x208] sm:$0xff] %v4769_v27  ;;  %v4682_v18 = vadd.f32 %v8563_v54, %v4569_v46  ;;  %v4578_v41 = vadd.f32 %v5492_v53, %v3132_v30  ;;  %v4777_v56 = vmax.f32 %v4681_v44, 0.0  ;;  %v9324_v30 = vld [vmem:[#allocation70_spill] sm:$0xff]  ;;  %v9329_v44 = vld [vmem:[#allocation107_spill] sm:$0xff] }
 0x2c1   : > { %v4467_v58 = vpop.f32.mrf.mxu1  ;;  %4872 = vst [vmem:[%s5936_s4 + $0x240] sm:$0xff] %v4776_v15  ;;  %v4683_v4 = vadd.f32 %v8420_v47, %v4570_v40  ;;  %v4571_v61 = vadd.f32 %v4301_v28, %v2958_v12  ;;  %v2964_v63 = vadd.f32 %v8499_v17, %v9323_v59  ;;  %v4305_v5 = vpop.f32.mrf.mxu0  ;;  %v3148_v39 = vadd.f32 %v9325_v14, %v9324_v30 }
 0x2c2   : > { %4880 = vst [vmem:[%s5936_s4 + $0x280] sm:$0xff] %v4784_v19  ;;  %v4572_v36 = vadd.f32 %v4467_v58, %v3124_v7  ;;  %v4778_v37 = vmax.f32 %v4682_v18, 0.0  ;;  %v4691_v9 = vadd.f32 %v8563_v54, %v4578_v41  ;;  %4873 = vst [vmem:[%s5936_s4 + $0x248] sm:$0xff] %v4777_v56  ;;  %v4573_v3 = vadd.f32 %v4305_v5, %v2962_v8  ;;  %v9328_v19 = vld [vmem:[#allocation72_spill] sm:$0xff]  ;;  %v9331_v56 = vld [vmem:[#allocation31_spill] sm:$0xff] }
 0x2c3   : > { %v5495_v55 = vpop.f32.mrf.mxu1  ;;  %v4779_v26 = vmax.f32 %v4683_v4, 0.0  ;;  %v4684_v23 = vadd.f32 %v8427_v2, %v4571_v61  ;;  %v2966_v17 = vadd.f32 %v8505_v1, %v9326_v43  ;;  %v4307_v52 = vpop.f32.mrf.mxu0  ;;  %v2968_v7 = vadd.f32 %v8511_v38, %v9327_v34  ;;  %v9334_v43 = vld [vmem:[#allocation11_spill] sm:$0xff] }
 0x2c4   : > { %v4685_v35 = vadd.f32 %v8563_v54, %v4572_v36  ;;  %4874 = vst [vmem:[%s5936_s4 + $0x250] sm:$0xff] %v4778_v37  ;;  %v4787_v42 = vmax.f32 %v4691_v9, 0.0  ;;  %v4587_v33 = vadd.f32 %v5495_v55, %v3145_v0  ;;  %v4686_v48 = vadd.f32 %v8420_v47, %v4573_v3  ;;  %v9332_v9 = vld [vmem:[#allocation19_spill] sm:$0xff]  ;;  %v9333_v3 = vld [vmem:[#allocation21_spill] sm:$0xff] }
 0x2c5   : > { %v4480_v16 = vpop.f32.mrf.mxu1  ;;  %4875 = vst [vmem:[%s5936_s4 + $0x258] sm:$0xff] %v4779_v26  ;;  %v4780_v45 = vmax.f32 %v4684_v23, 0.0  ;;  %v4574_v21 = vadd.f32 %v4307_v52, %v2964_v63  ;;  %v4309_v12 = vpop.f32.mrf.mxu0  ;;  %v3140_v40 = vadd.f32 %v9329_v44, %v9328_v19  ;;  %v2972_v38 = vadd.f32 %v8517_v31, %v9330_v29 }
 0x2c6   : > { %v4781_v49 = vmax.f32 %v4685_v35, 0.0  ;;  %4883 = vst [vmem:[%s5936_s4 + $0x298] sm:$0xff] %v4787_v42  ;;  %v4700_v6 = vadd.f32 %v8563_v54, %v4587_v33  ;;  %v4581_v1 = vadd.f32 %v4480_v16, %v3137_v32  ;;  %v4782_v46 = vmax.f32 %v4686_v48, 0.0 }
 0x2c7   : > { %v5496_v27 = vpop.f32.mrf.mxu1  ;;  %4876 = vst [vmem:[%s5936_s4 + $0x260] sm:$0xff] %v4780_v45  ;;  %v4687_v62 = vadd.f32 %v8427_v2, %v4574_v21  ;;  %v4576_v53 = vadd.f32 %v4309_v12, %v2966_v17  ;;  %v4311_v22 = vpop.f32.mrf.mxu0  ;;  %v2974_v4 = vadd.f32 %v8523_v57, %v9331_v56  ;;  %v2976_v5 = vadd.f32 %v8529_v51, %v9332_v9  ;;  %v9335_v45 = vld [vmem:[#allocation30_spill] sm:$0xff] }
 0x2c8   : > { %4877 = vst [vmem:[%s5936_s4 + $0x268] sm:$0xff] %v4781_v49  ;;  %v4590_v15 = vadd.f32 %v5496_v27, %v3148_v39  ;;  %v4796_v20 = vmax.f32 %v4700_v6, 0.0  ;;  %v4694_v0 = vadd.f32 %v8563_v54, %v4581_v1  ;;  %4878 = vst [vmem:[%s5936_s4 + $0x270] sm:$0xff] %v4782_v46  ;;  %v4577_v58 = vadd.f32 %v4311_v22, %v2968_v7  ;;  %v9336_v7 = vld [vmem:[#allocation13_spill] sm:$0xff] }
 0x2c9   : > { %v4483_v8 = vpop.f32.mrf.mxu1  ;;  %v4783_v18 = vmax.f32 %v4687_v62, 0.0  ;;  %v4689_v41 = vadd.f32 %v8420_v47, %v4576_v53  ;;  %v4315_v36 = vpop.f32.mrf.mxu0  ;;  %v2978_v30 = vadd.f32 %v8535_v25, %v9333_v3  ;;  %v2982_v17 = vadd.f32 %v8541_v24, %v9334_v43 }
 0x2ca   : > { %v4703_v28 = vadd.f32 %v8563_v54, %v4590_v15  ;;  %4892 = vst [vmem:[%s5936_s4 + $0x2e0] sm:$0xff] %v4796_v20  ;;  %v4790_v31 = vmax.f32 %v4694_v0, 0.0  ;;  %v4584_v61 = vadd.f32 %v4483_v8, %v3140_v40  ;;  %v4690_v32 = vadd.f32 %v8427_v2, %v4577_v58 }
 0x2cb   : > { %4879 = vst [vmem:[%s5936_s4 + $0x278] sm:$0xff] %v4783_v18  ;;  %v4785_v10 = vmax.f32 %v4689_v41, 0.0  ;;  %v4579_v59 = vadd.f32 %v4315_v36, %v2972_v38  ;;  %v4317_v37 = vpop.f32.mrf.mxu0  ;;  %v2984_v25 = vadd.f32 %v8547_v11, %v9335_v45  ;;  %v2986_v24 = vadd.f32 %v8554_v13, %v9336_v7  ;;  %v9337_v11 = vld [vmem:[#allocation15_spill] sm:$0xff] }
 0x2cc   : > { %v4799_v60 = vmax.f32 %v4703_v28, 0.0  ;;  %4886 = vst [vmem:[%s5936_s4 + $0x2b0] sm:$0xff] %v4790_v31  ;;  %v4697_v63 = vadd.f32 %v8563_v54, %v4584_v61  ;;  %v4786_v57 = vmax.f32 %v4690_v32, 0.0  ;;  %v4580_v26 = vadd.f32 %v4317_v37, %v2974_v4 }
 0x2cd   : > { %4881 = vst [vmem:[%s5936_s4 + $0x288] sm:$0xff] %v4785_v10  ;;  %v4692_v55 = vadd.f32 %v8420_v47, %v4579_v59  ;;  %v4319_v35 = vpop.f32.mrf.mxu0  ;;  %v2988_v46 = vadd.f32 %v8560_v50, %v9337_v11 }
 0x2ce   : > { %4895 = vst [vmem:[%s5936_s4 + $0x2f8] sm:$0xff] %v4799_v60  ;;  %v4793_v23 = vmax.f32 %v4697_v63, 0.0  ;;  %4882 = vst [vmem:[%s5936_s4 + $0x290] sm:$0xff] %v4786_v57  ;;  %v4693_v54 = vadd.f32 %v8427_v2, %v4580_v26  ;;  %v4582_v39 = vadd.f32 %v4319_v35, %v2976_v5 }
 0x2cf   : > { %v4788_v14 = vmax.f32 %v4692_v55, 0.0  ;;  %v4321_v51 = vpop.f32.mrf.mxu0 }
 0x2d0   : > { %4889 = vst [vmem:[%s5936_s4 + $0x2c8] sm:$0xff] %v4793_v23  ;;  %v4789_v42 = vmax.f32 %v4693_v54, 0.0  ;;  %v4695_v33 = vadd.f32 %v8420_v47, %v4582_v39  ;;  %v4583_v52 = vadd.f32 %v4321_v51, %v2978_v30 }
 0x2d1   : > { %4884 = vst [vmem:[%s5936_s4 + $0x2a0] sm:$0xff] %v4788_v14  ;;  %v4325_v16 = vpop.f32.mrf.mxu0 }
 0x2d2   : > { %4885 = vst [vmem:[%s5936_s4 + $0x2a8] sm:$0xff] %v4789_v42  ;;  %v4791_v49 = vmax.f32 %v4695_v33, 0.0  ;;  %v4696_v48 = vadd.f32 %v8427_v2, %v4583_v52  ;;  %v4585_v21 = vadd.f32 %v4325_v16, %v2982_v17 }
 0x2d3   : > { %v4327_v34 = vpop.f32.mrf.mxu0 }
 0x2d4   : > { %4887 = vst [vmem:[%s5936_s4 + $0x2b8] sm:$0xff] %v4791_v49  ;;  %v4792_v6 = vmax.f32 %v4696_v48, 0.0  ;;  %v4698_v1 = vadd.f32 %v8420_v47, %v4585_v21  ;;  %v4586_v12 = vadd.f32 %v4327_v34, %v2984_v25 }
 0x2d5   : > { %v4329_v27 = vpop.f32.mrf.mxu0 }
 0x2d6   : > { %4888 = vst [vmem:[%s5936_s4 + $0x2c0] sm:$0xff] %v4792_v6  ;;  %v4794_v62 = vmax.f32 %v4698_v1, 0.0  ;;  %v4699_v53 = vadd.f32 %v8427_v2, %v4586_v12  ;;  %v4588_v15 = vadd.f32 %v4329_v27, %v2986_v24 }
 0x2d7   : > { %v4331_v13 = vpop.f32.mrf.mxu0 }
 0x2d8   : > { %4890 = vst [vmem:[%s5936_s4 + $0x2d0] sm:$0xff] %v4794_v62  ;;  %v4795_v19 = vmax.f32 %v4699_v53, 0.0  ;;  %v4701_v44 = vadd.f32 %v8420_v47, %v4588_v15  ;;  %v4589_v40 = vadd.f32 %v4331_v13, %v2988_v46 }
 0x2da   : > { %4891 = vst [vmem:[%s5936_s4 + $0x2d8] sm:$0xff] %v4795_v19  ;;  %v4797_v29 = vmax.f32 %v4701_v44, 0.0  ;;  %v4702_v50 = vadd.f32 %v8427_v2, %v4589_v40 }
 0x2dc   : > { %4893 = vst [vmem:[%s5936_s4 + $0x2e8] sm:$0xff] %v4797_v29  ;;  %v4798_v38 = vmax.f32 %v4702_v50, 0.0 }
 0x2de   : > { %4894 = vst [vmem:[%s5936_s4 + $0x2f0] sm:$0xff] %v4798_v38 }
 0x2df   : > { %5801 = shalt.err (!%p5798_p4)
}
 0x2e0   : > { %s5802_s24 = scalar_lea.hbm %s8846_s25, 12288  ;;  %s5806_s7 = scalar_lea.hbm %s8897_s3, 24576 }
 0x2e1   : > { %p5803_p7 = scmp.ne.s32.totalorder %s8846_s25, %s5802_s24  ;;  %p5807_p10 = scmp.lt.s32.totalorder %s8846_s25, %s8897_s3 }
 0x2e2   : > { %p5808_p11 = scmp.lt.s32.totalorder %s5806_s7, %s5802_s24 }
 0x2e3   : > { %p5804_p8 = pnand %p5803_p7, %p5916_p5 }
 0x2e4   : > { %p5809_p12 = por %p5808_p11, %p5807_p10 }
 0x2e5   : > { %p5805_p9 = pneg %p5804_p8 }
 0x2e7   : > { %p5810_p13 = pnand %p5809_p12, %p5805_p9 }
 0x2e9   : > { %5813 = shalt.err (!%p5810_p13)
}
 0x2ea   : > { %s5856_s10 = smov 384   ;;  %s5857_s5 = smov 24  }
 0x2eb   : > { %5501 = dma.vmem_to_hbm [thread:$0]  (%p5916_p5), %s8849_s17, 12288, %s8846_s25, %s8854_s16, %s5856_s10, %s5856_s10, %s5857_s5  }
 0x2ec PF: > { %p5507_p0 = scmp.ge.s32.totalorder %s5848_s15, 2  ;;  %s4925_s6 = sand.u32 1, %s5836_s12  }
 0x2ed   : > { %s4926_s11 = scalar_lea.sflag [#allocation4], %s4925_s6 }
 0x2ee   : > { %p5504_p1 = pnand %p5507_p0, %p5920_p6 }
 0x2f0   : > { %p5505_p2 = pneg %p5504_p1 }
 0x2f2   : > { %5831 = dma.done.wait (%p5505_p2), %s4926_s11, 12288  }
 0x2f3   : > { %5833 = vsyncadd (%p5505_p2), %s4926_s11, 4294955008  ;;  %p13_p3 = scmp.ge.s32.totalorder %s5903_s18, 4   ;;  %s9338_s12 = smov %s5840_s13 }
 0x2f4   : > { %s9339_s13 = smov %s5844_s14  ;;  %s9340_s14 = smov %s5914_s21 }
 0x2f5   : > { %s9341_s15 = smov %s5903_s18  ;;  %15 = sbr.rel (!%p13_p3) target bundleno = 3 (0x3), region = 73 }
 0x2fa   :  { %4931 = vsyncpa [#allocation4], 1 }
 0x2fb   :  { %4933 = vsyncpa [#allocation4 + $0x1], 1 }

</bundles_post_ra>
